<compile_context>
chip_gen: v7x
topology: tpu7x:2x2x1
jax: 0.10.0
libtpu: 0.0.40
codegen_flags: <defaults>
</compile_context>

<pallas_src>
import jax
import jax.numpy as jnp
import numpy as np
from jax.experimental import pallas as pl
from jax.experimental.pallas import tpu as pltpu

LEAKY_SLOPE = 0.2
KSIZE = 5
CIN = 80
HIDDEN = 128
CODE_DIM = 64
N_RES = 6  # number of dilated residual convs
RECEPTIVE_FIELD = KSIZE + sum((KSIZE - 1) * 2 * (i % 3 + 1) for i in range(N_RES))  # 101


# ----------------------------------------------------------------------------
# Fused conv stack (conv0 + 6 residual convs) + temporal mean — one kernel
# ----------------------------------------------------------------------------
def _conv_stack_kernel(x_ref, w0_ref, b0_ref, wr_ref, br_ref, o_ref):
    # x_ref : (L_in, 128) bf16 (channels zero-padded 80 -> 128)
    # w0_ref: (5*128, 128)  bf16     b0_ref: (1, 128) f32
    # wr_ref: (6, 5*128, 128) bf16   br_ref: (6, 1, 128) f32
    # o_ref : (1, 128) f32  -- mean over time of the final activation
    x = x_ref[...]                                           # (L_in, 128) bf16
    L_in = x.shape[0]

    # ---- layer 0 (dilation 1): input-side im2col -> one K=640 MXU matmul ----
    L = L_in - (KSIZE - 1)
    xcol = jnp.concatenate([x[t:t + L, :] for t in range(KSIZE)], axis=1)   # (L, 640) bf16
    y = jnp.dot(xcol, w0_ref[...], preferred_element_type=jnp.float32) + b0_ref[...]
    a = jnp.where(y > 0, y, LEAKY_SLOPE * y)                 # (L, 128) f32, lane-dense

    # ---- 6 dilated residual conv layers, fully unrolled (static shapes) ----
    for i in range(N_RES):
        d = 2 * (i % 3 + 1)
        L_out = L - (KSIZE - 1) * d
        a_bf = a.astype(jnp.bfloat16)                        # single cast per layer
        # im2col: shifts happen on bf16, f32 live width stays 128 lanes
        xcol = jnp.concatenate(
            [a_bf[t * d:t * d + L_out, :] for t in range(KSIZE)], axis=1)   # (L_out, 640)
        y = jnp.dot(xcol, wr_ref[i], preferred_element_type=jnp.float32) + br_ref[i]
        conv_out = jnp.where(y > 0, y, LEAKY_SLOPE * y)      # (L_out, 128) f32
        # crop == (KSIZE-1)*d//2 == 2d (the center-tap offset); residual kept f32.
        crop = 2 * d
        a = (a[crop:crop + L_out, :] + conv_out) * 0.5       # residual average
        L = L_out

    # torch.mean(x, dim=-1)  (time axis)
    o_ref[...] = jnp.mean(a, axis=0, keepdims=True).astype(o_ref.dtype)


def conv_stack_mean(x_blc, kp):
    # x_blc: (B, L_in, 128) bf16 (channel-padded)  ->  (B, 128) f32
    B, L_in, C = x_blc.shape
    assert C == HIDDEN, "channels must be padded to 128 before the kernel"
    assert L_in >= RECEPTIVE_FIELD, (
        f"input length {L_in} shorter than receptive field {RECEPTIVE_FIELD}")
    out = pl.pallas_call(
        _conv_stack_kernel,
        out_shape=jax.ShapeDtypeStruct((B, 1, HIDDEN), jnp.float32),
        grid=(B,),
        in_specs=[
            pl.BlockSpec((None, L_in, C), lambda b: (b, 0, 0)),
            pl.BlockSpec((KSIZE * HIDDEN, HIDDEN), lambda b: (0, 0)),
            pl.BlockSpec((1, HIDDEN), lambda b: (0, 0)),
            pl.BlockSpec((N_RES, KSIZE * HIDDEN, HIDDEN), lambda b: (0, 0, 0)),
            pl.BlockSpec((N_RES, 1, HIDDEN), lambda b: (0, 0, 0)),
        ],
        out_specs=pl.BlockSpec((None, 1, HIDDEN), lambda b: (b, 0, 0)),
        compiler_params=pltpu.CompilerParams(dimension_semantics=("parallel",)),
    )(x_blc, kp["w0"], kp["b0"], kp["wr"], kp["br"])
    return out.reshape(B, HIDDEN)


# ----------------------------------------------------------------------------
# 2-layer LSTM (batch=1, seq=B) + Linear(128 -> 64), fused in one kernel
# ----------------------------------------------------------------------------
def _lstm_code_kernel(x_ref, wih0_ref, whh0_ref, w1_ref, b0_ref, b1_ref,
                      wc_ref, bc_ref, o_ref):
    # x_ref: (seq, 128) f32; weights bf16: wih0/whh0 (128,512), w1 (256,512),
    # wc (128,128 padded); biases f32: b0/b1 (1,512), bc (1,128 padded).
    H = HIDDEN
    seq = x_ref.shape[0]

    # Hoist layer-0 input projection out of the recurrence: one M=seq matmul.
    xproj = (jnp.dot(x_ref[...].astype(jnp.bfloat16), wih0_ref[...],
                     preferred_element_type=jnp.float32) + b0_ref[...])  # (seq, 4H)

    def gates_to_hc(g, c):
        i = jax.nn.sigmoid(g[:, 0:H])
        f = jax.nn.sigmoid(g[:, H:2 * H])
        gg = jnp.tanh(g[:, 2 * H:3 * H])
        o = jax.nn.sigmoid(g[:, 3 * H:4 * H])
        c_new = f * c + i * gg
        return o * jnp.tanh(c_new), c_new

    zeros = jnp.zeros((1, H), jnp.float32)
    h0, c0, h1, c1 = zeros, zeros, zeros, zeros
    h1_rows = []
    for t in range(seq):  # static unroll; seq == batch B (tiny)
        g0 = xproj[t:t + 1, :] + jnp.dot(h0.astype(jnp.bfloat16), whh0_ref[...],
                                         preferred_element_type=jnp.float32)
        h0, c0 = gates_to_hc(g0, c0)
        # layer 1: fuse the two gate matmuls -> one K=256 push
        xh = jnp.concatenate([h0, h1], axis=1).astype(jnp.bfloat16)   # (1, 2H)
        g1 = (jnp.dot(xh, w1_ref[...], preferred_element_type=jnp.float32)
              + b1_ref[...])
        h1, c1 = gates_to_hc(g1, c1)
        h1_rows.append(h1)

    # One lane-dense code projection for all timesteps (output padded to 128).
    h1_all = jnp.concatenate(h1_rows, axis=0)                          # (seq, H)
    o_ref[...] = (jnp.dot(h1_all.astype(jnp.bfloat16), wc_ref[...],
                          preferred_element_type=jnp.float32)
                  + bc_ref[...]).astype(o_ref.dtype)


def lstm_and_code(feat, kp):
    seq = feat.shape[0]
    vmem = pl.BlockSpec(memory_space=pltpu.MemorySpace.VMEM)
    out = pl.pallas_call(
        _lstm_code_kernel,
        out_shape=jax.ShapeDtypeStruct((seq, HIDDEN), jnp.float32),
        in_specs=[vmem] * 8,
        out_specs=vmem,
    )(feat, kp["wih0"], kp["whh0"], kp["w1"], kp["b0_lstm"], kp["b1_lstm"],
      kp["wc"], kp["bc"])
    return out[:, :CODE_DIM]   # slice in wrapper; kernel store stays lane-dense


# ----------------------------------------------------------------------------
# Full forward pass
# ----------------------------------------------------------------------------
def audio2pose_forward(audio_ncw, kp):
    # audio_ncw: (B, 80, L)  -- same layout PyTorch Conv1d consumes
    B, C_in, L = audio_ncw.shape
    x = jnp.transpose(audio_ncw, (0, 2, 1)).astype(jnp.bfloat16)   # (B, L, 80)
    x = jnp.pad(x, ((0, 0), (0, 0), (0, HIDDEN - C_in)))           # pad channels -> 128
    feat = conv_stack_mean(x, kp)       # (B, 128)   == torch.mean(conv_stack, -1)
    code = lstm_and_code(feat, kp)      # (B, 64)    LSTM sees batch=1, seq=B
    return code[None]                   # (1, B, 64)


# ----------------------------------------------------------------------------
# Parameter init (module shapes; synthetic values) + packing for the kernels
# ----------------------------------------------------------------------------
def init_params(key):
    keys = iter(jax.random.split(key, 32))
    params = {}

    def xavier(k, shape, fan_in, fan_out):
        bound = (6.0 / (fan_in + fan_out)) ** 0.5
        return jax.random.uniform(k, shape, jnp.float32, -bound, bound)

    # convert_dimensions: Conv1d(80, 128, 5); stored as (k, C_in, C_out)
    params["conv0_w"] = xavier(next(keys), (KSIZE, CIN, HIDDEN), CIN * KSIZE, HIDDEN * KSIZE)
    params["conv0_b"] = jnp.full((1, HIDDEN), 0.01, jnp.float32)
    for i in range(N_RES):
        params[f"conv{i + 1}_w"] = xavier(next(keys), (KSIZE, HIDDEN, HIDDEN),
                                          HIDDEN * KSIZE, HIDDEN * KSIZE)
        params[f"conv{i + 1}_b"] = jnp.full((1, HIDDEN), 0.01, jnp.float32)

    # LSTM(128 -> 128, 2 layers): W stored transposed (in, 4H); b = b_ih + b_hh.
    s = 1.0 / (HIDDEN ** 0.5)

    def unif(k, shape):
        return jax.random.uniform(k, shape, jnp.float32, -s, s)

    params["wih0"] = unif(next(keys), (HIDDEN, 4 * HIDDEN))
    params["whh0"] = unif(next(keys), (HIDDEN, 4 * HIDDEN))
    params["b0"] = unif(next(keys), (1, 4 * HIDDEN)) + unif(next(keys), (1, 4 * HIDDEN))
    params["wih1"] = unif(next(keys), (HIDDEN, 4 * HIDDEN))
    params["whh1"] = unif(next(keys), (HIDDEN, 4 * HIDDEN))
    params["b1"] = unif(next(keys), (1, 4 * HIDDEN)) + unif(next(keys), (1, 4 * HIDDEN))

    # code: Linear(128, 64); stored transposed (128, 64)
    sc = 1.0 / (HIDDEN ** 0.5)
    params["wc"] = jax.random.uniform(next(keys), (HIDDEN, CODE_DIM), jnp.float32, -sc, sc)
    params["bc"] = jax.random.uniform(next(keys), (1, CODE_DIM), jnp.float32, -sc, sc)
    return params


def pack_params(p):
    """Repack f32 module params into the kernel layouts (bf16 weights)."""
    def im2col_w(w, cin_pad=None):
        # (k, Cin, Cout) -> (k*Cin_pad, Cout); rows [t*Cin_pad:(t+1)*Cin_pad] = tap t
        k, cin, cout = w.shape
        if cin_pad is not None and cin_pad > cin:
            w = jnp.pad(w, ((0, 0), (0, cin_pad - cin), (0, 0)))
        return w.reshape(-1, cout).astype(jnp.bfloat16)

    kp = {
        "w0": im2col_w(p["conv0_w"], cin_pad=HIDDEN),                          # (640, 128) bf16
        "b0": p["conv0_b"],                                                    # (1, 128)  f32
        "wr": jnp.stack([im2col_w(p[f"conv{i + 1}_w"]) for i in range(N_RES)]),  # (6,640,128)
        "br": jnp.stack([p[f"conv{i + 1}_b"] for i in range(N_RES)]),            # (6,1,128)
        "wih0": p["wih0"].astype(jnp.bfloat16),                                # (128, 512)
        "whh0": p["whh0"].astype(jnp.bfloat16),                                # (128, 512)
        "w1": jnp.concatenate([p["wih1"], p["whh1"]], axis=0).astype(jnp.bfloat16),  # (256,512)
        "b0_lstm": p["b0"],                                                    # (1, 512) f32
        "b1_lstm": p["b1"],                                                    # (1, 512) f32
        "wc": jnp.pad(p["wc"], ((0, 0), (0, HIDDEN - CODE_DIM))).astype(jnp.bfloat16),  # (128,128)
        "bc": jnp.pad(p["bc"], ((0, 0), (0, HIDDEN - CODE_DIM))),              # (1, 128) f32
    }
    return kp


# ----------------------------------------------------------------------------
# Pure-JAX reference (same math / same bf16-operand + f32-accumulate precision)
# ----------------------------------------------------------------------------
def ref_forward(audio_ncw, params):
    x = jnp.transpose(audio_ncw, (0, 2, 1)).astype(jnp.float32)

    def conv(x, w, b, d, residual):
        k = w.shape[0]
        L_out = x.shape[1] - (k - 1) * d
        y = jnp.zeros((x.shape[0], L_out, w.shape[2]), jnp.float32) + b
        xb = x.astype(jnp.bfloat16)
        wb = w.astype(jnp.bfloat16)
        for t in range(k):
            y = y + jnp.einsum("blc,cd->bld", xb[:, t * d:t * d + L_out, :], wb[t],
                               preferred_element_type=jnp.float32)
        y = jnp.where(y > 0, y, LEAKY_SLOPE * y)
        if residual:
            crop = (k - 1) * d // 2
            y = (x[:, crop:crop + L_out, :] + y) * 0.5
        return y

    x = conv(x, params["conv0_w"], params["conv0_b"], 1, False)
    for i in range(N_RES):
        d = 2 * (i % 3 + 1)
        x = conv(x, params[f"conv{i + 1}_w"], params[f"conv{i + 1}_b"], d, True)
    x = jnp.mean(x, axis=1)  # (B, 128)

    def cell(x_t, h, c, wih, whh, b):
        H = HIDDEN
        g = (jnp.dot(x_t.astype(jnp.bfloat16), wih.astype(jnp.bfloat16),
                     preferred_element_type=jnp.float32)
             + jnp.dot(h.astype(jnp.bfloat16), whh.astype(jnp.bfloat16),
                       preferred_element_type=jnp.float32)
             + b)
        i = jax.nn.sigmoid(g[:, :H]); f = jax.nn.sigmoid(g[:, H:2 * H])
        gg = jnp.tanh(g[:, 2 * H:3 * H]); o = jax.nn.sigmoid(g[:, 3 * H:])
        c_new = f * c + i * gg
        return o * jnp.tanh(c_new), c_new

    h0 = c0 = h1 = c1 = jnp.zeros((1, HIDDEN), jnp.float32)
    outs = []
    for t in range(x.shape[0]):
        xt = x[t:t + 1]
        h0, c0 = cell(xt, h0, c0, params["wih0"], params["whh0"], params["b0"])
        h1, c1 = cell(h0, h1, c1, params["wih1"], params["whh1"], params["b1"])
        outs.append((jnp.dot(h1.astype(jnp.bfloat16), params["wc"].astype(jnp.bfloat16),
                             preferred_element_type=jnp.float32) + params["bc"])[0])
    return jnp.stack(outs, axis=0)[None]


if __name__ == "__main__":
    key = jax.random.PRNGKey(0)
    k_audio, k_params = jax.random.split(key)

    B, C_IN, L = 2, 80, 116   # L=116 > receptive field 101 -> final conv length 16
    audio = jax.random.normal(k_audio, (B, C_IN, L), jnp.float32)
    params = init_params(k_params)
    kparams = pack_params(params)

    out = audio2pose_forward(audio, kparams)
    out = jax.block_until_ready(out)
    assert out.shape == (1, B, CODE_DIM)

    ref = ref_forward(audio, params)
    np.testing.assert_allclose(np.asarray(out), np.asarray(ref), rtol=2e-3, atol=2e-3)

    print("KERNEL_OK")
</pallas_src>

<mosaic_0001>
module attributes {stable_mosaic.version = 11 : i64} {
  func.func @_conv_stack_kernel(%arg0: i32, %arg1: memref<1x116x128xbf16, #tpu.memory_space<vmem>>, %arg2: memref<640x128xbf16, #tpu.memory_space<vmem>>, %arg3: memref<1x128xf32, #tpu.memory_space<vmem>>, %arg4: memref<6x640x128xbf16, #tpu.memory_space<vmem>>, %arg5: memref<6x1x128xf32, #tpu.memory_space<vmem>>, %arg6: memref<1x1x128xf32, #tpu.memory_space<vmem>>) attributes {dimension_semantics = [#tpu.dimension_semantics<parallel>], iteration_bounds = array<i64: 2>, scalar_prefetch = 0 : i64, scratch_operands = 0 : i64, tpu.core_type = #tpu.core_type<tc>, window_params = [{transform_indices = @transform_0, window_bounds = array<i64: 1, 116, 128>}, {pipeline_mode = #tpu.pipeline_mode<synchronous>, transform_indices = @transform_1, window_bounds = array<i64: 640, 128>}, {pipeline_mode = #tpu.pipeline_mode<synchronous>, transform_indices = @transform_2, window_bounds = array<i64: 1, 128>}, {pipeline_mode = #tpu.pipeline_mode<synchronous>, transform_indices = @transform_3, window_bounds = array<i64: 6, 640, 128>}, {pipeline_mode = #tpu.pipeline_mode<synchronous>, transform_indices = @transform_4, window_bounds = array<i64: 6, 1, 128>}, {transform_indices = @transform_5, window_bounds = array<i64: 1, 1, 128>}]} {
    %c0 = arith.constant 0 : index
    %c0_0 = arith.constant 0 : index
    %c0_1 = arith.constant 0 : index
    %0 = vector.load %arg1[%c0, %c0_0, %c0_1] : memref<1x116x128xbf16, #tpu.memory_space<vmem>>, vector<1x116x128xbf16>
    %1 = vector.shape_cast %0 : vector<1x116x128xbf16> to vector<116x128xbf16>
    %2 = vector.extract_strided_slice %1 {offsets = [0, 0], sizes = [112, 128], strides = [1, 1]} : vector<116x128xbf16> to vector<112x128xbf16>
    %3 = vector.extract_strided_slice %1 {offsets = [1, 0], sizes = [112, 128], strides = [1, 1]} : vector<116x128xbf16> to vector<112x128xbf16>
    %4 = vector.extract_strided_slice %1 {offsets = [2, 0], sizes = [112, 128], strides = [1, 1]} : vector<116x128xbf16> to vector<112x128xbf16>
    %5 = vector.extract_strided_slice %1 {offsets = [3, 0], sizes = [112, 128], strides = [1, 1]} : vector<116x128xbf16> to vector<112x128xbf16>
    %6 = vector.extract_strided_slice %1 {offsets = [4, 0], sizes = [112, 128], strides = [1, 1]} : vector<116x128xbf16> to vector<112x128xbf16>
    %7 = tpu.concatenate %2, %3, %4, %5, %6 in 1 : vector<112x128xbf16>, vector<112x128xbf16>, vector<112x128xbf16>, vector<112x128xbf16>, vector<112x128xbf16> -> vector<112x640xbf16>
    %c0_2 = arith.constant 0 : index
    %c0_3 = arith.constant 0 : index
    %8 = vector.load %arg2[%c0_2, %c0_3] : memref<640x128xbf16, #tpu.memory_space<vmem>>, vector<640x128xbf16>
    %cst = arith.constant dense<0.000000e+00> : vector<112x128xf32>
    %9 = tpu.matmul %7, %8, %cst {dimension_numbers = #tpu.dot_dimension_numbers<[1], [0], [0], [1], [0, 0, 1, 1], [], []>} : vector<112x640xbf16>, vector<640x128xbf16>, vector<112x128xf32> -> vector<112x128xf32>
    %c0_4 = arith.constant 0 : index
    %c0_5 = arith.constant 0 : index
    %10 = vector.load %arg3[%c0_4, %c0_5] : memref<1x128xf32, #tpu.memory_space<vmem>>, vector<1x128xf32>
    %11 = vector.broadcast %10 : vector<1x128xf32> to vector<112x128xf32>
    %12 = arith.addf %9, %11 : vector<112x128xf32>
    %cst_6 = arith.constant 0.000000e+00 : f32
    %13 = vector.broadcast %cst_6 : f32 to vector<112x128xf32>
    %14 = arith.cmpf ogt, %12, %13 : vector<112x128xf32>
    %cst_7 = arith.constant 2.000000e-01 : f32
    %15 = vector.broadcast %cst_7 : f32 to vector<112x128xf32>
    %16 = arith.mulf %15, %12 : vector<112x128xf32>
    %17 = arith.select %14, %12, %16 : vector<112x128xi1>, vector<112x128xf32>
    %18 = arith.truncf %17 : vector<112x128xf32> to vector<112x128xbf16>
    %19 = vector.extract_strided_slice %18 {offsets = [0, 0], sizes = [104, 128], strides = [1, 1]} : vector<112x128xbf16> to vector<104x128xbf16>
    %20 = vector.extract_strided_slice %18 {offsets = [2, 0], sizes = [104, 128], strides = [1, 1]} : vector<112x128xbf16> to vector<104x128xbf16>
    %21 = vector.extract_strided_slice %18 {offsets = [4, 0], sizes = [104, 128], strides = [1, 1]} : vector<112x128xbf16> to vector<104x128xbf16>
    %22 = vector.extract_strided_slice %18 {offsets = [6, 0], sizes = [104, 128], strides = [1, 1]} : vector<112x128xbf16> to vector<104x128xbf16>
    %23 = vector.extract_strided_slice %18 {offsets = [8, 0], sizes = [104, 128], strides = [1, 1]} : vector<112x128xbf16> to vector<104x128xbf16>
    %24 = tpu.concatenate %19, %20, %21, %22, %23 in 1 : vector<104x128xbf16>, vector<104x128xbf16>, vector<104x128xbf16>, vector<104x128xbf16>, vector<104x128xbf16> -> vector<104x640xbf16>
    %c0_8 = arith.constant 0 : index
    %c0_9 = arith.constant 0 : index
    %c0_10 = arith.constant 0 : index
    %25 = vector.load %arg4[%c0_8, %c0_9, %c0_10] : memref<6x640x128xbf16, #tpu.memory_space<vmem>>, vector<1x640x128xbf16>
    %26 = vector.shape_cast %25 : vector<1x640x128xbf16> to vector<640x128xbf16>
    %cst_11 = arith.constant dense<0.000000e+00> : vector<104x128xf32>
    %27 = tpu.matmul %24, %26, %cst_11 {dimension_numbers = #tpu.dot_dimension_numbers<[1], [0], [0], [1], [0, 0, 1, 1], [], []>} : vector<104x640xbf16>, vector<640x128xbf16>, vector<104x128xf32> -> vector<104x128xf32>
    %c0_12 = arith.constant 0 : index
    %c0_13 = arith.constant 0 : index
    %c0_14 = arith.constant 0 : index
    %28 = vector.load %arg5[%c0_12, %c0_13, %c0_14] : memref<6x1x128xf32, #tpu.memory_space<vmem>>, vector<1x1x128xf32>
    %29 = vector.shape_cast %28 : vector<1x1x128xf32> to vector<1x128xf32>
    %30 = vector.broadcast %29 : vector<1x128xf32> to vector<104x128xf32>
    %31 = arith.addf %27, %30 : vector<104x128xf32>
    %cst_15 = arith.constant 0.000000e+00 : f32
    %32 = vector.broadcast %cst_15 : f32 to vector<104x128xf32>
    %33 = arith.cmpf ogt, %31, %32 : vector<104x128xf32>
    %cst_16 = arith.constant 2.000000e-01 : f32
    %34 = vector.broadcast %cst_16 : f32 to vector<104x128xf32>
    %35 = arith.mulf %34, %31 : vector<104x128xf32>
    %36 = arith.select %33, %31, %35 : vector<104x128xi1>, vector<104x128xf32>
    %37 = vector.extract_strided_slice %17 {offsets = [4, 0], sizes = [104, 128], strides = [1, 1]} : vector<112x128xf32> to vector<104x128xf32>
    %38 = arith.addf %37, %36 : vector<104x128xf32>
    %cst_17 = arith.constant 5.000000e-01 : f32
    %39 = vector.broadcast %cst_17 : f32 to vector<104x128xf32>
    %40 = arith.mulf %38, %39 : vector<104x128xf32>
    %41 = arith.truncf %40 : vector<104x128xf32> to vector<104x128xbf16>
    %42 = vector.extract_strided_slice %41 {offsets = [0, 0], sizes = [88, 128], strides = [1, 1]} : vector<104x128xbf16> to vector<88x128xbf16>
    %43 = vector.extract_strided_slice %41 {offsets = [4, 0], sizes = [88, 128], strides = [1, 1]} : vector<104x128xbf16> to vector<88x128xbf16>
    %44 = vector.extract_strided_slice %41 {offsets = [8, 0], sizes = [88, 128], strides = [1, 1]} : vector<104x128xbf16> to vector<88x128xbf16>
    %45 = vector.extract_strided_slice %41 {offsets = [12, 0], sizes = [88, 128], strides = [1, 1]} : vector<104x128xbf16> to vector<88x128xbf16>
    %46 = vector.extract_strided_slice %41 {offsets = [16, 0], sizes = [88, 128], strides = [1, 1]} : vector<104x128xbf16> to vector<88x128xbf16>
    %47 = tpu.concatenate %42, %43, %44, %45, %46 in 1 : vector<88x128xbf16>, vector<88x128xbf16>, vector<88x128xbf16>, vector<88x128xbf16>, vector<88x128xbf16> -> vector<88x640xbf16>
    %c1 = arith.constant 1 : index
    %c0_18 = arith.constant 0 : index
    %c0_19 = arith.constant 0 : index
    %48 = vector.load %arg4[%c1, %c0_18, %c0_19] : memref<6x640x128xbf16, #tpu.memory_space<vmem>>, vector<1x640x128xbf16>
    %49 = vector.shape_cast %48 : vector<1x640x128xbf16> to vector<640x128xbf16>
    %cst_20 = arith.constant dense<0.000000e+00> : vector<88x128xf32>
    %50 = tpu.matmul %47, %49, %cst_20 {dimension_numbers = #tpu.dot_dimension_numbers<[1], [0], [0], [1], [0, 0, 1, 1], [], []>} : vector<88x640xbf16>, vector<640x128xbf16>, vector<88x128xf32> -> vector<88x128xf32>
    %c1_21 = arith.constant 1 : index
    %c0_22 = arith.constant 0 : index
    %c0_23 = arith.constant 0 : index
    %51 = vector.load %arg5[%c1_21, %c0_22, %c0_23] : memref<6x1x128xf32, #tpu.memory_space<vmem>>, vector<1x1x128xf32>
    %52 = vector.shape_cast %51 : vector<1x1x128xf32> to vector<1x128xf32>
    %53 = vector.broadcast %52 : vector<1x128xf32> to vector<88x128xf32>
    %54 = arith.addf %50, %53 : vector<88x128xf32>
    %cst_24 = arith.constant 0.000000e+00 : f32
    %55 = vector.broadcast %cst_24 : f32 to vector<88x128xf32>
    %56 = arith.cmpf ogt, %54, %55 : vector<88x128xf32>
    %cst_25 = arith.constant 2.000000e-01 : f32
    %57 = vector.broadcast %cst_25 : f32 to vector<88x128xf32>
    %58 = arith.mulf %57, %54 : vector<88x128xf32>
    %59 = arith.select %56, %54, %58 : vector<88x128xi1>, vector<88x128xf32>
    %60 = vector.extract_strided_slice %40 {offsets = [8, 0], sizes = [88, 128], strides = [1, 1]} : vector<104x128xf32> to vector<88x128xf32>
    %61 = arith.addf %60, %59 : vector<88x128xf32>
    %cst_26 = arith.constant 5.000000e-01 : f32
    %62 = vector.broadcast %cst_26 : f32 to vector<88x128xf32>
    %63 = arith.mulf %61, %62 : vector<88x128xf32>
    %64 = arith.truncf %63 : vector<88x128xf32> to vector<88x128xbf16>
    %65 = vector.extract_strided_slice %64 {offsets = [0, 0], sizes = [64, 128], strides = [1, 1]} : vector<88x128xbf16> to vector<64x128xbf16>
    %66 = vector.extract_strided_slice %64 {offsets = [6, 0], sizes = [64, 128], strides = [1, 1]} : vector<88x128xbf16> to vector<64x128xbf16>
    %67 = vector.extract_strided_slice %64 {offsets = [12, 0], sizes = [64, 128], strides = [1, 1]} : vector<88x128xbf16> to vector<64x128xbf16>
    %68 = vector.extract_strided_slice %64 {offsets = [18, 0], sizes = [64, 128], strides = [1, 1]} : vector<88x128xbf16> to vector<64x128xbf16>
    %69 = vector.extract_strided_slice %64 {offsets = [24, 0], sizes = [64, 128], strides = [1, 1]} : vector<88x128xbf16> to vector<64x128xbf16>
    %70 = tpu.concatenate %65, %66, %67, %68, %69 in 1 : vector<64x128xbf16>, vector<64x128xbf16>, vector<64x128xbf16>, vector<64x128xbf16>, vector<64x128xbf16> -> vector<64x640xbf16>
    %c2 = arith.constant 2 : index
    %c0_27 = arith.constant 0 : index
    %c0_28 = arith.constant 0 : index
    %71 = vector.load %arg4[%c2, %c0_27, %c0_28] : memref<6x640x128xbf16, #tpu.memory_space<vmem>>, vector<1x640x128xbf16>
    %72 = vector.shape_cast %71 : vector<1x640x128xbf16> to vector<640x128xbf16>
    %cst_29 = arith.constant dense<0.000000e+00> : vector<64x128xf32>
    %73 = tpu.matmul %70, %72, %cst_29 {dimension_numbers = #tpu.dot_dimension_numbers<[1], [0], [0], [1], [0, 0, 1, 1], [], []>} : vector<64x640xbf16>, vector<640x128xbf16>, vector<64x128xf32> -> vector<64x128xf32>
    %c2_30 = arith.constant 2 : index
    %c0_31 = arith.constant 0 : index
    %c0_32 = arith.constant 0 : index
    %74 = vector.load %arg5[%c2_30, %c0_31, %c0_32] : memref<6x1x128xf32, #tpu.memory_space<vmem>>, vector<1x1x128xf32>
    %75 = vector.shape_cast %74 : vector<1x1x128xf32> to vector<1x128xf32>
    %76 = vector.broadcast %75 : vector<1x128xf32> to vector<64x128xf32>
    %77 = arith.addf %73, %76 : vector<64x128xf32>
    %cst_33 = arith.constant 0.000000e+00 : f32
    %78 = vector.broadcast %cst_33 : f32 to vector<64x128xf32>
    %79 = arith.cmpf ogt, %77, %78 : vector<64x128xf32>
    %cst_34 = arith.constant 2.000000e-01 : f32
    %80 = vector.broadcast %cst_34 : f32 to vector<64x128xf32>
    %81 = arith.mulf %80, %77 : vector<64x128xf32>
    %82 = arith.select %79, %77, %81 : vector<64x128xi1>, vector<64x128xf32>
    %83 = vector.extract_strided_slice %63 {offsets = [12, 0], sizes = [64, 128], strides = [1, 1]} : vector<88x128xf32> to vector<64x128xf32>
    %84 = arith.addf %83, %82 : vector<64x128xf32>
    %cst_35 = arith.constant 5.000000e-01 : f32
    %85 = vector.broadcast %cst_35 : f32 to vector<64x128xf32>
    %86 = arith.mulf %84, %85 : vector<64x128xf32>
    %87 = arith.truncf %86 : vector<64x128xf32> to vector<64x128xbf16>
    %88 = vector.extract_strided_slice %87 {offsets = [0, 0], sizes = [56, 128], strides = [1, 1]} : vector<64x128xbf16> to vector<56x128xbf16>
    %89 = vector.extract_strided_slice %87 {offsets = [2, 0], sizes = [56, 128], strides = [1, 1]} : vector<64x128xbf16> to vector<56x128xbf16>
    %90 = vector.extract_strided_slice %87 {offsets = [4, 0], sizes = [56, 128], strides = [1, 1]} : vector<64x128xbf16> to vector<56x128xbf16>
    %91 = vector.extract_strided_slice %87 {offsets = [6, 0], sizes = [56, 128], strides = [1, 1]} : vector<64x128xbf16> to vector<56x128xbf16>
    %92 = vector.extract_strided_slice %87 {offsets = [8, 0], sizes = [56, 128], strides = [1, 1]} : vector<64x128xbf16> to vector<56x128xbf16>
    %93 = tpu.concatenate %88, %89, %90, %91, %92 in 1 : vector<56x128xbf16>, vector<56x128xbf16>, vector<56x128xbf16>, vector<56x128xbf16>, vector<56x128xbf16> -> vector<56x640xbf16>
    %c3 = arith.constant 3 : index
    %c0_36 = arith.constant 0 : index
    %c0_37 = arith.constant 0 : index
    %94 = vector.load %arg4[%c3, %c0_36, %c0_37] : memref<6x640x128xbf16, #tpu.memory_space<vmem>>, vector<1x640x128xbf16>
    %95 = vector.shape_cast %94 : vector<1x640x128xbf16> to vector<640x128xbf16>
    %cst_38 = arith.constant dense<0.000000e+00> : vector<56x128xf32>
    %96 = tpu.matmul %93, %95, %cst_38 {dimension_numbers = #tpu.dot_dimension_numbers<[1], [0], [0], [1], [0, 0, 1, 1], [], []>} : vector<56x640xbf16>, vector<640x128xbf16>, vector<56x128xf32> -> vector<56x128xf32>
    %c3_39 = arith.constant 3 : index
    %c0_40 = arith.constant 0 : index
    %c0_41 = arith.constant 0 : index
    %97 = vector.load %arg5[%c3_39, %c0_40, %c0_41] : memref<6x1x128xf32, #tpu.memory_space<vmem>>, vector<1x1x128xf32>
    %98 = vector.shape_cast %97 : vector<1x1x128xf32> to vector<1x128xf32>
    %99 = vector.broadcast %98 : vector<1x128xf32> to vector<56x128xf32>
    %100 = arith.addf %96, %99 : vector<56x128xf32>
    %cst_42 = arith.constant 0.000000e+00 : f32
    %101 = vector.broadcast %cst_42 : f32 to vector<56x128xf32>
    %102 = arith.cmpf ogt, %100, %101 : vector<56x128xf32>
    %cst_43 = arith.constant 2.000000e-01 : f32
    %103 = vector.broadcast %cst_43 : f32 to vector<56x128xf32>
    %104 = arith.mulf %103, %100 : vector<56x128xf32>
    %105 = arith.select %102, %100, %104 : vector<56x128xi1>, vector<56x128xf32>
    %106 = vector.extract_strided_slice %86 {offsets = [4, 0], sizes = [56, 128], strides = [1, 1]} : vector<64x128xf32> to vector<56x128xf32>
    %107 = arith.addf %106, %105 : vector<56x128xf32>
    %cst_44 = arith.constant 5.000000e-01 : f32
    %108 = vector.broadcast %cst_44 : f32 to vector<56x128xf32>
    %109 = arith.mulf %107, %108 : vector<56x128xf32>
    %110 = arith.truncf %109 : vector<56x128xf32> to vector<56x128xbf16>
    %111 = vector.extract_strided_slice %110 {offsets = [0, 0], sizes = [40, 128], strides = [1, 1]} : vector<56x128xbf16> to vector<40x128xbf16>
    %112 = vector.extract_strided_slice %110 {offsets = [4, 0], sizes = [40, 128], strides = [1, 1]} : vector<56x128xbf16> to vector<40x128xbf16>
    %113 = vector.extract_strided_slice %110 {offsets = [8, 0], sizes = [40, 128], strides = [1, 1]} : vector<56x128xbf16> to vector<40x128xbf16>
    %114 = vector.extract_strided_slice %110 {offsets = [12, 0], sizes = [40, 128], strides = [1, 1]} : vector<56x128xbf16> to vector<40x128xbf16>
    %115 = vector.extract_strided_slice %110 {offsets = [16, 0], sizes = [40, 128], strides = [1, 1]} : vector<56x128xbf16> to vector<40x128xbf16>
    %116 = tpu.concatenate %111, %112, %113, %114, %115 in 1 : vector<40x128xbf16>, vector<40x128xbf16>, vector<40x128xbf16>, vector<40x128xbf16>, vector<40x128xbf16> -> vector<40x640xbf16>
    %c4 = arith.constant 4 : index
    %c0_45 = arith.constant 0 : index
    %c0_46 = arith.constant 0 : index
    %117 = vector.load %arg4[%c4, %c0_45, %c0_46] : memref<6x640x128xbf16, #tpu.memory_space<vmem>>, vector<1x640x128xbf16>
    %118 = vector.shape_cast %117 : vector<1x640x128xbf16> to vector<640x128xbf16>
    %cst_47 = arith.constant dense<0.000000e+00> : vector<40x128xf32>
    %119 = tpu.matmul %116, %118, %cst_47 {dimension_numbers = #tpu.dot_dimension_numbers<[1], [0], [0], [1], [0, 0, 1, 1], [], []>} : vector<40x640xbf16>, vector<640x128xbf16>, vector<40x128xf32> -> vector<40x128xf32>
    %c4_48 = arith.constant 4 : index
    %c0_49 = arith.constant 0 : index
    %c0_50 = arith.constant 0 : index
    %120 = vector.load %arg5[%c4_48, %c0_49, %c0_50] : memref<6x1x128xf32, #tpu.memory_space<vmem>>, vector<1x1x128xf32>
    %121 = vector.shape_cast %120 : vector<1x1x128xf32> to vector<1x128xf32>
    %122 = vector.broadcast %121 : vector<1x128xf32> to vector<40x128xf32>
    %123 = arith.addf %119, %122 : vector<40x128xf32>
    %cst_51 = arith.constant 0.000000e+00 : f32
    %124 = vector.broadcast %cst_51 : f32 to vector<40x128xf32>
    %125 = arith.cmpf ogt, %123, %124 : vector<40x128xf32>
    %cst_52 = arith.constant 2.000000e-01 : f32
    %126 = vector.broadcast %cst_52 : f32 to vector<40x128xf32>
    %127 = arith.mulf %126, %123 : vector<40x128xf32>
    %128 = arith.select %125, %123, %127 : vector<40x128xi1>, vector<40x128xf32>
    %129 = vector.extract_strided_slice %109 {offsets = [8, 0], sizes = [40, 128], strides = [1, 1]} : vector<56x128xf32> to vector<40x128xf32>
    %130 = arith.addf %129, %128 : vector<40x128xf32>
    %cst_53 = arith.constant 5.000000e-01 : f32
    %131 = vector.broadcast %cst_53 : f32 to vector<40x128xf32>
    %132 = arith.mulf %130, %131 : vector<40x128xf32>
    %133 = arith.truncf %132 : vector<40x128xf32> to vector<40x128xbf16>
    %134 = vector.extract_strided_slice %133 {offsets = [0, 0], sizes = [16, 128], strides = [1, 1]} : vector<40x128xbf16> to vector<16x128xbf16>
    %135 = vector.extract_strided_slice %133 {offsets = [6, 0], sizes = [16, 128], strides = [1, 1]} : vector<40x128xbf16> to vector<16x128xbf16>
    %136 = vector.extract_strided_slice %133 {offsets = [12, 0], sizes = [16, 128], strides = [1, 1]} : vector<40x128xbf16> to vector<16x128xbf16>
    %137 = vector.extract_strided_slice %133 {offsets = [18, 0], sizes = [16, 128], strides = [1, 1]} : vector<40x128xbf16> to vector<16x128xbf16>
    %138 = vector.extract_strided_slice %133 {offsets = [24, 0], sizes = [16, 128], strides = [1, 1]} : vector<40x128xbf16> to vector<16x128xbf16>
    %139 = tpu.concatenate %134, %135, %136, %137, %138 in 1 : vector<16x128xbf16>, vector<16x128xbf16>, vector<16x128xbf16>, vector<16x128xbf16>, vector<16x128xbf16> -> vector<16x640xbf16>
    %c5 = arith.constant 5 : index
    %c0_54 = arith.constant 0 : index
    %c0_55 = arith.constant 0 : index
    %140 = vector.load %arg4[%c5, %c0_54, %c0_55] : memref<6x640x128xbf16, #tpu.memory_space<vmem>>, vector<1x640x128xbf16>
    %141 = vector.shape_cast %140 : vector<1x640x128xbf16> to vector<640x128xbf16>
    %cst_56 = arith.constant dense<0.000000e+00> : vector<16x128xf32>
    %142 = tpu.matmul %139, %141, %cst_56 {dimension_numbers = #tpu.dot_dimension_numbers<[1], [0], [0], [1], [0, 0, 1, 1], [], []>} : vector<16x640xbf16>, vector<640x128xbf16>, vector<16x128xf32> -> vector<16x128xf32>
    %c5_57 = arith.constant 5 : index
    %c0_58 = arith.constant 0 : index
    %c0_59 = arith.constant 0 : index
    %143 = vector.load %arg5[%c5_57, %c0_58, %c0_59] : memref<6x1x128xf32, #tpu.memory_space<vmem>>, vector<1x1x128xf32>
    %144 = vector.shape_cast %143 : vector<1x1x128xf32> to vector<1x128xf32>
    %145 = vector.broadcast %144 : vector<1x128xf32> to vector<16x128xf32>
    %146 = arith.addf %142, %145 : vector<16x128xf32>
    %cst_60 = arith.constant 0.000000e+00 : f32
    %147 = vector.broadcast %cst_60 : f32 to vector<16x128xf32>
    %148 = arith.cmpf ogt, %146, %147 : vector<16x128xf32>
    %cst_61 = arith.constant 2.000000e-01 : f32
    %149 = vector.broadcast %cst_61 : f32 to vector<16x128xf32>
    %150 = arith.mulf %149, %146 : vector<16x128xf32>
    %151 = arith.select %148, %146, %150 : vector<16x128xi1>, vector<16x128xf32>
    %152 = vector.extract_strided_slice %132 {offsets = [12, 0], sizes = [16, 128], strides = [1, 1]} : vector<40x128xf32> to vector<16x128xf32>
    %153 = arith.addf %152, %151 : vector<16x128xf32>
    %cst_62 = arith.constant 5.000000e-01 : f32
    %154 = vector.broadcast %cst_62 : f32 to vector<16x128xf32>
    %155 = arith.mulf %153, %154 : vector<16x128xf32>
    %cst_63 = arith.constant dense<0.000000e+00> : vector<128xf32>
    %156 = vector.multi_reduction <add>, %155, %cst_63 [0] : vector<16x128xf32> to vector<128xf32>
    %157 = vector.shape_cast %156 : vector<128xf32> to vector<1x128xf32>
    %cst_64 = arith.constant 1.600000e+01 : f32
    %158 = vector.broadcast %cst_64 : f32 to vector<1x128xf32>
    %159 = arith.divf %157, %158 : vector<1x128xf32>
    %c0_65 = arith.constant 0 : index
    %c0_66 = arith.constant 0 : index
    %c0_67 = arith.constant 0 : index
    %160 = vector.load %arg6[%c0_65, %c0_66, %c0_67] : memref<1x1x128xf32, #tpu.memory_space<vmem>>, vector<1x1x128xf32>
    %161 = vector.shape_cast %160 : vector<1x1x128xf32> to vector<1x128xf32>
    %162 = vector.shape_cast %159 : vector<1x128xf32> to vector<1x1x128xf32>
    tpu.vector_store %arg6[%c0_65, %c0_66, %c0_67], %162 {strides = array<i32>} : memref<1x1x128xf32, #tpu.memory_space<vmem>>, vector<1x1x128xf32>,
    return
  }
  func.func @transform_0(%arg0: i32) -> (i32, i32, i32) {
    %c0_i32 = arith.constant 0 : i32
    %c0_i32_0 = arith.constant 0 : i32
    %c0_i32_1 = arith.constant 0 : i32
    return %arg0, %c0_i32, %c0_i32_0 : i32, i32, i32
  }
  func.func @transform_1(%arg0: i32) -> (i32, i32) {
    %c0_i32 = arith.constant 0 : i32
    %c0_i32_0 = arith.constant 0 : i32
    %c0_i32_1 = arith.constant 0 : i32
    return %c0_i32, %c0_i32_0 : i32, i32
  }
  func.func @transform_2(%arg0: i32) -> (i32, i32) {
    %c0_i32 = arith.constant 0 : i32
    %c0_i32_0 = arith.constant 0 : i32
    %c0_i32_1 = arith.constant 0 : i32
    return %c0_i32, %c0_i32_0 : i32, i32
  }
  func.func @transform_3(%arg0: i32) -> (i32, i32, i32) {
    %c0_i32 = arith.constant 0 : i32
    %c0_i32_0 = arith.constant 0 : i32
    %c0_i32_1 = arith.constant 0 : i32
    %c0_i32_2 = arith.constant 0 : i32
    return %c0_i32, %c0_i32_0, %c0_i32_1 : i32, i32, i32
  }
  func.func @transform_4(%arg0: i32) -> (i32, i32, i32) {
    %c0_i32 = arith.constant 0 : i32
    %c0_i32_0 = arith.constant 0 : i32
    %c0_i32_1 = arith.constant 0 : i32
    %c0_i32_2 = arith.constant 0 : i32
    return %c0_i32, %c0_i32_0, %c0_i32_1 : i32, i32, i32
  }
  func.func @transform_5(%arg0: i32) -> (i32, i32, i32) {
    %c0_i32 = arith.constant 0 : i32
    %c0_i32_0 = arith.constant 0 : i32
    %c0_i32_1 = arith.constant 0 : i32
    return %arg0, %c0_i32, %c0_i32_0 : i32, i32, i32
  }
}

</mosaic_0001>

<bundles_post_ra>
// kernel: tpu_custom_call.1
= control target key start
LH: loop header
LB: loop body
LE: loop exit
PB: predicated region body
PF: predicated region fallthrough
CT: control target
= control target key end

     0   :  { %10 = vsyncpa [#allocation3], 0  ;;  %s7972_s0 = inlined_call_operand.vmem [shape: bf16[2,116,128], index: 0, kind: input, shape index: {}]   ;;  %s7973_s1 = inlined_call_operand.hbm [shape: bf16[640,128], index: 1, kind: input, shape index: {}]   ;;  %s7974_s2 = inlined_call_operand.vmem [shape: f32[1,128], index: 2, kind: input, shape index: {}]   ;;  %s7975_s3 = inlined_call_operand.hbm [shape: bf16[6,640,128], index: 3, kind: input, shape index: {}]   ;;  %s7976_s4 = inlined_call_operand.vmem [shape: f32[6,1,128], index: 4, kind: input, shape index: {}]   ;;  %s7977_s5 = inlined_call_operand.hbm [shape: f32[2,1,128], index: 5, kind: output, shape index: {}]  }
   0x1   :  { %11 = vsyncpa [#allocation6], 0 }
   0x2   :  { %12 = vsyncpa [#allocation4], 0 }
   0x3   :  { %14 = vsyncpa [#allocation4 + $0x1], 0  ;;  %s6941_s18 = smov 0   ;;  %s6943_s19 = smov 0  }
   0x4   :  { %s6945_s20 = smov 0   ;;  %s6947_s21 = smov 0  }
   0x5 LB: > { %s6962_s22 = sadd.s32 4294967295, %s6902_s21   ;;  %s5202_s23 = sadd.s32 4294967294, %s6902_s21   ;;  %s6902_s21 = sphi %s6947_s21, %s7995_s21   ;;  %s6898_s20 = sphi %s6945_s20, %s7994_s20   ;;  %s6894_s19 = sphi %s6943_s19, %s7993_s19   ;;  %s6890_s18 = sphi %s6941_s18, %s7992_s18  }
   0x6   : > { %s6966_s24 = sadd.s32 1, %s6902_s21   ;;  %s137_s25 = sadd.s32 1, %s6898_s20 }
   0x7   : > { %s134_s26 = ssub.s32 %s6902_s21, %s6966_s24  ;;  %p147_p0 = scmp.ne.s32.totalorder %s6898_s20, %s6894_s19 }
   0x8   : > { %p135_p1 = scmp.eq.s32.totalorder %s134_s26, 0  ;;  %p148_p2 = scmp.eq.s32.totalorder %s6962_s22, 1 }
   0x9   : > { %p153_p3 = scmp.ne.s32.totalorder %s6894_s19, %s6890_s18  ;;  %p154_p4 = scmp.eq.s32.totalorder %s5202_s23, 1 }
   0xa   : > { %s6977_s27 = scalar_select %p135_p1, %s6898_s20, %s137_s25  }
   0xb   : > { %p6979_p5 = por %p148_p2, %p147_p0  ;;  %p6983_p6 = por %p154_p4, %p153_p3 }
   0xc   : > { %p5203_p7 = scmp.ge.s32.totalorder %s6902_s21, 1  ;;  %p161_p8 = scmp.lt.s32.totalorder %s6902_s21, 3 }
   0xd   : > { %s7981_s28 = scalar_select %p6979_p5, 1, 0 }
   0xe   : > { %s7982_s29 = scalar_select %p6983_p6, 1, 0 }
   0xf   : > { %p7978_p9 = scmp.eq.s32.totalorder %s6962_s22, 0  ;;  %p6990_p10 = pnand %p5203_p7, %p161_p8 }
  0x10   : > { %s6904_s6 = smov [#allocation2]   ;;  %s6905_s9 = smov [#allocation5]  }
  0x11   : > { %s7983_s30 = scalar_select %p6990_p10, 1, 0 }
  0x12   : > { %s173_s7 = sshll.u32 %s6904_s6, 4  ;;  %p6434_p11 = pneg %p6990_p10  ;;  %s174_s7 = int_to_ptr.vmem [resolvable:$true] %s173_s7 }
  0x13   : > { %s189_s10 = sshll.u32 %s6905_s9, 4  ;;  %s6776_s13 = scalar_lea.hbm %s7973_s1, 5120  ;;  %s7002_s10 = int_to_ptr.vmem [resolvable:$true] %s189_s10 }
  0x14   : > { %p6998_p12 = pnand %p7978_p9, %p6434_p11  ;;  %p6777_p13 = scmp.ne.s32.totalorder %s7973_s1, %s6776_s13 }
  0x15   : > { %p6783_p3 = scmp.lt.u32.totalorder %s6776_s13, %s7973_s1 }
  0x16   : > { %p6778_p0 = pneg %p6998_p12 }
  0x18   : > { %p6779_p1 = pnand %p6778_p0, %p6777_p13 }
  0x1a   : > { %p6780_p2 = pneg %p6779_p1 }
  0x1c   : > { %p6785_p4 = pnand %p6783_p3, %p6780_p2 }
  0x1e   : > { %6788 = shalt.err (!%p6785_p4)
}
  0x1f   : > { %s6789_s23 = scalar_lea.vmem %s174_s7, 5120  ;;  %p6797_p9 = scmp.lt.s32.totalorder %s174_s7, %s174_s7 }
  0x20   : > { %p6790_p7 = scmp.ne.s32.totalorder %s174_s7, %s6789_s23  ;;  %p6798_p6 = scmp.lt.s32.totalorder %s6789_s23, %s6789_s23 }
  0x22   : > { %p6792_p8 = pnand %p6790_p7, %p6778_p0  ;;  %p6799_p5 = por %p6798_p6, %p6797_p9 }
  0x24   : > { %p6793_p11 = pneg %p6792_p8 }
  0x26   : > { %p6800_p10 = pnand %p6799_p5, %p6793_p11 }
  0x28   : > { %6803 = shalt.err (!%p6800_p10)
}
  0x29   : > { %s6906_s25 = smov 64   ;;  %s6907_s26 = smov 4  }
  0x2a   : > { %6437 = dma.hbm_to_vmem [thread:$0]  (!%p6998_p12), %s7973_s1, 5120, %s174_s7, [#allocation3], %s6906_s25, %s6906_s25, %s6907_s26  }
  0x2b   : > { %s6804_s13 = scalar_lea.hbm %s7975_s3, 30720 }
  0x2c   : > { %p6805_p13 = scmp.ne.s32.totalorder %s7975_s3, %s6804_s13  ;;  %p6811_p9 = scmp.lt.u32.totalorder %s6804_s13, %s7975_s3 }
  0x2e   : > { %p6807_p5 = pnand %p6805_p13, %p6778_p0 }
  0x30   : > { %p6808_p6 = pneg %p6807_p5 }
  0x32   : > { %p6813_p10 = pnand %p6811_p9, %p6808_p6 }
  0x34   : > { %6816 = shalt.err (!%p6813_p10)
}
  0x35   : > { %s6817_s7 = scalar_lea.vmem %s7002_s10, 30720  ;;  %p6825_p4 = scmp.lt.s32.totalorder %s7002_s10, %s7002_s10 }
  0x36   : > { %p6818_p1 = scmp.ne.s32.totalorder %s7002_s10, %s6817_s7  ;;  %p6826_p7 = scmp.lt.s32.totalorder %s6817_s7, %s6817_s7 }
  0x38   : > { %p6820_p2 = pnand %p6818_p1, %p6778_p0  ;;  %p6827_p8 = por %p6826_p7, %p6825_p4 }
  0x3a   : > { %p6821_p3 = pneg %p6820_p2 }
  0x3c   : > { %p6828_p11 = pnand %p6827_p8, %p6821_p3 }
  0x3e   : > { %6831 = shalt.err (!%p6828_p11)
}
  0x3f   : > { %6440 = dma.hbm_to_vmem [thread:$0]  (!%p6998_p12), %s7975_s3, 30720, %s7002_s10, [#allocation6], %s6906_s25, %s6906_s25, %s6907_s26  }
  0x40   : > { %p7985_p13 = scmp.ne.s32.totalorder %s7983_s30, 0 }
  0x41   : > { %p7986_p5 = scmp.eq.s32.totalorder (!%p7985_p13), %s6962_s22, 0 }
  0x42   : > { %216 = sbr.rel (%p7985_p13) target bundleno = 2101 (0x835), region = 40 }
  0x49   : > { %6877 = dma.done.wait (%p7986_p5), [#allocation3], 5120   ;;  %p7987_p0 = pmov %p7986_p5 }
  0x4b   : > { %6879 = vsyncadd (%p7987_p0), [#allocation3], 4294962176  ;;  %p7988_p6 = pmov %p7987_p0 }
  0x4c   : > { %p7989_p9 = pmov %p7987_p0 }
  0x4d   : > { %6881 = dma.done.wait (%p7988_p6), [#allocation6], 30720  }
  0x4e   : > { %6883 = vsyncadd (%p7989_p9), [#allocation6], 4294936576  ;;  %v6488_v0 = vld [vmem:[#allocation2 + $0x40] sm:$0xff]   ;;  %v6492_v4 = vld [vmem:[#allocation2 + $0x48] sm:$0xff]   ;;  %p247_p12 = scmp.lt.s32.totalorder %s6962_s22, 1  ;;  %v6908_v33 = vmov 0.0  }
  0x4f   : > { %v6489_v1 = vld [vmem:[#allocation2] sm:$0xff]   ;;  %5515 = vmatprep.subr.bf16.mxu0 %v6488_v0  ;;  %v6493_v5 = vld [vmem:[#allocation2 + $0x8] sm:$0xff]   ;;  %v6496_v8 = vld [vmem:[#allocation2 + $0x50] sm:$0xff]   ;;  %vm313_vm0 = vsmask.f32 7424  ;;  %vm381_vm2 = vcmask 1046528  }
  0x50   : > { %v6490_v2 = vld [vmem:[#allocation2 + $0xc0] sm:$0xff]   ;;  %5516 = vmatpush3.bf16.msra.mxu0 %v6489_v1  ;;  %v6494_v6 = vld [vmem:[#allocation2 + $0xc8] sm:$0xff]   ;;  %v6497_v9 = vld [vmem:[#allocation2 + $0x10] sm:$0xff]   ;;  %s248_s30 = scalar_select %p247_p12, %s6962_s22, 1  ;;  %vm404_vm1 = vsmask.f32 6400 }
  0x51   : > { %v6491_v3 = vld [vmem:[#allocation2 + $0x80] sm:$0xff]   ;;  %5573 = vmatprep.subr.bf16.mxu1 %v6490_v2  ;;  %5517 = vmatprep.subr.bf16.mxu0 %v6492_v4  ;;  %v6495_v7 = vld [vmem:[#allocation2 + $0x88] sm:$0xff]   ;;  %v6498_v10 = vld [vmem:[#allocation2 + $0xd0] sm:$0xff]   ;;  %vm445_vm3 = vcmask 1045504   ;;  %vm6909_vm4 = vmmov 0   ;;  %vm1158_vm9 = vcmask 1044480  }
  0x52   : > { %5574 = vmatpush3.bf16.msra.mxu1 %v6491_v3  ;;  %v6499_v11 = vld [vmem:[#allocation2 + $0x90] sm:$0xff]   ;;  %v6500_v12 = vld [vmem:[#allocation2 + $0x58] sm:$0xff]   ;;  %v6504_v16 = vld [vmem:[#allocation2 + $0x60] sm:$0xff]   ;;  %s6423_s8 = smul.u32 60, %s248_s30  ;;  %s245_s25 = sand.u32 1, %s6894_s19  }
  0x53   : > { %5575 = vmatprep.subr.bf16.mxu1 %v6494_v6  ;;  %v6501_v13 = vld [vmem:[#allocation2 + $0x18] sm:$0xff]   ;;  %v6505_v17 = vld [vmem:[#allocation2 + $0x20] sm:$0xff]   ;;  %v6508_v20 = vld [vmem:[#allocation2 + $0x68] sm:$0xff]   ;;  %s246_s9 = scalar_lea.vmem [#allocation7], %s245_s25  ;;  %s5113_s15 = scalar_lea.sflag [#allocation4], %s245_s25 }
  0x54   : > { %5518 = vmatpush3.bf16.msra.mxu0 %v6493_v5  ;;  %v6502_v14 = vld [vmem:[#allocation2 + $0xd8] sm:$0xff]   ;;  %v6506_v18 = vld [vmem:[#allocation2 + $0xe0] sm:$0xff]   ;;  %v6509_v21 = vld [vmem:[#allocation2 + $0x28] sm:$0xff]   ;;  %s7066_s26 = scalar_lea.vmem %s7972_s0, %s6423_s8  ;;  %s5125_s11 = sshll.u32 %s246_s9, 4  ;;  %s7932_s11 = int_to_ptr.vmem [resolvable:$true] %s5125_s11 }
  0x55   : > { %5519 = vmatprep.subr.bf16.mxu0 %v6496_v8  ;;  %v6503_v15 = vld [vmem:[#allocation2 + $0x98] sm:$0xff]   ;;  %v6507_v19 = vld [vmem:[#allocation2 + $0xa0] sm:$0xff]   ;;  %v6510_v22 = vld [vmem:[#allocation2 + $0xe8] sm:$0xff]   ;;  %s6832_s16 = scalar_lea.vmem %s7932_s11, 16  ;;  %p7990_p1 = scmp.ne.s32.totalorder %s7981_s28, 0 }
  0x56   : > { %5576 = vmatpush3.bf16.msra.mxu1 %v6495_v7  ;;  %v6511_v23 = vld [vmem:[#allocation2 + $0xa8] sm:$0xff]   ;;  %v6512_v24 = vld [vmem:[#allocation2 + $0x70] sm:$0xff]   ;;  %v6516_v28 = vld [vmem:[#allocation2 + $0x78] sm:$0xff]   ;;  %p6833_p10 = scmp.ne.s32.totalorder %s7932_s11, %s6832_s16 }
  0x57   : > { %5577 = vmatprep.subr.bf16.mxu1 %v6498_v10  ;;  %v6513_v25 = vld [vmem:[#allocation2 + $0x30] sm:$0xff]   ;;  %v6517_v29 = vld [vmem:[#allocation2 + $0x38] sm:$0xff]   ;;  %v7069_v31 = vld [vmem:[%s7066_s26] sm:$0xff]  }
  0x58   : > { %5520 = vmatpush3.bf16.msra.mxu0 %v6497_v9  ;;  %v6514_v26 = vld [vmem:[#allocation2 + $0xf0] sm:$0xff]   ;;  %v6518_v30 = vld [vmem:[#allocation2 + $0xf8] sm:$0xff]   ;;  %v7072_v32 = vld [vmem:[%s7066_s26 + $0x8] sm:$0xff]   ;;  %v315_v35 = vshrl.u32 %v7069_v31, 16  ;;  %v317_v36 = vshll.u32 %v7069_v31, 16  ;;  %v382_v39 = vrot.slane %v7069_v31, 1  ;;  %p6834_p2 = pnand %p6833_p10, %p7990_p1 }
  0x59   : > { %5521 = vmatprep.subr.bf16.mxu0 %v6500_v12  ;;  %v6515_v27 = vld [vmem:[#allocation2 + $0xb0] sm:$0xff]   ;;  %v6521_v34 = vld [vmem:[#allocation2 + $0xb8] sm:$0xff]   ;;  %v322_v37 = vshll.u32 %v7072_v32, 16  ;;  %v326_v38 = vshrl.u32 %v7072_v32, 16  ;;  %v383_v40 = vrot.slane %v7072_v32, 1  ;;  %v6522_v55 = vld [vmem:[#allocation2 + $0x100] sm:$0xff]  }
  0x5a   : > { %5578 = vmatpush3.bf16.msra.mxu1 %v6499_v11  ;;  %v7082_v41 = vld [vmem:[%s7066_s26 + $0x10] sm:$0xff]   ;;  %v319_v42 = vrot.slane %v317_v36, 1  ;;  %v405_v44 = vrot.slane %v315_v35, 1  ;;  %v406_v45 = vrot.slane %v317_v36, 2  ;;  %v7087_v53 = vld [vmem:[%s7066_s26 + $0x18] sm:$0xff]   ;;  %v6524_v0 = vld [vmem:[#allocation2 + $0x108] sm:$0xff]   ;;  %p6835_p3 = pneg %p6834_p2 }
  0x5b   : > { %5579 = vmatprep.subr.bf16.mxu1 %v6502_v14  ;;  %v324_v43 = vrot.slane %v322_v37, 1  ;;  %v408_v46 = vrot.slane %v326_v38, 1  ;;  %v409_v47 = vrot.slane %v322_v37, 2  ;;  %v330_v48 = vshll.u32 %v7082_v41, 16  ;;  %v7098_v5 = vld [vmem:[%s7066_s26 + $0x20] sm:$0xff]   ;;  %v7105_v12 = vld [vmem:[%s7066_s26 + $0x28] sm:$0xff]  }
  0x5c   : > { %5522 = vmatpush3.bf16.msra.mxu0 %v6501_v13  ;;  %v320_v49 = vor.u32 %v319_v42, %v315_v35  ;;  %v407_v50 = vor.u32 %v406_v45, %v405_v44  ;;  %v334_v52 = vshrl.u32 %v7082_v41, 16  ;;  %v384_v59 = vsel %vm381_vm2, %v382_v39, %v383_v40  ;;  %v7108_v14 = vld [vmem:[%s7066_s26 + $0x30] sm:$0xff]   ;;  %v6529_v44 = vld [vmem:[#allocation2 + $0x120] sm:$0xff]  }
  0x5d   : > { %5523 = vmatprep.subr.bf16.mxu0 %v6504_v16  ;;  %v328_v51 = vor.u32 %v326_v38, %v324_v43  ;;  %v410_v54 = vor.u32 %v409_v47, %v408_v46  ;;  %v332_v56 = vrot.slane %v330_v48, 1  ;;  %v413_v57 = vrot.slane %v330_v48, 2 }
  0x5e   : > { %5580 = vmatpush3.bf16.msra.mxu1 %v6503_v15  ;;  %v325_v58 = vsel %vm313_vm0, %v320_v49, %v324_v43  ;;  %v412_v60 = vrot.slane %v334_v52, 1  ;;  %v338_v61 = vshll.u32 %v7087_v53, 16  ;;  %v342_v2 = vshrl.u32 %v7087_v53, 16 }
  0x5f   : > { %5581 = vmatprep.subr.bf16.mxu1 %v6506_v18  ;;  %827 = vmatprep.mubr.bf16.mxu0 %v325_v58  ;;  %v411_v62 = vsel %vm404_vm1, %v407_v50, %v410_v54  ;;  %v333_v63 = vsel %vm313_vm0, %v328_v51, %v332_v56  ;;  %v385_v4 = vrot.slane %v7082_v41, 1  ;;  %v336_v7 = vor.u32 %v334_v52, %v332_v56 }
  0x60   : > { %5524 = vmatpush3.bf16.msra.mxu0 %v6505_v17  ;;  %916 = vmatprep.mubr.bf16.mxu1 %v411_v62  ;;  %v414_v1 = vor.u32 %v413_v57, %v412_v60  ;;  %v417_v3 = vrot.slane %v338_v61, 2  ;;  %v340_v8 = vrot.slane %v338_v61, 1  ;;  %v416_v9 = vrot.slane %v342_v2, 1  ;;  %v6526_v17 = vld [vmem:[#allocation2 + $0x110] sm:$0xff]  }
  0x61   : > { %5525 = vmatprep.subr.bf16.mxu0 %v6508_v20  ;;  %v346_v10 = vshll.u32 %v7098_v5, 16  ;;  %v350_v11 = vshrl.u32 %v7098_v5, 16  ;;  %v386_v15 = vsel %vm381_vm2, %v383_v40, %v385_v4  ;;  %v391_v35 = vrot.slane %v7105_v12, 1 }
  0x62   : > { %5582 = vmatpush3.bf16.msra.mxu1 %v6507_v19  ;;  %v415_v6 = vsel %vm404_vm1, %v410_v54, %v414_v1  ;;  %v418_v13 = vor.u32 %v417_v3, %v416_v9  ;;  %v341_v16 = vsel %vm313_vm0, %v336_v7, %v340_v8  ;;  %v446_v36 = vrot.slane %v7069_v31, 2  ;;  %v6533_v7 = vld [vmem:[#allocation2 + $0x130] sm:$0xff]  }
  0x63   : > { %5583 = vmatprep.subr.bf16.mxu1 %v6510_v22  ;;  %v420_v18 = vrot.slane %v350_v11, 1  ;;  %v421_v19 = vrot.slane %v346_v10, 2  ;;  %v358_v22 = vshrl.u32 %v7105_v12, 16  ;;  %v393_v49 = vrot.slane %v7108_v14, 1 }
  0x64   : > { %5526 = vmatpush3.bf16.msra.mxu0 %v6509_v21  ;;  %v419_v20 = vsel %vm404_vm1, %v414_v1, %v418_v13  ;;  %v354_v21 = vshll.u32 %v7105_v12, 16  ;;  %v449_v54 = vrot.slane %v7082_v41, 2  ;;  %v453_v58 = vrot.slane %v7098_v5, 2 }
  0x65   : > { %5527 = vmatprep.subr.bf16.mxu0 %v6512_v24  ;;  %v344_v24 = vor.u32 %v342_v2, %v340_v8  ;;  %v424_v38 = vrot.slane %v358_v22, 1  ;;  %v447_v60 = vrot.slane %v7072_v32, 2  ;;  %v455_v62 = vrot.slane %v7105_v12, 2 }
  0x66   : > { %5584 = vmatpush3.bf16.msra.mxu1 %v6511_v23  ;;  %v387_v23 = vrot.slane %v7087_v53, 1  ;;  %v356_v37 = vrot.slane %v354_v21, 1  ;;  %v425_v45 = vrot.slane %v354_v21, 2 }
  0x67   : > { %5585 = vmatprep.subr.bf16.mxu1 %v6514_v26  ;;  %v362_v26 = vshll.u32 %v7108_v14, 16 }
  0x68   : > { %5528 = vmatpush3.bf16.msra.mxu0 %v6513_v25  ;;  %v348_v25 = vrot.slane %v346_v10, 1  ;;  %v388_v42 = vsel %vm381_vm2, %v385_v4, %v387_v23  ;;  %v426_v3 = vor.u32 %v425_v45, %v424_v38  ;;  %v6551_v38 = vld [vmem:[#allocation5 + $0x90] sm:$0xff]   ;;  %v6557_v45 = vld [vmem:[#allocation5 + $0xa0] sm:$0xff]  }
  0x69   : > { %5529 = vmatprep.subr.bf16.mxu0 %v6516_v28  ;;  %v389_v28 = vrot.slane %v7098_v5, 1  ;;  %v364_v46 = vrot.slane %v362_v26, 1  ;;  %v429_v48 = vrot.slane %v362_v26, 2  ;;  %v6541_v26 = vld [vmem:[#allocation5 + $0x10] sm:$0xff]  }
  0x6a   : > { %5586 = vmatpush3.bf16.msra.mxu1 %v6515_v27  ;;  %v6527_v27 = vld [vmem:[#allocation2 + $0x118] sm:$0xff]   ;;  %v349_v43 = vsel %vm313_vm0, %v344_v24, %v348_v25  ;;  %v352_v2 = vor.u32 %v350_v11, %v348_v25  ;;  %v6539_v24 = vld [vmem:[#allocation5 + $0x8] sm:$0xff]   ;;  %v6540_v25 = vld [vmem:[#allocation5 + $0x50] sm:$0xff]  }
  0x6b   : > { %5587 = vmatprep.subr.bf16.mxu1 %v6518_v30  ;;  %v7124_v30 = vld [vmem:[%s7066_s26 + $0x38] ss:$0 sps:$4 sm:$0x33]   ;;  %v390_v8 = vsel %vm381_vm2, %v387_v23, %v389_v28  ;;  %v448_v23 = vsel %vm445_vm3, %v446_v36, %v447_v60  ;;  %v6546_v36 = vld [vmem:[#allocation5 + $0x60] sm:$0xff]   ;;  %s5512_s26 = sshll.u32 %s6962_s22, 4  ;;  %s6910_s22 = smov [#allocation7]  }
  0x6c   : > { %5530 = vmatpush3.bf16.msra.mxu0 %v6517_v29  ;;  %v366_v29 = vshrl.u32 %v7108_v14, 16  ;;  %v370_v39 = vshll.u32 %v7124_v30, 16  ;;  %v432_v40 = vshrl.u32 %v7124_v30, 16  ;;  %v395_v50 = vrot.slane %v7124_v30, 1  ;;  %v6535_v11 = vld [vmem:[#allocation2 + $0x138] sm:$0xff]   ;;  %s7930_s14 = scalar_lea.hbm %s7977_s5, %s5512_s26  ;;  %s6836_s17 = sshll.u32 %s6910_s22, 4  ;;  %s6837_s17 = int_to_ptr.vmem [resolvable:$false] %s6836_s17 }
  0x6d   : > { %6211 = vmatprep.subr.bf16.mxu0 %v6908_v33  ;;  %v459_v1 = vrot.slane %v7124_v30, 2  ;;  %v357_v9 = vsel %vm313_vm0, %v352_v2, %v356_v37  ;;  %v6543_v30 = vld [vmem:[#allocation5 + $0x18] sm:$0xff]   ;;  %s6838_s7 = scalar_lea.vmem %s6837_s17, 32  ;;  %p6839_p4 = scmp.lt.s32.totalorder %s7932_s11, %s6837_s17 }
  0x6e   : > { %5588 = vmatpush3.bf16.msra.mxu1 %v6521_v34  ;;  %v422_v34 = vor.u32 %v421_v19, %v420_v18  ;;  %v428_v47 = vrot.slane %v366_v29, 1  ;;  %v372_v51 = vrot.slane %v370_v39, 1  ;;  %v434_v52 = vrot.slane %v432_v40, 1  ;;  %v6554_v40 = vld [vmem:[#allocation5 + $0xd8] sm:$0xff]   ;;  %p6840_p7 = scmp.lt.s32.totalorder %s6838_s7, %s6832_s16 }
  0x6f   : > { %828 = vmatmul.mubr.bf16.vlgmr.msra.gmra.mrb[0].mxu0 %v7069_v31  ;;  %v435_v57 = vrot.slane %v370_v39, 2  ;;  %v368_v18 = vor.u32 %v366_v29, %v364_v46  ;;  %v6536_v31 = vld [vmem:[#allocation5 + $0x40] sm:$0xff]   ;;  %v6542_v29 = vld [vmem:[#allocation5 + $0x58] sm:$0xff]  }
  0x70   : > { %6212 = vmatpush3.bf16.msra.mxu0 %v6522_v55  ;;  %835 = vmatprep.mubr.bf16.mxu0 %v333_v63  ;;  %v451_v55 = vrot.slane %v7087_v53, 2  ;;  %v423_v56 = vsel %vm404_vm1, %v418_v13, %v422_v34  ;;  %v427_v10 = vsel %vm404_vm1, %v422_v34, %v426_v3  ;;  %v360_v13 = vor.u32 %v358_v22, %v356_v37  ;;  %v6547_v34 = vld [vmem:[#allocation5 + $0xc8] sm:$0xff]   ;;  %v6550_v37 = vld [vmem:[#allocation5 + $0xd0] sm:$0xff]   ;;  %v6548_v39 = vld [vmem:[#allocation5 + $0x20] sm:$0xff]   ;;  %p6841_p8 = por %p6840_p7, %p6839_p4 }
  0x71   : > { %917 = vmatmul.mubr.bf16.vlgmr.msra.gmra.mrb[0].mxu1 %v384_v59  ;;  %6213 = vmatprep.subr.bf16.mxu0 %v6908_v33  ;;  %v6531_v59 = vld [vmem:[#allocation2 + $0x128] sm:$0xff]   ;;  %v436_v19 = vor.u32 %v435_v57, %v434_v52  ;;  %v373_v21 = vsel %vm313_vm0, %v368_v18, %v372_v51  ;;  %v6559_v51 = vld [vmem:[#allocation5 + $0x30] sm:$0xff]   ;;  %v6567_v57 = vld [vmem:[#allocation5 + $0xb8] sm:$0xff]  }
  0x72   : > { %924 = vmatprep.mubr.bf16.mxu1 %v415_v6  ;;  %v452_v61 = vsel %vm445_vm3, %v449_v54, %v451_v55  ;;  %v454_v63 = vsel %vm445_vm3, %v451_v55, %v453_v58  ;;  %5646 = vmatprep.subr.bf16.mxu1 %v6536_v31  ;;  %v6564_v52 = vld [vmem:[#allocation5 + $0xb0] sm:$0xff]   ;;  %v6566_v55 = vld [vmem:[#allocation5 + $0xf8] sm:$0xff]   ;;  %p6842_p11 = pnand %p6841_p8, %p6835_p3 }
  0x74   : > { %6214 = vmatpush3.bf16.msra.mxu0 %v6524_v0  ;;  %v457_v0 = vrot.slane %v7108_v14, 2 }
  0x75   : > { %6215 = vmatprep.subr.bf16.mxu0 %v6908_v33 }
  0x76   : > { %v458_v4 = vsel %vm445_vm3, %v455_v62, %v457_v0  ;;  %v460_v6 = vsel %vm445_vm3, %v457_v0, %v459_v1 }
  0x77   : > { %836 = vmatmul.mubr.bf16.gmra.mrb[4].mxu0 %v7072_v32  ;;  %v456_v32 = vsel %vm445_vm3, %v453_v58, %v455_v62 }
  0x78   : > { %843 = vmatprep.mubr.bf16.mxu0 %v341_v16  ;;  %6216 = vmatpush3.bf16.msra.mxu0 %v6526_v17  ;;  %v392_v16 = vsel %vm381_vm2, %v389_v28, %v391_v35  ;;  %v365_v17 = vsel %vm313_vm0, %v360_v13, %v364_v46  ;;  %v6545_v28 = vld [vmem:[#allocation5 + $0x80] sm:$0xff]   ;;  %v6553_v46 = vld [vmem:[#allocation5 + $0x28] sm:$0xff]  }
  0x79   : > { %925 = vmatmul.mubr.bf16.gmra.mrb[4].mxu1 %v386_v15  ;;  %6217 = vmatprep.subr.bf16.mxu0 %v6908_v33  ;;  %v430_v15 = vor.u32 %v429_v48, %v428_v47  ;;  %v6560_v47 = vld [vmem:[#allocation5 + $0xe8] sm:$0xff]  }
  0x7a   : > { %932 = vmatprep.mubr.bf16.mxu1 %v419_v20  ;;  %v394_v20 = vsel %vm381_vm2, %v391_v35, %v393_v49  ;;  %v6549_v35 = vld [vmem:[#allocation5 + $0x88] sm:$0xff]  }
  0x7b   : > { %v437_v22 = vsel %vm404_vm1, %v430_v15, %v436_v19  ;;  %v6561_v48 = vld [vmem:[#allocation5 + $0xa8] sm:$0xff]  }
  0x7c   : > { %6218 = vmatpush3.bf16.msra.mxu0 %v6527_v27  ;;  %v6544_v27 = vld [vmem:[#allocation5 + $0xc0] sm:$0xff]  }
  0x7d   : > { %6219 = vmatprep.subr.bf16.mxu0 %v6908_v33 }
  0x7f   : > { %844 = vmatmul.mubr.bf16.gmra.mrb[8].mxu0 %v7082_v41  ;;  %v6537_v41 = vld [vmem:[#allocation5] sm:$0xff]  }
  0x80   : > { %851 = vmatprep.mubr.bf16.mxu0 %v349_v43  ;;  %6220 = vmatpush3.bf16.msra.mxu0 %v6529_v44  ;;  %v6556_v43 = vld [vmem:[#allocation5 + $0xe0] sm:$0xff]   ;;  %v6552_v44 = vld [vmem:[#allocation5 + $0x68] sm:$0xff]  }
  0x81   : > { %933 = vmatmul.mubr.bf16.gmra.mrb[8].mxu1 %v388_v42  ;;  %6221 = vmatprep.subr.bf16.mxu0 %v6908_v33  ;;  %v6555_v42 = vld [vmem:[#allocation5 + $0x98] sm:$0xff]  }
  0x82   : > { %940 = vmatprep.mubr.bf16.mxu1 %v423_v56  ;;  %5647 = vmatpush3.bf16.msra.mxu1 %v6537_v41  ;;  %v6565_v56 = vld [vmem:[#allocation5 + $0x38] sm:$0xff]  }
  0x84   : > { %6222 = vmatpush3.bf16.msra.mxu0 %v6531_v59  ;;  %v7211_v59 = vld [vmem:[%s7974_s2] ss:$0 sm:$0xff] }
  0x85   : > { %6223 = vmatprep.subr.bf16.mxu0 %v6908_v33 }
  0x87   : > { %852 = vmatmul.mubr.bf16.gmra.mrb[12].mxu0 %v7087_v53  ;;  %v431_v53 = vsel %vm404_vm1, %v426_v3, %v430_v15 }
  0x88   : > { %859 = vmatprep.mubr.bf16.mxu0 %v357_v9  ;;  %6224 = vmatpush3.bf16.msra.mxu0 %v6533_v7 }
  0x89   : > { %941 = vmatmul.mubr.bf16.gmra.mrb[12].mxu1 %v390_v8  ;;  %6225 = vmatprep.subr.bf16.mxu0 %v6908_v33 }
  0x8a   : > { %948 = vmatprep.mubr.bf16.mxu1 %v427_v10 }
  0x8c   : > { %6226 = vmatpush3.bf16.msra.mxu0 %v6535_v11 }
  0x8d   : > { %5704 = vmatprep.subr.bf16.mxu0 %v6544_v27 }
  0x8f   : > { %860 = vmatmul.mubr.bf16.gmra.mrb[16].mxu0 %v7098_v5  ;;  %v396_v5 = vsel %vm381_vm2, %v393_v49, %v395_v50  ;;  %v6558_v49 = vld [vmem:[#allocation5 + $0x70] sm:$0xff]  }
  0x90   : > { %867 = vmatprep.mubr.bf16.mxu0 %v365_v17  ;;  %v6562_v50 = vld [vmem:[#allocation5 + $0xf0] sm:$0xff]  }
  0x91   : > { %949 = vmatmul.mubr.bf16.gmra.mrb[16].mxu1 %v392_v16 }
  0x92   : > { %956 = vmatprep.mubr.bf16.mxu1 %v431_v53 }
  0x97   : > { %868 = vmatmul.mubr.bf16.gmra.mrb[20].mxu0 %v7105_v12  ;;  %v450_v12 = vsel %vm445_vm3, %v447_v60, %v449_v54  ;;  %v6563_v54 = vld [vmem:[#allocation5 + $0x78] sm:$0xff]  }
  0x98   : > { %875 = vmatprep.mubr.bf16.mxu0 %v373_v21 }
  0x99   : > { %957 = vmatmul.mubr.bf16.gmra.mrb[20].mxu1 %v394_v20 }
  0x9a   : > { %964 = vmatprep.mubr.bf16.mxu1 %v437_v22 }
  0x9f   : > { %876 = vmatmul.mubr.bf16.gmra.mrb[24].mxu0 %v7108_v14  ;;  %v6538_v14 = vld [vmem:[#allocation5 + $0x48] sm:$0xff]  }
  0xa0   : > { %6227 = vmatprep.mubr.msk.bf16.mxu0 %vm6909_vm4, %v6908_v33  ;;  %5648 = vmatprep.subr.bf16.mxu1 %v6538_v14 }
  0xa1   : > { %965 = vmatmul.mubr.bf16.gmra.mrb[24].mxu1 %v396_v5 }
  0xa2   : > { %5649 = vmatpush3.bf16.msra.mxu1 %v6539_v24 }
  0xa3   : > { %5650 = vmatprep.subr.bf16.mxu1 %v6540_v25 }
  0xa6   : > { %5651 = vmatpush3.bf16.msra.mxu1 %v6541_v26 }
  0xa7   : > { %6228 = vmatmul.mubr.bf16.vlgmr.msra.gmra.mrb[28].mxu0 %v448_v23  ;;  %5652 = vmatprep.subr.bf16.mxu1 %v6542_v29 }
  0xa8   : > { %6231 = vmatprep.mubr.msk.bf16.mxu0 %vm6909_vm4, %v6908_v33  ;;  %5705 = vmatpush3.bf16.msra.mxu0 %v6545_v28 }
  0xa9   : > { %5706 = vmatprep.subr.bf16.mxu0 %v6547_v34 }
  0xaa   : > { %5653 = vmatpush3.bf16.msra.mxu1 %v6543_v30 }
  0xab   : > { %5654 = vmatprep.subr.bf16.mxu1 %v6546_v36 }
  0xac   : > { %5707 = vmatpush3.bf16.msra.mxu0 %v6549_v35 }
  0xad   : > { %5708 = vmatprep.subr.bf16.mxu0 %v6550_v37 }
  0xae   : > { %5655 = vmatpush3.bf16.msra.mxu1 %v6548_v39 }
  0xaf   : > { %6232 = vmatmul.mubr.bf16.gmra.mrb[32].mxu0 %v450_v12  ;;  %5656 = vmatprep.subr.bf16.mxu1 %v6552_v44 }
  0xb0   : > { %6235 = vmatprep.mubr.msk.bf16.mxu0 %vm6909_vm4, %v6908_v33  ;;  %5709 = vmatpush3.bf16.msra.mxu0 %v6551_v38 }
  0xb1   : > { %5710 = vmatprep.subr.bf16.mxu0 %v6554_v40 }
  0xb2   : > { %5657 = vmatpush3.bf16.msra.mxu1 %v6553_v46 }
  0xb3   : > { %5658 = vmatprep.subr.bf16.mxu1 %v6558_v49 }
  0xb4   : > { %5711 = vmatpush3.bf16.msra.mxu0 %v6555_v42 }
  0xb5   : > { %5712 = vmatprep.subr.bf16.mxu0 %v6556_v43 }
  0xb6   : > { %5659 = vmatpush3.bf16.msra.mxu1 %v6559_v51 }
  0xb7   : > { %6236 = vmatmul.mubr.bf16.gmra.mrb[36].mxu0 %v452_v61  ;;  %5660 = vmatprep.subr.bf16.mxu1 %v6563_v54 }
  0xb8   : > { %6239 = vmatprep.mubr.msk.bf16.mxu0 %vm6909_vm4, %v6908_v33  ;;  %5713 = vmatpush3.bf16.msra.mxu0 %v6557_v45 }
  0xb9   : > { %5714 = vmatprep.subr.bf16.mxu0 %v6560_v47 }
  0xba   : > { %5661 = vmatpush3.bf16.msra.mxu1 %v6565_v56 }
  0xbb   : > { %6255 = vmatprep.subr.bf16.mxu1 %v6908_v33 }
  0xbc   : > { %5715 = vmatpush3.bf16.msra.mxu0 %v6561_v48 }
  0xbd   : > { %5716 = vmatprep.subr.bf16.mxu0 %v6562_v50 }
  0xbf   : > { %6240 = vmatmul.mubr.bf16.gmra.mrb[40].mxu0 %v454_v63 }
  0xc0   : > { %6243 = vmatprep.mubr.msk.bf16.mxu0 %vm6909_vm4, %v6908_v33  ;;  %5717 = vmatpush3.bf16.msra.mxu0 %v6564_v52 }
  0xc1   : > { %5718 = vmatprep.subr.bf16.mxu0 %v6566_v55 }
  0xc4   : > { %5719 = vmatpush3.bf16.msra.mxu0 %v6567_v57 }
  0xc7   : > { %6244 = vmatmul.mubr.bf16.gmra.mrb[44].mxu0 %v456_v32 }
  0xc8   : > { %6247 = vmatprep.mubr.msk.bf16.mxu0 %vm6909_vm4, %v6908_v33 }
  0xcf   : > { %6248 = vmatmul.mubr.bf16.gmra.mrb[48].mxu0 %v458_v4 }
  0xd0   : > { %6251 = vmatprep.mubr.msk.bf16.mxu0 %vm6909_vm4, %v6908_v33 }
  0xd7   : > { %6252 = vmatmul.mubr.bf16.gmra.mrb[52].mxu0 %v460_v6 }
 0x142   : > { %v5531_v58 = vpop.f32.mrb[0].mxu0 }
 0x143   : > { %v5532_v60 = vpop.f32.mrb[1].mxu0 }
 0x144   : > { %v5589_v61 = vpop.f32.mrb[0].mxu1  ;;  %v5533_v62 = vadd.f32 %v5532_v60, %v5531_v58  ;;  %v5534_v63 = vpop.f32.mrb[2].mxu0 }
 0x145   : > { %v5590_v0 = vpop.f32.mrb[1].mxu1  ;;  %v5535_v1 = vpop.f32.mrb[3].mxu0 }
 0x146   : > { %v5591_v2 = vadd.f32 %v5590_v0, %v5589_v61  ;;  %v5592_v32 = vpop.f32.mrb[2].mxu1  ;;  %v830_v3 = vadd.f32 %v5533_v62, %v7211_v59  ;;  %v5536_v4 = vadd.f32 %v5535_v1, %v5534_v63 }
 0x147   : > { %v5593_v6 = vpop.f32.mrb[3].mxu1 }
 0x148   : > { %v5594_v7 = vadd.f32 %v5593_v6, %v5592_v32  ;;  %v833_v8 = vadd.f32 %v5536_v4, %v7211_v59  ;;  %v7215_v9 = vadd.f32 %v5591_v2, %v830_v3 }
 0x14a   : > { %v5537_v10 = vpop.f32.mrb[4].mxu0  ;;  %v7217_v11 = vadd.f32 %v5594_v7, %v833_v8 }
 0x14b   : > { %v5538_v13 = vpop.f32.mrb[5].mxu0 }
 0x14c   : > { %v5595_v15 = vpop.f32.mrb[4].mxu1  ;;  %v5539_v16 = vadd.f32 %v5538_v13, %v5537_v10  ;;  %v5540_v17 = vpop.f32.mrb[6].mxu0 }
 0x14d   : > { %v5596_v53 = vpop.f32.mrb[5].mxu1  ;;  %v5541_v18 = vpop.f32.mrb[7].mxu0 }
 0x14e   : > { %v5597_v19 = vadd.f32 %v5596_v53, %v5595_v15  ;;  %v5598_v20 = vpop.f32.mrb[6].mxu1  ;;  %v838_v21 = vadd.f32 %v5539_v16, %v7211_v59  ;;  %v5542_v22 = vadd.f32 %v5541_v18, %v5540_v17 }
 0x14f   : > { %v5599_v5 = vpop.f32.mrb[7].mxu1 }
 0x150   : > { %v5600_v23 = vadd.f32 %v5599_v5, %v5598_v20  ;;  %v841_v12 = vadd.f32 %v5542_v22, %v7211_v59  ;;  %v7221_v31 = vadd.f32 %v5597_v19, %v838_v21 }
 0x152   : > { %v5543_v41 = vpop.f32.mrb[8].mxu0  ;;  %v7223_v14 = vadd.f32 %v5600_v23, %v841_v12 }
 0x153   : > { %v5544_v24 = vpop.f32.mrb[9].mxu0 }
 0x154   : > { %v5601_v25 = vpop.f32.mrb[8].mxu1  ;;  %v5545_v26 = vadd.f32 %v5544_v24, %v5543_v41  ;;  %v5546_v27 = vpop.f32.mrb[10].mxu0 }
 0x155   : > { %v5602_v28 = vpop.f32.mrb[9].mxu1  ;;  %v5547_v29 = vpop.f32.mrb[11].mxu0 }
 0x156   : > { %v5603_v30 = vadd.f32 %v5602_v28, %v5601_v25  ;;  %v5604_v34 = vpop.f32.mrb[10].mxu1  ;;  %v846_v35 = vadd.f32 %v5545_v26, %v7211_v59  ;;  %v5548_v36 = vadd.f32 %v5547_v29, %v5546_v27 }
 0x157   : > { %v5605_v37 = vpop.f32.mrb[11].mxu1 }
 0x158   : > { %v5606_v38 = vadd.f32 %v5605_v37, %v5604_v34  ;;  %v849_v39 = vadd.f32 %v5548_v36, %v7211_v59  ;;  %v7227_v40 = vadd.f32 %v5603_v30, %v846_v35 }
 0x15a   : > { %v5549_v42 = vpop.f32.mrb[12].mxu0  ;;  %v7229_v43 = vadd.f32 %v5606_v38, %v849_v39 }
 0x15b   : > { %v5550_v44 = vpop.f32.mrb[13].mxu0 }
 0x15c   : > { %v5607_v45 = vpop.f32.mrb[12].mxu1  ;;  %v5551_v46 = vadd.f32 %v5550_v44, %v5549_v42  ;;  %v5552_v47 = vpop.f32.mrb[14].mxu0 }
 0x15d   : > { %v5608_v48 = vpop.f32.mrb[13].mxu1  ;;  %v5553_v49 = vpop.f32.mrb[15].mxu0 }
 0x15e   : > { %v5609_v50 = vadd.f32 %v5608_v48, %v5607_v45  ;;  %v5610_v51 = vpop.f32.mrb[14].mxu1  ;;  %v854_v52 = vadd.f32 %v5551_v46, %v7211_v59  ;;  %v5554_v54 = vadd.f32 %v5553_v49, %v5552_v47 }
 0x15f   : > { %v5611_v55 = vpop.f32.mrb[15].mxu1 }
 0x160   : > { %v5612_v56 = vadd.f32 %v5611_v55, %v5610_v51  ;;  %v857_v57 = vadd.f32 %v5554_v54, %v7211_v59  ;;  %v7233_v58 = vadd.f32 %v5609_v50, %v854_v52 }
 0x162   : > { %v5555_v60 = vpop.f32.mrb[16].mxu0  ;;  %v7235_v61 = vadd.f32 %v5612_v56, %v857_v57 }
 0x163   : > { %v5556_v62 = vpop.f32.mrb[17].mxu0 }
 0x164   : > { %v5613_v63 = vpop.f32.mrb[16].mxu1  ;;  %v5557_v0 = vadd.f32 %v5556_v62, %v5555_v60  ;;  %v5558_v1 = vpop.f32.mrb[18].mxu0 }
 0x165   : > { %v5614_v2 = vpop.f32.mrb[17].mxu1  ;;  %v5559_v32 = vpop.f32.mrb[19].mxu0 }
 0x166   : > { %v5615_v3 = vadd.f32 %v5614_v2, %v5613_v63  ;;  %v5616_v4 = vpop.f32.mrb[18].mxu1  ;;  %v862_v6 = vadd.f32 %v5557_v0, %v7211_v59  ;;  %v5560_v7 = vadd.f32 %v5559_v32, %v5558_v1 }
 0x167   : > { %v5617_v8 = vpop.f32.mrb[19].mxu1 }
 0x168   : > { %v5618_v10 = vadd.f32 %v5617_v8, %v5616_v4  ;;  %v865_v13 = vadd.f32 %v5560_v7, %v7211_v59  ;;  %v7239_v15 = vadd.f32 %v5615_v3, %v862_v6 }
 0x16a   : > { %v5561_v16 = vpop.f32.mrb[20].mxu0  ;;  %v7241_v17 = vadd.f32 %v5618_v10, %v865_v13 }
 0x16b   : > { %v5562_v53 = vpop.f32.mrb[21].mxu0 }
 0x16c   : > { %v5619_v18 = vpop.f32.mrb[20].mxu1  ;;  %v5563_v19 = vadd.f32 %v5562_v53, %v5561_v16  ;;  %v5564_v20 = vpop.f32.mrb[22].mxu0 }
 0x16d   : > { %v5620_v21 = vpop.f32.mrb[21].mxu1  ;;  %v5565_v22 = vpop.f32.mrb[23].mxu0 }
 0x16e   : > { %v5621_v5 = vadd.f32 %v5620_v21, %v5619_v18  ;;  %v5622_v23 = vpop.f32.mrb[22].mxu1  ;;  %v870_v12 = vadd.f32 %v5563_v19, %v7211_v59  ;;  %v5566_v41 = vadd.f32 %v5565_v22, %v5564_v20 }
 0x16f   : > { %v5623_v24 = vpop.f32.mrb[23].mxu1 }
 0x170   : > { %v5624_v25 = vadd.f32 %v5623_v24, %v5622_v23  ;;  %v873_v26 = vadd.f32 %v5566_v41, %v7211_v59  ;;  %v7245_v27 = vadd.f32 %v5621_v5, %v870_v12 }
 0x172   : > { %v5567_v28 = vpop.f32.mrb[24].mxu0  ;;  %v7247_v29 = vadd.f32 %v5624_v25, %v873_v26 }
 0x173   : > { %v5568_v30 = vpop.f32.mrb[25].mxu0 }
 0x174   : > { %v5625_v34 = vpop.f32.mrb[24].mxu1  ;;  %v5569_v35 = vadd.f32 %v5568_v30, %v5567_v28  ;;  %v5570_v36 = vpop.f32.mrb[26].mxu0 }
 0x175   : > { %v5626_v37 = vpop.f32.mrb[25].mxu1  ;;  %v5571_v38 = vpop.f32.mrb[27].mxu0 }
 0x176   : > { %v5627_v39 = vadd.f32 %v5626_v37, %v5625_v34  ;;  %v5628_v42 = vpop.f32.mrb[26].mxu1  ;;  %v878_v44 = vadd.f32 %v5569_v35, %v7211_v59  ;;  %v5572_v45 = vadd.f32 %v5571_v38, %v5570_v36 }
 0x177   : > { %v5629_v46 = vpop.f32.mrb[27].mxu1 }
 0x178   : > { %v5630_v47 = vadd.f32 %v5629_v46, %v5628_v42  ;;  %v881_v48 = vadd.f32 %v5572_v45, %v7211_v59  ;;  %v7251_v49 = vadd.f32 %v5627_v39, %v878_v44 }
 0x17a   : > { %v1007_v50 = vpop.f32.mrb[28].mxu0  ;;  %v7253_v51 = vadd.f32 %v5630_v47, %v881_v48  ;;  %v6570_v48 = vld [vmem:[#allocation5 + $0x110] sm:$0xff]  }
 0x17b   : > { %v1008_v52 = vadd.f32 %v1007_v50, %v7215_v9  ;;  %v6229_v54 = vpop.f32.mrb[29].mxu0 }
 0x17c   : > { %v1010_v55 = vpop.f32.mrb[30].mxu0 }
 0x17d   : > { %v1011_v56 = vadd.f32 %v1010_v55, %v7217_v11  ;;  %v6230_v57 = vpop.f32.mrb[31].mxu0  ;;  %v1076_v62 = vmul.f32 0.2, %v1008_v52  ;;  %vm1062_vm6 = vcmp.gt.f32.partialorder %v1008_v52, 0.0 }
 0x17f   : > { %v1077_v60 = vmul.f32 0.2, %v1011_v56  ;;  %vm1063_vm5 = vcmp.gt.f32.partialorder %v1011_v56, 0.0  ;;  %v7261_v4 = vsel %vm1062_vm6, %v1008_v52, %v1076_v62 }
 0x181   : > { %v7258_v1 = vsel %vm1063_vm5, %v1011_v56, %v1077_v60  ;;  %v6571_v56 = vld [vmem:[#allocation5 + $0x118] sm:$0xff]  }
 0x182   : > { %v1015_v63 = vpop.f32.mrb[32].mxu0  ;;  %v7265_v11 = vpack.c.bf16 %v7258_v1, %v7261_v4 }
 0x183   : > { %v1016_v0 = vadd.f32 %v1015_v63, %v7221_v31  ;;  %v6233_v59 = vpop.f32.mrb[33].mxu0 }
 0x184   : > { %v1018_v2 = vpop.f32.mrb[34].mxu0  ;;  %v1118_v16 = vrot.slane %v7265_v11, 1  ;;  %v1159_v53 = vrot.slane %v7265_v11, 3  ;;  %v1138_v21 = vrot.slane %v7265_v11, 2 }
 0x185   : > { %v1078_v32 = vmul.f32 0.2, %v1016_v0  ;;  %v1019_v3 = vadd.f32 %v1018_v2, %v7223_v14  ;;  %v6234_v9 = vpop.f32.mrb[35].mxu0  ;;  %vm1064_vm7 = vcmp.gt.f32.partialorder %v1016_v0, 0.0 }
 0x187   : > { %vm1065_vm8 = vcmp.gt.f32.partialorder %v1019_v3, 0.0  ;;  %v1079_v6 = vmul.f32 0.2, %v1019_v3  ;;  %v7267_v7 = vsel %vm1064_vm7, %v1016_v0, %v1078_v32  ;;  %vm1179_vm7 = vcmask 1043456  }
 0x189   : > { %v7269_v31 = vsel %vm1065_vm8, %v1019_v3, %v1079_v6 }
 0x18a   : > { %v7273_v8 = vpack.c.bf16 %v7269_v31, %v7267_v7  ;;  %v1023_v10 = vpop.f32.mrb[36].mxu0 }
 0x18b   : > { %v1024_v14 = vadd.f32 %v1023_v10, %v7227_v40  ;;  %v6237_v13 = vpop.f32.mrb[37].mxu0  ;;  %v6568_v40 = vld [vmem:[#allocation5 + $0x100] sm:$0xff]  }
 0x18c   : > { %v1026_v18 = vpop.f32.mrb[38].mxu0  ;;  %v1119_v19 = vrot.slane %v7273_v8, 1  ;;  %v1160_v20 = vrot.slane %v7273_v8, 3  ;;  %v1139_v22 = vrot.slane %v7273_v8, 2  ;;  %v6572_v10 = vld [vmem:[#allocation5 + $0x120] sm:$0xff]  }
 0x18d   : > { %v1080_v5 = vmul.f32 0.2, %v1024_v14  ;;  %v1027_v23 = vadd.f32 %v1026_v18, %v7229_v43  ;;  %v6238_v12 = vpop.f32.mrb[39].mxu0  ;;  %vm1066_vm10 = vcmp.gt.f32.partialorder %v1024_v14, 0.0  ;;  %v6569_v43 = vld [vmem:[#allocation5 + $0x108] sm:$0xff]  }
 0x18e   : > { %v1120_v41 = vsel %vm381_vm2, %v1118_v16, %v1119_v19  ;;  %v1161_v24 = vsel %vm1158_vm9, %v1159_v53, %v1160_v20  ;;  %v1140_v25 = vsel %vm445_vm3, %v1138_v21, %v1139_v22  ;;  %v6573_v18 = vld [vmem:[#allocation5 + $0x128] sm:$0xff]  }
 0x18f   : > { %vm1067_vm11 = vcmp.gt.f32.partialorder %v1027_v23, 0.0  ;;  %v1081_v26 = vmul.f32 0.2, %v1027_v23  ;;  %1559 = vmatprep.mubr.bf16.mxu1 %v1120_v41  ;;  %1647 = vmatprep.mubr.bf16.mxu0 %v1161_v24  ;;  %v7287_v28 = vsel %vm1066_vm10, %v1024_v14, %v1080_v5 }
 0x190   : > { %1560 = vmatmul.mubr.bf16.vlgmr.msra.gmra.mrb[28].mxu1 %v7265_v11  ;;  %1648 = vmatmul.mubr.bf16.vlgmr.msra.gmra.mrb[56].mxu0 %v1140_v25 }
 0x191   : > { %v7289_v30 = vsel %vm1067_vm11, %v1027_v23, %v1081_v26  ;;  %6256 = vmatpush3.bf16.msra.mxu1 %v6568_v40  ;;  %v6574_v26 = vld [vmem:[#allocation5 + $0x130] sm:$0xff]  }
 0x192   : > { %v7293_v34 = vpack.c.bf16 %v7289_v30, %v7287_v28  ;;  %v1031_v35 = vpop.f32.mrb[40].mxu0  ;;  %6257 = vmatprep.subr.bf16.mxu1 %v6908_v33 }
 0x193   : > { %v1032_v36 = vadd.f32 %v1031_v35, %v7233_v58  ;;  %v6241_v37 = vpop.f32.mrb[41].mxu0 }
 0x194   : > { %v1034_v38 = vpop.f32.mrb[42].mxu0  ;;  %v1121_v39 = vrot.slane %v7293_v34, 1  ;;  %v1162_v42 = vrot.slane %v7293_v34, 3  ;;  %v1141_v44 = vrot.slane %v7293_v34, 2 }
 0x195   : > { %v1082_v45 = vmul.f32 0.2, %v1032_v36  ;;  %v1035_v46 = vadd.f32 %v1034_v38, %v7235_v61  ;;  %v6242_v47 = vpop.f32.mrb[43].mxu0  ;;  %6258 = vmatpush3.bf16.msra.mxu1 %v6569_v43  ;;  %vm1068_vm12 = vcmp.gt.f32.partialorder %v1032_v36, 0.0  ;;  %v6575_v38 = vld [vmem:[#allocation5 + $0x138] sm:$0xff]  }
 0x196   : > { %v1122_v50 = vsel %vm381_vm2, %v1119_v19, %v1121_v39  ;;  %v1163_v52 = vsel %vm1158_vm9, %v1160_v20, %v1162_v42  ;;  %v1142_v58 = vsel %vm445_vm3, %v1139_v22, %v1141_v44  ;;  %6259 = vmatprep.subr.bf16.mxu1 %v6908_v33 }
 0x197   : > { %vm1069_vm13 = vcmp.gt.f32.partialorder %v1035_v46, 0.0  ;;  %v1083_v54 = vmul.f32 0.2, %v1035_v46  ;;  %1567 = vmatprep.mubr.bf16.mxu1 %v1122_v50  ;;  %1655 = vmatprep.mubr.bf16.mxu0 %v1163_v52  ;;  %v7306_v61 = vsel %vm1068_vm12, %v1032_v36, %v1082_v45 }
 0x198   : > { %1568 = vmatmul.mubr.bf16.gmra.mrb[32].mxu1 %v7273_v8  ;;  %1656 = vmatmul.mubr.bf16.gmra.mrb[60].mxu0 %v1142_v58 }
 0x199   : > { %v7308_v55 = vsel %vm1069_vm13, %v1035_v46, %v1083_v54  ;;  %6260 = vmatpush3.bf16.msra.mxu1 %v6570_v48 }
 0x19a   : > { %v7312_v57 = vpack.c.bf16 %v7308_v55, %v7306_v61  ;;  %v1039_v60 = vpop.f32.mrb[44].mxu0  ;;  %6261 = vmatprep.subr.bf16.mxu1 %v6908_v33 }
 0x19b   : > { %v1040_v62 = vadd.f32 %v1039_v60, %v7239_v15  ;;  %v6245_v63 = vpop.f32.mrb[45].mxu0 }
 0x19c   : > { %v1042_v0 = vpop.f32.mrb[46].mxu0  ;;  %v1123_v59 = vrot.slane %v7312_v57, 1  ;;  %v1164_v2 = vrot.slane %v7312_v57, 3  ;;  %v1143_v32 = vrot.slane %v7312_v57, 2 }
 0x19d   : > { %v1084_v3 = vmul.f32 0.2, %v1040_v62  ;;  %v1043_v9 = vadd.f32 %v1042_v0, %v7241_v17  ;;  %v6246_v6 = vpop.f32.mrb[47].mxu0  ;;  %6262 = vmatpush3.bf16.msra.mxu1 %v6571_v56  ;;  %vm1070_vm14 = vcmp.gt.f32.partialorder %v1040_v62, 0.0 }
 0x19e   : > { %v1124_v14 = vsel %vm381_vm2, %v1121_v39, %v1123_v59  ;;  %v1165_v13 = vsel %vm1158_vm9, %v1162_v42, %v1164_v2  ;;  %v1144_v15 = vsel %vm445_vm3, %v1141_v44, %v1143_v32  ;;  %6263 = vmatprep.subr.bf16.mxu1 %v6908_v33 }
 0x19f   : > { %vm1071_vm15 = vcmp.gt.f32.partialorder %v1043_v9, 0.0  ;;  %v1085_v16 = vmul.f32 0.2, %v1043_v9  ;;  %1575 = vmatprep.mubr.bf16.mxu1 %v1124_v14  ;;  %1663 = vmatprep.mubr.bf16.mxu0 %v1165_v13  ;;  %v7325_v17 = vsel %vm1070_vm14, %v1040_v62, %v1084_v3  ;;  %v1180_v14 = vrot.slane %v7265_v11, 4 }
 0x1a0   : > { %1576 = vmatmul.mubr.bf16.gmra.mrb[36].mxu1 %v7293_v34  ;;  %1664 = vmatmul.mubr.bf16.gmra.mrb[64].mxu0 %v1144_v15  ;;  %v1183_v15 = vrot.slane %v7293_v34, 4 }
 0x1a1   : > { %v7327_v53 = vsel %vm1071_vm15, %v1043_v9, %v1085_v16  ;;  %6264 = vmatpush3.bf16.msra.mxu1 %v6572_v10  ;;  %v1181_v10 = vrot.slane %v7273_v8, 4 }
 0x1a2   : > { %v7331_v19 = vpack.c.bf16 %v7327_v53, %v7325_v17  ;;  %v1047_v20 = vpop.f32.mrb[48].mxu0  ;;  %6265 = vmatprep.subr.bf16.mxu1 %v6908_v33 }
 0x1a3   : > { %v1048_v21 = vadd.f32 %v1047_v20, %v7245_v27  ;;  %v6249_v22 = vpop.f32.mrb[49].mxu0  ;;  %v1182_v13 = vsel %vm1179_vm7, %v1180_v14, %v1181_v10  ;;  %v1184_v16 = vsel %vm1179_vm7, %v1181_v10, %v1183_v15 }
 0x1a4   : > { %v1050_v5 = vpop.f32.mrb[50].mxu0  ;;  %v1125_v23 = vrot.slane %v7331_v19, 1  ;;  %v1166_v12 = vrot.slane %v7331_v19, 3  ;;  %v1145_v40 = vrot.slane %v7331_v19, 2  ;;  %v1187_v11 = vrot.slane %v7331_v19, 4 }
 0x1a5   : > { %v1086_v41 = vmul.f32 0.2, %v1048_v21  ;;  %v1051_v24 = vadd.f32 %v1050_v5, %v7247_v29  ;;  %v6250_v25 = vpop.f32.mrb[51].mxu0  ;;  %6266 = vmatpush3.bf16.msra.mxu1 %v6573_v18  ;;  %vm1072_vm0 = vcmp.gt.f32.partialorder %v1048_v21, 0.0  ;;  %v1185_v18 = vrot.slane %v7312_v57, 4  ;;  %v6577_v5 = vld [vmem:[#allocation5 + $0x140] sm:$0xff]  }
 0x1a6   : > { %v1126_v43 = vsel %vm381_vm2, %v1123_v59, %v1125_v23  ;;  %v1167_v35 = vsel %vm1158_vm9, %v1164_v2, %v1166_v12  ;;  %v1146_v27 = vsel %vm445_vm3, %v1143_v32, %v1145_v40  ;;  %6267 = vmatprep.subr.bf16.mxu1 %v6908_v33  ;;  %v6585_v25 = vld [vmem:[#allocation5 + $0x1c0] sm:$0xff]  }
 0x1a7   : > { %vm1073_vm1 = vcmp.gt.f32.partialorder %v1051_v24, 0.0  ;;  %v1087_v36 = vmul.f32 0.2, %v1051_v24  ;;  %1583 = vmatprep.mubr.bf16.mxu1 %v1126_v43  ;;  %1671 = vmatprep.mubr.bf16.mxu0 %v1167_v35  ;;  %v7344_v29 = vsel %vm1072_vm0, %v1048_v21, %v1086_v41  ;;  %v1186_v8 = vsel %vm1179_vm7, %v1183_v15, %v1185_v18  ;;  %v6581_v41 = vld [vmem:[#allocation5 + $0x150] sm:$0xff]   ;;  %v6589_v43 = vld [vmem:[#allocation5 + $0x1c8] sm:$0xff]  }
 0x1a8   : > { %1584 = vmatmul.mubr.bf16.gmra.mrb[40].mxu1 %v7312_v57  ;;  %1672 = vmatmul.mubr.bf16.gmra.mrb[68].mxu0 %v1146_v27  ;;  %v1188_v20 = vsel %vm1179_vm7, %v1185_v18, %v1187_v11  ;;  %v6590_v35 = vld [vmem:[#allocation5 + $0x210] sm:$0xff]   ;;  %v6582_v27 = vld [vmem:[#allocation5 + $0x198] sm:$0xff]  }
 0x1a9   : > { %v7346_v37 = vsel %vm1073_vm1, %v1051_v24, %v1087_v36  ;;  %6268 = vmatpush3.bf16.msra.mxu1 %v6574_v26  ;;  %v6584_v24 = vld [vmem:[#allocation5 + $0x200] sm:$0xff]   ;;  %v6587_v26 = vld [vmem:[#allocation5 + $0x208] sm:$0xff]   ;;  %v6583_v36 = vld [vmem:[#allocation5 + $0x158] sm:$0xff]   ;;  %vm1949_vm1 = vcmask 1041408  }
 0x1aa   : > { %v7350_v39 = vpack.c.bf16 %v7346_v37, %v7344_v29  ;;  %v1055_v42 = vpop.f32.mrb[52].mxu0  ;;  %6269 = vmatprep.subr.bf16.mxu1 %v6908_v33 }
 0x1ab   : > { %v1056_v44 = vadd.f32 %v1055_v42, %v7251_v49  ;;  %v6253_v45 = vpop.f32.mrb[53].mxu0  ;;  %v6595_v42 = vld [vmem:[#allocation5 + $0x1d8] sm:$0xff]  }
 0x1ac   : > { %v1058_v46 = vpop.f32.mrb[54].mxu0  ;;  %v1127_v47 = vrot.slane %v7350_v39, 1  ;;  %v1168_v48 = vrot.slane %v7350_v39, 3  ;;  %v1147_v50 = vrot.slane %v7350_v39, 2  ;;  %v1189_v34 = vrot.slane %v7350_v39, 4  ;;  %v6588_v45 = vld [vmem:[#allocation5 + $0x160] sm:$0xff]  }
 0x1ad   : > { %v1088_v52 = vmul.f32 0.2, %v1056_v44  ;;  %v1059_v58 = vadd.f32 %v1058_v46, %v7253_v51  ;;  %v6254_v54 = vpop.f32.mrb[55].mxu0  ;;  %6270 = vmatpush3.bf16.msra.mxu1 %v6575_v38  ;;  %vm1074_vm5 = vcmp.gt.f32.partialorder %v1056_v44, 0.0  ;;  %v6591_v38 = vld [vmem:[#allocation5 + $0x1d0] sm:$0xff]   ;;  %v6596_v46 = vld [vmem:[#allocation5 + $0x220] sm:$0xff]  }
 0x1ae   : > { %v1128_v56 = vsel %vm381_vm2, %v1125_v23, %v1127_v47  ;;  %v1169_v60 = vsel %vm1158_vm9, %v1166_v12, %v1168_v48  ;;  %v1148_v49 = vsel %vm445_vm3, %v1145_v40, %v1147_v50  ;;  %v1190_v21 = vsel %vm1179_vm7, %v1187_v11, %v1189_v34  ;;  %v6578_v23 = vld [vmem:[#allocation5 + $0x188] sm:$0xff]   ;;  %v6580_v40 = vld [vmem:[#allocation5 + $0x190] sm:$0xff]   ;;  %5829 = vmatprep.subr.bf16.mxu1 %v6584_v24 }
 0x1af   : > { %vm1075_vm6 = vcmp.gt.f32.partialorder %v1059_v58, 0.0  ;;  %v1089_v62 = vmul.f32 0.2, %v1059_v58  ;;  %1591 = vmatprep.mubr.bf16.mxu1 %v1128_v56  ;;  %1679 = vmatprep.mubr.bf16.mxu0 %v1169_v60  ;;  %v7362_v63 = vsel %vm1074_vm5, %v1056_v44, %v1088_v52  ;;  %v6579_v12 = vld [vmem:[#allocation5 + $0x148] sm:$0xff]   ;;  %v6586_v44 = vld [vmem:[#allocation5 + $0x1a0] sm:$0xff]   ;;  %v6598_v54 = vld [vmem:[#allocation5 + $0x1b0] sm:$0xff]  }
 0x1b0   : > { %1592 = vmatmul.mubr.bf16.gmra.mrb[44].mxu1 %v7331_v19  ;;  %1680 = vmatmul.mubr.bf16.gmra.mrb[72].mxu0 %v1148_v49  ;;  %v6576_v19 = vld [vmem:[#allocation5 + $0x180] sm:$0xff]   ;;  %v6593_v52 = vld [vmem:[#allocation5 + $0x168] sm:$0xff]   ;;  %v6602_v56 = vld [vmem:[#allocation5 + $0x230] sm:$0xff]  }
 0x1b1   : > { %v7364_v0 = vsel %vm1075_vm6, %v1059_v58, %v1089_v62  ;;  %5777 = vmatprep.subr.bf16.mxu0 %v6576_v19  ;;  %v6601_v58 = vld [vmem:[#allocation5 + $0x1e8] sm:$0xff]   ;;  %v6599_v60 = vld [vmem:[#allocation5 + $0x170] sm:$0xff]   ;;  %v6603_v62 = vld [vmem:[#allocation5 + $0x1b8] sm:$0xff]  }
 0x1b2   : > { %v1110_v51 = vpack.c.bf16 %v7364_v0, %v7362_v63  ;;  %5778 = vmatpush3.bf16.msra.mxu0 %v6577_v5  ;;  %v6604_v49 = vld [vmem:[#allocation5 + $0x1f0] sm:$0xff]  }
 0x1b3   : > { %5779 = vmatprep.subr.bf16.mxu0 %v6578_v23 }
 0x1b4   : > { %v1129_v59 = vrot.slane %v1110_v51, 1  ;;  %v1170_v2 = vrot.slane %v1110_v51, 3  ;;  %v1149_v32 = vrot.slane %v1110_v51, 2  ;;  %v1191_v57 = vrot.slane %v1110_v51, 4 }
 0x1b6   : > { %v1130_v3 = vsel %vm381_vm2, %v1127_v47, %v1129_v59  ;;  %v1171_v9 = vsel %vm1158_vm9, %v1168_v48, %v1170_v2  ;;  %v1150_v6 = vsel %vm445_vm3, %v1147_v50, %v1149_v32  ;;  %v1192_v22 = vsel %vm1179_vm7, %v1189_v34, %v1191_v57  ;;  %5780 = vmatpush3.bf16.msra.mxu0 %v6579_v12  ;;  %v6597_v47 = vld [vmem:[#allocation5 + $0x1e0] sm:$0xff]   ;;  %v6592_v48 = vld [vmem:[#allocation5 + $0x1a8] sm:$0xff]  }
 0x1b7   : > { %1599 = vmatprep.mubr.bf16.mxu1 %v1130_v3  ;;  %1687 = vmatprep.mubr.bf16.mxu0 %v1171_v9  ;;  %v6600_v50 = vld [vmem:[#allocation5 + $0x228] sm:$0xff]  }
 0x1b8   : > { %1600 = vmatmul.mubr.bf16.gmra.mrb[48].mxu1 %v7350_v39  ;;  %1688 = vmatmul.mubr.bf16.gmra.mrb[76].mxu0 %v1150_v6  ;;  %v6594_v39 = vld [vmem:[#allocation5 + $0x218] sm:$0xff]   ;;  %v7404_v6 = vld [vmem:[%s7976_s4] ss:$0 sm:$0xff] }
 0x1b9   : > { %1607 = vmatprep.mubr.bf16.mxu1 %v1129_v59  ;;  %1695 = vmatprep.mubr.bf16.mxu0 %v1170_v2  ;;  %v6605_v59 = vld [vmem:[#allocation5 + $0x178] sm:$0xff]  }
 0x1ba   : > { %5781 = vmatprep.subr.bf16.mxu0 %v6580_v40  ;;  %v6607_v2 = vld [vmem:[#allocation5 + $0x1f8] sm:$0xff]  }
 0x1bb   : > { %5782 = vmatpush3.bf16.msra.mxu0 %v6581_v41 }
 0x1bc   : > { %5783 = vmatprep.subr.bf16.mxu0 %v6582_v27 }
 0x1bf   : > { %5784 = vmatpush3.bf16.msra.mxu0 %v6583_v36 }
 0x1c0   : > { %1608 = vmatmul.mubr.bf16.gmra.mrb[52].mxu1 %v1110_v51  ;;  %1696 = vmatmul.mubr.bf16.gmra.mrb[80].mxu0 %v1149_v32  ;;  %v6606_v51 = vld [vmem:[#allocation5 + $0x238] sm:$0xff]   ;;  %v7398_v32 = vld [vmem:[#allocation5 + $0x240] sm:$0xff]  }
 0x1c1   : > { %6271 = vmatprep.mubr.msk.bf16.mxu1 %vm6909_vm4, %v6908_v33  ;;  %5785 = vmatprep.subr.bf16.mxu0 %v6586_v44 }
 0x1c3   : > { %5786 = vmatpush3.bf16.msra.mxu0 %v6588_v45 }
 0x1c4   : > { %5787 = vmatprep.subr.bf16.mxu0 %v6592_v48 }
 0x1c7   : > { %5788 = vmatpush3.bf16.msra.mxu0 %v6593_v52 }
 0x1c8   : > { %6272 = vmatmul.mubr.bf16.vlgmr.msra.gmra.mrb[56].mxu1 %v1182_v13  ;;  %5789 = vmatprep.subr.bf16.mxu0 %v6598_v54 }
 0x1c9   : > { %6275 = vmatprep.mubr.msk.bf16.mxu1 %vm6909_vm4, %v6908_v33  ;;  %5830 = vmatpush3.bf16.msra.mxu1 %v6585_v25 }
 0x1ca   : > { %5831 = vmatprep.subr.bf16.mxu1 %v6587_v26 }
 0x1cb   : > { %5790 = vmatpush3.bf16.msra.mxu0 %v6599_v60 }
 0x1cc   : > { %5791 = vmatprep.subr.bf16.mxu0 %v6603_v62 }
 0x1cd   : > { %5832 = vmatpush3.bf16.msra.mxu1 %v6589_v43 }
 0x1ce   : > { %5833 = vmatprep.subr.bf16.mxu1 %v6590_v35 }
 0x1cf   : > { %5792 = vmatpush3.bf16.msra.mxu0 %v6605_v59 }
 0x1d0   : > { %6276 = vmatmul.mubr.bf16.gmra.mrb[60].mxu1 %v1184_v16  ;;  %6299 = vmatprep.subr.bf16.mxu0 %v7398_v32 }
 0x1d1   : > { %6279 = vmatprep.mubr.msk.bf16.mxu1 %vm6909_vm4, %v6908_v33  ;;  %5834 = vmatpush3.bf16.msra.mxu1 %v6591_v38 }
 0x1d2   : > { %5835 = vmatprep.subr.bf16.mxu1 %v6594_v39 }
 0x1d5   : > { %5836 = vmatpush3.bf16.msra.mxu1 %v6595_v42 }
 0x1d6   : > { %5837 = vmatprep.subr.bf16.mxu1 %v6596_v46 }
 0x1d8   : > { %6280 = vmatmul.mubr.bf16.gmra.mrb[64].mxu1 %v1186_v8 }
 0x1d9   : > { %6283 = vmatprep.mubr.msk.bf16.mxu1 %vm6909_vm4, %v6908_v33  ;;  %5838 = vmatpush3.bf16.msra.mxu1 %v6597_v47 }
 0x1da   : > { %5839 = vmatprep.subr.bf16.mxu1 %v6600_v50 }
 0x1dd   : > { %5840 = vmatpush3.bf16.msra.mxu1 %v6601_v58 }
 0x1de   : > { %5841 = vmatprep.subr.bf16.mxu1 %v6602_v56 }
 0x1e0   : > { %6284 = vmatmul.mubr.bf16.gmra.mrb[68].mxu1 %v1188_v20 }
 0x1e1   : > { %6287 = vmatprep.mubr.msk.bf16.mxu1 %vm6909_vm4, %v6908_v33  ;;  %5842 = vmatpush3.bf16.msra.mxu1 %v6604_v49 }
 0x1e2   : > { %5843 = vmatprep.subr.bf16.mxu1 %v6606_v51 }
 0x1e5   : > { %5844 = vmatpush3.bf16.msra.mxu1 %v6607_v2 }
 0x1e8   : > { %6288 = vmatmul.mubr.bf16.gmra.mrb[72].mxu1 %v1190_v21 }
 0x1e9   : > { %6291 = vmatprep.mubr.msk.bf16.mxu1 %vm6909_vm4, %v6908_v33 }
 0x1f0   : > { %6292 = vmatmul.mubr.bf16.gmra.mrb[76].mxu1 %v1192_v22 }
 0x1f1   : > { %6295 = vmatprep.mubr.msk.bf16.mxu1 %vm6909_vm4, %v6908_v33 }
 0x1f8   : > { %6296 = vmatmul.mubr.bf16.gmra.mrb[80].mxu1 %v1191_v57 }
 0x263   : > { %v5662_v3 = vpop.f32.mrb[28].mxu1  ;;  %v5720_v9 = vpop.f32.mrb[56].mxu0 }
 0x264   : > { %v5663_v10 = vpop.f32.mrb[29].mxu1  ;;  %v5721_v14 = vpop.f32.mrb[57].mxu0 }
 0x265   : > { %v5664_v13 = vadd.f32 %v5663_v10, %v5662_v3  ;;  %v5722_v15 = vadd.f32 %v5721_v14, %v5720_v9  ;;  %v5665_v16 = vpop.f32.mrb[30].mxu1  ;;  %v5723_v18 = vpop.f32.mrb[58].mxu0 }
 0x266   : > { %v5666_v8 = vpop.f32.mrb[31].mxu1  ;;  %v5724_v11 = vpop.f32.mrb[59].mxu0 }
 0x267   : > { %v1562_v20 = vadd.f32 %v5664_v13, %v7404_v6  ;;  %v5667_v34 = vadd.f32 %v5666_v8, %v5665_v16  ;;  %v5725_v21 = vadd.f32 %v5724_v11, %v5723_v18 }
 0x269   : > { %v1565_v57 = vadd.f32 %v5667_v34, %v7404_v6  ;;  %v7408_v22 = vadd.f32 %v5722_v15, %v1562_v20 }
 0x26b   : > { %v5668_v19 = vpop.f32.mrb[32].mxu1  ;;  %v5726_v5 = vpop.f32.mrb[60].mxu0  ;;  %v7410_v23 = vadd.f32 %v5725_v21, %v1565_v57 }
 0x26c   : > { %v5669_v12 = vpop.f32.mrb[33].mxu1  ;;  %v5727_v40 = vpop.f32.mrb[61].mxu0 }
 0x26d   : > { %v5670_v41 = vadd.f32 %v5669_v12, %v5668_v19  ;;  %v5728_v24 = vadd.f32 %v5727_v40, %v5726_v5  ;;  %v5671_v25 = vpop.f32.mrb[34].mxu1  ;;  %v5729_v26 = vpop.f32.mrb[62].mxu0 }
 0x26e   : > { %v5672_v43 = vpop.f32.mrb[35].mxu1  ;;  %v5730_v35 = vpop.f32.mrb[63].mxu0 }
 0x26f   : > { %v1570_v27 = vadd.f32 %v5670_v41, %v7404_v6  ;;  %v5673_v36 = vadd.f32 %v5672_v43, %v5671_v25  ;;  %v5731_v38 = vadd.f32 %v5730_v35, %v5729_v26 }
 0x271   : > { %v1573_v39 = vadd.f32 %v5673_v36, %v7404_v6  ;;  %v7414_v42 = vadd.f32 %v5728_v24, %v1570_v27 }
 0x273   : > { %v5674_v44 = vpop.f32.mrb[36].mxu1  ;;  %v5732_v45 = vpop.f32.mrb[64].mxu0  ;;  %v7416_v46 = vadd.f32 %v5731_v38, %v1573_v39 }
 0x274   : > { %v5675_v47 = vpop.f32.mrb[37].mxu1  ;;  %v5733_v48 = vpop.f32.mrb[65].mxu0 }
 0x275   : > { %v5676_v50 = vadd.f32 %v5675_v47, %v5674_v44  ;;  %v5734_v52 = vadd.f32 %v5733_v48, %v5732_v45  ;;  %v5677_v58 = vpop.f32.mrb[38].mxu1  ;;  %v5735_v54 = vpop.f32.mrb[66].mxu0 }
 0x276   : > { %v5678_v56 = vpop.f32.mrb[39].mxu1  ;;  %v5736_v60 = vpop.f32.mrb[67].mxu0 }
 0x277   : > { %v1578_v49 = vadd.f32 %v5676_v50, %v7404_v6  ;;  %v5679_v62 = vadd.f32 %v5678_v56, %v5677_v58  ;;  %v5737_v51 = vadd.f32 %v5736_v60, %v5735_v54 }
 0x279   : > { %v1581_v59 = vadd.f32 %v5679_v62, %v7404_v6  ;;  %v7420_v2 = vadd.f32 %v5734_v52, %v1578_v49 }
 0x27b   : > { %v5680_v3 = vpop.f32.mrb[40].mxu1  ;;  %v5738_v9 = vpop.f32.mrb[68].mxu0  ;;  %v7422_v10 = vadd.f32 %v5737_v51, %v1581_v59 }
 0x27c   : > { %v5681_v14 = vpop.f32.mrb[41].mxu1  ;;  %v5739_v13 = vpop.f32.mrb[69].mxu0 }
 0x27d   : > { %v5682_v15 = vadd.f32 %v5681_v14, %v5680_v3  ;;  %v5740_v16 = vadd.f32 %v5739_v13, %v5738_v9  ;;  %v5683_v18 = vpop.f32.mrb[42].mxu1  ;;  %v5741_v8 = vpop.f32.mrb[70].mxu0 }
 0x27e   : > { %v5684_v11 = vpop.f32.mrb[43].mxu1  ;;  %v5742_v20 = vpop.f32.mrb[71].mxu0 }
 0x27f   : > { %v1586_v34 = vadd.f32 %v5682_v15, %v7404_v6  ;;  %v5685_v21 = vadd.f32 %v5684_v11, %v5683_v18  ;;  %v5743_v57 = vadd.f32 %v5742_v20, %v5741_v8 }
 0x281   : > { %v1589_v19 = vadd.f32 %v5685_v21, %v7404_v6  ;;  %v7426_v5 = vadd.f32 %v5740_v16, %v1586_v34 }
 0x283   : > { %v5686_v12 = vpop.f32.mrb[44].mxu1  ;;  %v5744_v40 = vpop.f32.mrb[72].mxu0  ;;  %v7428_v41 = vadd.f32 %v5743_v57, %v1589_v19 }
 0x284   : > { %v5687_v24 = vpop.f32.mrb[45].mxu1  ;;  %v5745_v25 = vpop.f32.mrb[73].mxu0 }
 0x285   : > { %v5688_v26 = vadd.f32 %v5687_v24, %v5686_v12  ;;  %v5746_v43 = vadd.f32 %v5745_v25, %v5744_v40  ;;  %v5689_v35 = vpop.f32.mrb[46].mxu1  ;;  %v5747_v27 = vpop.f32.mrb[74].mxu0 }
 0x286   : > { %v5690_v36 = vpop.f32.mrb[47].mxu1  ;;  %v5748_v38 = vpop.f32.mrb[75].mxu0 }
 0x287   : > { %v1594_v39 = vadd.f32 %v5688_v26, %v7404_v6  ;;  %v5691_v44 = vadd.f32 %v5690_v36, %v5689_v35  ;;  %v5749_v45 = vadd.f32 %v5748_v38, %v5747_v27 }
 0x289   : > { %v1597_v47 = vadd.f32 %v5691_v44, %v7404_v6  ;;  %v7432_v48 = vadd.f32 %v5746_v43, %v1594_v39 }
 0x28b   : > { %v5692_v50 = vpop.f32.mrb[48].mxu1  ;;  %v5750_v52 = vpop.f32.mrb[76].mxu0  ;;  %v7434_v58 = vadd.f32 %v5749_v45, %v1597_v47 }
 0x28c   : > { %v5693_v54 = vpop.f32.mrb[49].mxu1  ;;  %v5751_v56 = vpop.f32.mrb[77].mxu0 }
 0x28d   : > { %v5694_v60 = vadd.f32 %v5693_v54, %v5692_v50  ;;  %v5752_v49 = vadd.f32 %v5751_v56, %v5750_v52  ;;  %v5695_v62 = vpop.f32.mrb[50].mxu1  ;;  %v5753_v51 = vpop.f32.mrb[78].mxu0 }
 0x28e   : > { %v5696_v59 = vpop.f32.mrb[51].mxu1  ;;  %v5754_v3 = vpop.f32.mrb[79].mxu0 }
 0x28f   : > { %v1602_v9 = vadd.f32 %v5694_v60, %v7404_v6  ;;  %v5697_v14 = vadd.f32 %v5696_v59, %v5695_v62  ;;  %v5755_v13 = vadd.f32 %v5754_v3, %v5753_v51 }
 0x291   : > { %v1605_v15 = vadd.f32 %v5697_v14, %v7404_v6  ;;  %v7438_v16 = vadd.f32 %v5752_v49, %v1602_v9 }
 0x293   : > { %v5698_v18 = vpop.f32.mrb[52].mxu1  ;;  %v5756_v8 = vpop.f32.mrb[80].mxu0  ;;  %v7440_v11 = vadd.f32 %v5755_v13, %v1605_v15 }
 0x294   : > { %v5699_v20 = vpop.f32.mrb[53].mxu1  ;;  %v5757_v34 = vpop.f32.mrb[81].mxu0 }
 0x295   : > { %v5700_v21 = vadd.f32 %v5699_v20, %v5698_v18  ;;  %v5758_v57 = vadd.f32 %v5757_v34, %v5756_v8  ;;  %v5701_v19 = vpop.f32.mrb[54].mxu1  ;;  %v5759_v12 = vpop.f32.mrb[82].mxu0 }
 0x296   : > { %v5702_v40 = vpop.f32.mrb[55].mxu1  ;;  %v5760_v24 = vpop.f32.mrb[83].mxu0 }
 0x297   : > { %v1610_v25 = vadd.f32 %v5700_v21, %v7404_v6 }
 0x299   : > { %v7443_v26 = vadd.f32 %v5758_v57, %v1610_v25 }
 0x29b   : > { %v1737_v43 = vpop.f32.mrb[56].mxu1 }
 0x29c   : > { %v1738_v35 = vadd.f32 %v1737_v43, %v7408_v22  ;;  %v6273_v27 = vpop.f32.mrb[57].mxu1 }
 0x29d   : > { %v1740_v36 = vpop.f32.mrb[58].mxu1 }
 0x29e   : > { %vm1791_vm8 = vcmp.gt.f32.partialorder %v1738_v35, 0.0  ;;  %v1804_v38 = vmul.f32 0.2, %v1738_v35  ;;  %v1741_v39 = vadd.f32 %v1740_v36, %v7410_v23  ;;  %v6274_v44 = vpop.f32.mrb[59].mxu1 }
 0x2a0   : > { %v1817_v45 = vsel %vm1791_vm8, %v1738_v35, %v1804_v38  ;;  %vm1792_vm10 = vcmp.gt.f32.partialorder %v1741_v39, 0.0  ;;  %v1805_v47 = vmul.f32 0.2, %v1741_v39 }
 0x2a1   : > { %v1844_v52 = vrot.slane %v1817_v45, 4 }
 0x2a2   : > { %v1818_v50 = vsel %vm1792_vm10, %v1741_v39, %v1805_v47 }
 0x2a3   : > { %v1845_v54 = vrot.slane %v1818_v50, 4  ;;  %v1745_v56 = vpop.f32.mrb[60].mxu1  ;;  %v1883_v8 = vadd.f32 %v1844_v52, %v7261_v4 }
 0x2a4   : > { %v1746_v6 = vadd.f32 %v1745_v56, %v7414_v42  ;;  %v6277_v60 = vpop.f32.mrb[61].mxu1 }
 0x2a5   : > { %v1846_v49 = vsel %vm1179_vm7, %v1844_v52, %v1845_v54  ;;  %v1748_v22 = vpop.f32.mrb[62].mxu1  ;;  %v1897_v25 = vmul.f32 0.5, %v1883_v8 }
 0x2a6   : > { %vm1793_vm11 = vcmp.gt.f32.partialorder %v1746_v6, 0.0  ;;  %v1806_v62 = vmul.f32 0.2, %v1746_v6  ;;  %v1749_v51 = vadd.f32 %v1748_v22, %v7416_v46  ;;  %v6278_v59 = vpop.f32.mrb[63].mxu1  ;;  %v1884_v14 = vadd.f32 %v1846_v49, %v7258_v1 }
 0x2a8   : > { %v1819_v23 = vsel %vm1793_vm11, %v1746_v6, %v1806_v62  ;;  %vm1794_vm12 = vcmp.gt.f32.partialorder %v1749_v51, 0.0  ;;  %v1807_v3 = vmul.f32 0.2, %v1749_v51  ;;  %v7456_v19 = vmul.f32 0.5, %v1884_v14 }
 0x2a9   : > { %v1847_v9 = vrot.slane %v1819_v23, 4 }
 0x2aa   : > { %v1820_v13 = vsel %vm1794_vm12, %v1749_v51, %v1807_v3  ;;  %v1911_v27 = vpack.c.bf16 %v7456_v19, %v1897_v25 }
 0x2ab   : > { %v1848_v15 = vsel %vm1179_vm7, %v1845_v54, %v1847_v9  ;;  %v1849_v18 = vrot.slane %v1820_v13, 4  ;;  %v1753_v42 = vpop.f32.mrb[64].mxu1 }
 0x2ac   : > { %v1885_v20 = vadd.f32 %v1848_v15, %v7267_v7  ;;  %v1754_v34 = vadd.f32 %v1753_v42, %v7420_v2  ;;  %v6281_v21 = vpop.f32.mrb[65].mxu1  ;;  %v1924_v60 = vrot.slane %v1911_v27, 2  ;;  %v1936_v14 = vrot.slane %v1911_v27, 4 }
 0x2ad   : > { %v1850_v46 = vsel %vm1179_vm7, %v1847_v9, %v1849_v18  ;;  %v1756_v57 = vpop.f32.mrb[66].mxu1 }
 0x2ae   : > { %v1886_v12 = vadd.f32 %v1850_v46, %v7269_v31  ;;  %vm1795_vm13 = vcmp.gt.f32.partialorder %v1754_v34, 0.0  ;;  %v1808_v1 = vmul.f32 0.2, %v1754_v34  ;;  %v6282_v40 = vpop.f32.mrb[67].mxu1  ;;  %v1757_v24 = vadd.f32 %v1756_v57, %v7422_v10 }
 0x2af   : > { %v7460_v43 = vmul.f32 0.5, %v1885_v20 }
 0x2b0   : > { %v7462_v4 = vmul.f32 0.5, %v1886_v12  ;;  %v1821_v7 = vsel %vm1795_vm13, %v1754_v34, %v1808_v1  ;;  %vm1796_vm14 = vcmp.gt.f32.partialorder %v1757_v24, 0.0  ;;  %v1809_v35 = vmul.f32 0.2, %v1757_v24 }
 0x2b1   : > { %v1851_v2 = vrot.slane %v1821_v7, 4 }
 0x2b2   : > { %v1912_v36 = vpack.c.bf16 %v7462_v4, %v7460_v43  ;;  %v1822_v38 = vsel %vm1796_vm14, %v1757_v24, %v1809_v35 }
 0x2b3   : > { %v1852_v31 = vsel %vm1179_vm7, %v1849_v18, %v1851_v2  ;;  %v1761_v39 = vpop.f32.mrb[68].mxu1  ;;  %v1853_v44 = vrot.slane %v1822_v38, 4 }
 0x2b4   : > { %v1887_v10 = vadd.f32 %v1852_v31, %v7287_v28  ;;  %v1762_v45 = vadd.f32 %v1761_v39, %v7426_v5  ;;  %v6285_v47 = vpop.f32.mrb[69].mxu1  ;;  %v1925_v50 = vrot.slane %v1912_v36, 2  ;;  %v1950_v62 = vrot.slane %v1912_v36, 6 }
 0x2b5   : > { %v1764_v52 = vpop.f32.mrb[70].mxu1  ;;  %v1854_v54 = vsel %vm1179_vm7, %v1851_v2, %v1853_v44  ;;  %v1937_v5 = vrot.slane %v1912_v36, 4 }
 0x2b6   : > { %vm1797_vm15 = vcmp.gt.f32.partialorder %v1762_v45, 0.0  ;;  %v1810_v56 = vmul.f32 0.2, %v1762_v45  ;;  %v6286_v6 = vpop.f32.mrb[71].mxu1  ;;  %v1888_v49 = vadd.f32 %v1854_v54, %v7289_v30  ;;  %v1765_v22 = vadd.f32 %v1764_v52, %v7428_v41  ;;  %v6609_v52 = vld [vmem:[#allocation5 + $0x248] sm:$0xff]  }
 0x2b7   : > { %v7473_v51 = vmul.f32 0.5, %v1887_v10  ;;  %v1926_v59 = vsel %vm445_vm3, %v1924_v60, %v1925_v50  ;;  %v2056_v18 = vrot.slane %v1950_v62, 2  ;;  %v1938_v1 = vsel %vm1179_vm7, %v1936_v14, %v1937_v5 }
 0x2b8   : > { %v1823_v28 = vsel %vm1797_vm15, %v1762_v45, %v1810_v56  ;;  %v7476_v23 = vmul.f32 0.5, %v1888_v49  ;;  %vm1798_vm0 = vcmp.gt.f32.partialorder %v1765_v22, 0.0  ;;  %v1811_v9 = vmul.f32 0.2, %v1765_v22 }
 0x2b9   : > { %v1855_v3 = vrot.slane %v1823_v28, 4  ;;  %v2050_v21 = vrot.slane %v1926_v59, 2  ;;  %v2053_v47 = vrot.slane %v1938_v1, 2 }
 0x2ba   : > { %v7480_v13 = vpack.c.bf16 %v7476_v23, %v7473_v51  ;;  %v1824_v41 = vsel %vm1798_vm0, %v1765_v22, %v1811_v9 }
 0x2bb   : > { %v1856_v30 = vsel %vm1179_vm7, %v1853_v44, %v1855_v3  ;;  %v1769_v15 = vpop.f32.mrb[72].mxu1  ;;  %v1857_v8 = vrot.slane %v1824_v41, 4  ;;  %v6610_v41 = vld [vmem:[#allocation5 + $0x250] sm:$0xff]  }
 0x2bc   : > { %v1889_v42 = vadd.f32 %v1856_v30, %v7306_v61  ;;  %v1770_v20 = vadd.f32 %v1769_v15, %v7432_v48  ;;  %v6289_v34 = vpop.f32.mrb[73].mxu1  ;;  %v1927_v57 = vrot.slane %v7480_v13, 2  ;;  %v1951_v12 = vrot.slane %v7480_v13, 6 }
 0x2bd   : > { %v1772_v46 = vpop.f32.mrb[74].mxu1  ;;  %v1939_v40 = vrot.slane %v7480_v13, 4  ;;  %v1858_v25 = vsel %vm1179_vm7, %v1855_v3, %v1857_v8 }
 0x2be   : > { %v7489_v24 = vmul.f32 0.5, %v1889_v42  ;;  %vm1799_vm5 = vcmp.gt.f32.partialorder %v1770_v20, 0.0  ;;  %v1812_v61 = vmul.f32 0.2, %v1770_v20  ;;  %v6290_v7 = vpop.f32.mrb[75].mxu1  ;;  %v1890_v48 = vadd.f32 %v1858_v25, %v7308_v55 }
 0x2bf   : > { %v1773_v2 = vadd.f32 %v1772_v46, %v7434_v58  ;;  %v7495_v35 = vsel %vm445_vm3, %v1925_v50, %v1927_v57  ;;  %v1952_v27 = vsel %vm1949_vm1, %v1950_v62, %v1951_v12  ;;  %v7500_v39 = vsel %vm1179_vm7, %v1937_v5, %v1939_v40 }
 0x2c0   : > { %v1825_v36 = vsel %vm1799_vm5, %v1770_v20, %v1812_v61  ;;  %v2051_v31 = vrot.slane %v7495_v35, 2  ;;  %v2057_v38 = vrot.slane %v1952_v27, 2  ;;  %v7502_v10 = vmul.f32 0.5, %v1890_v48  ;;  %v6611_v61 = vld [vmem:[#allocation5 + $0x258] sm:$0xff]  }
 0x2c1   : > { %v1859_v44 = vrot.slane %v1825_v36, 4  ;;  %vm1800_vm6 = vcmp.gt.f32.partialorder %v1773_v2, 0.0  ;;  %v1813_v45 = vmul.f32 0.2, %v1773_v2  ;;  %v2054_v50 = vrot.slane %v7500_v39, 2 }
 0x2c2   : > { %v2052_v55 = vsel %vm445_vm3, %v2050_v21, %v2051_v31  ;;  %v2058_v58 = vsel %vm445_vm3, %v2056_v18, %v2057_v38  ;;  %v7509_v54 = vpack.c.bf16 %v7502_v10, %v7489_v24 }
 0x2c3   : > { %v1860_v56 = vsel %vm1179_vm7, %v1857_v8, %v1859_v44  ;;  %v1826_v6 = vsel %vm1800_vm6, %v1773_v2, %v1813_v45  ;;  %2383 = vmatprep.mubr.bf16.mxu0 %v2052_v55  ;;  %2463 = vmatprep.mubr.bf16.mxu1 %v2058_v58  ;;  %v1777_v60 = vpop.f32.mrb[76].mxu1  ;;  %v2055_v28 = vsel %vm445_vm3, %v2053_v47, %v2054_v50 }
 0x2c4   : > { %v1891_v49 = vadd.f32 %v1860_v56, %v7325_v17  ;;  %v1861_v22 = vrot.slane %v1826_v6, 4  ;;  %v1778_v62 = vadd.f32 %v1777_v60, %v7438_v16  ;;  %2384 = vmatmul.mubr.bf16.vlgmr.msra.gmra.mrb[84].mxu0 %v1926_v59  ;;  %v6293_v5 = vpop.f32.mrb[77].mxu1  ;;  %2464 = vmatmul.mubr.bf16.vlgmr.msra.gmra.mrb[84].mxu1 %v2055_v28  ;;  %v1929_v9 = vrot.slane %v7509_v54, 2 }
 0x2c5   : > { %6300 = vmatpush3.bf16.msra.mxu0 %v7398_v32  ;;  %v1780_v3 = vpop.f32.mrb[78].mxu1  ;;  %v1953_v14 = vrot.slane %v7509_v54, 6  ;;  %v1941_v13 = vrot.slane %v7509_v54, 4 }
 0x2c6   : > { %v7519_v30 = vmul.f32 0.5, %v1891_v49  ;;  %v1862_v17 = vsel %vm1179_vm7, %v1859_v44, %v1861_v22  ;;  %vm1801_vm8 = vcmp.gt.f32.partialorder %v1778_v62, 0.0  ;;  %v1814_v16 = vmul.f32 0.2, %v1778_v62  ;;  %v6294_v59 = vpop.f32.mrb[79].mxu1  ;;  %6301 = vmatprep.subr.bf16.mxu0 %v6609_v52 }
 0x2c7   : > { %v1892_v15 = vadd.f32 %v1862_v17, %v7327_v53  ;;  %v1781_v32 = vadd.f32 %v1780_v3, %v7440_v11  ;;  %v7525_v18 = vsel %vm445_vm3, %v1927_v57, %v1929_v9  ;;  %v1954_v42 = vsel %vm1949_vm1, %v1951_v12, %v1953_v14 }
 0x2c8   : > { %v1827_v8 = vsel %vm1801_vm8, %v1778_v62, %v1814_v16  ;;  %v2059_v20 = vrot.slane %v7525_v18, 2  ;;  %v2063_v34 = vrot.slane %v1954_v42, 2  ;;  %v1942_v21 = vsel %vm1179_vm7, %v1939_v40, %v1941_v13 }
 0x2c9   : > { %v7530_v46 = vmul.f32 0.5, %v1892_v15  ;;  %v1863_v1 = vrot.slane %v1827_v8, 4  ;;  %vm1802_vm10 = vcmp.gt.f32.partialorder %v1781_v32, 0.0  ;;  %v1815_v25 = vmul.f32 0.2, %v1781_v32  ;;  %6302 = vmatpush3.bf16.msra.mxu0 %v6609_v52 }
 0x2ca   : > { %v2060_v53 = vsel %vm445_vm3, %v2051_v31, %v2059_v20  ;;  %v2064_v11 = vsel %vm445_vm3, %v2057_v38, %v2063_v34  ;;  %v2061_v57 = vrot.slane %v1942_v21, 2  ;;  %6303 = vmatprep.subr.bf16.mxu0 %v6610_v41 }
 0x2cb   : > { %v1915_v12 = vpack.c.bf16 %v7530_v46, %v7519_v30  ;;  %v1864_v7 = vsel %vm1179_vm7, %v1861_v22, %v1863_v1  ;;  %v1828_v48 = vsel %vm1802_vm10, %v1781_v32, %v1815_v25  ;;  %2391 = vmatprep.mubr.bf16.mxu0 %v2060_v53  ;;  %2471 = vmatprep.mubr.bf16.mxu1 %v2064_v11  ;;  %v1785_v40 = vpop.f32.mrb[80].mxu1 }
 0x2cc   : > { %v1865_v2 = vrot.slane %v1828_v48, 4  ;;  %v1786_v27 = vadd.f32 %v1785_v40, %v7443_v26  ;;  %2392 = vmatmul.mubr.bf16.gmra.mrb[88].mxu0 %v7495_v35  ;;  %v2062_v36 = vsel %vm445_vm3, %v2054_v50, %v2061_v57  ;;  %v6297_v31 = vpop.f32.mrb[81].mxu1  ;;  %v1893_v38 = vadd.f32 %v1864_v7, %v7344_v29  ;;  %v6612_v26 = vld [vmem:[#allocation5 + $0x260] sm:$0xff]   ;;  %v6615_v40 = vld [vmem:[#allocation5 + $0x278] sm:$0xff]  }
 0x2cd   : > { %2472 = vmatmul.mubr.bf16.gmra.mrb[88].mxu1 %v2062_v36  ;;  %v1788_v39 = vpop.f32.mrb[82].mxu1  ;;  %6304 = vmatpush3.bf16.msra.mxu0 %v6610_v41  ;;  %v1931_v44 = vrot.slane %v1915_v12, 2  ;;  %v1955_v45 = vrot.slane %v1915_v12, 6  ;;  %v1943_v55 = vrot.slane %v1915_v12, 4 }
 0x2ce   : > { %v1866_v58 = vsel %vm1179_vm7, %v1863_v1, %v1865_v2  ;;  %vm1803_vm11 = vcmp.gt.f32.partialorder %v1786_v27, 0.0  ;;  %v1816_v47 = vmul.f32 0.2, %v1786_v27  ;;  %v6298_v52 = vpop.f32.mrb[83].mxu1  ;;  %6305 = vmatprep.subr.bf16.mxu0 %v6611_v61  ;;  %v7549_v62 = vmul.f32 0.5, %v1893_v38 }
 0x2cf   : > { %v1894_v54 = vadd.f32 %v1866_v58, %v7346_v37  ;;  %v7544_v50 = vsel %vm445_vm3, %v1929_v9, %v1931_v44  ;;  %v1956_v29 = vsel %vm1949_vm1, %v1953_v14, %v1955_v45  ;;  %v1944_v56 = vsel %vm1179_vm7, %v1941_v13, %v1943_v55  ;;  %v6613_v14 = vld [vmem:[#allocation5 + $0x268] sm:$0xff]   ;;  %v6616_v58 = vld [vmem:[#allocation5 + $0x2c0] sm:$0xff]  }
 0x2d0   : > { %v1829_v6 = vsel %vm1803_vm11, %v1786_v27, %v1816_v47  ;;  %v2065_v60 = vrot.slane %v7544_v50, 2  ;;  %v2069_v49 = vrot.slane %v1956_v29, 2  ;;  %v2067_v22 = vrot.slane %v1944_v56, 2  ;;  %v6617_v47 = vld [vmem:[#allocation5 + $0x280] sm:$0xff]   ;;  %5895 = vmatprep.subr.bf16.mxu1 %v6616_v58  ;;  %v6618_v52 = vld [vmem:[#allocation5 + $0x2c8] sm:$0xff]  }
 0x2d1   : > { %v7551_v28 = vmul.f32 0.5, %v1894_v54  ;;  %v1867_v5 = vrot.slane %v1829_v6, 4  ;;  %6306 = vmatpush3.bf16.msra.mxu0 %v6611_v61  ;;  %5896 = vmatpush3.bf16.msra.mxu1 %v6617_v47  ;;  %v6620_v54 = vld [vmem:[#allocation5 + $0x2d0] sm:$0xff]   ;;  %v6626_v29 = vld [vmem:[#allocation5 + $0x348] sm:$0xff]  }
 0x2d2   : > { %v2066_v37 = vsel %vm445_vm3, %v2059_v20, %v2065_v60  ;;  %v2070_v3 = vsel %vm445_vm3, %v2063_v34, %v2069_v49  ;;  %v2068_v9 = vsel %vm445_vm3, %v2061_v57, %v2067_v22  ;;  %6307 = vmatprep.subr.bf16.mxu0 %v6612_v26  ;;  %v6614_v20 = vld [vmem:[#allocation5 + $0x270] sm:$0xff]   ;;  %5897 = vmatprep.subr.bf16.mxu1 %v6618_v52  ;;  %v6627_v56 = vld [vmem:[#allocation5 + $0x308] sm:$0xff]  }
 0x2d3   : > { %v1916_v13 = vpack.c.bf16 %v7551_v28, %v7549_v62  ;;  %v1868_v17 = vsel %vm1179_vm7, %v1865_v2, %v1867_v5  ;;  %v1896_v16 = vadd.f32 %v1867_v5, %v7364_v0  ;;  %2399 = vmatprep.mubr.bf16.mxu0 %v2066_v37  ;;  %2479 = vmatprep.mubr.bf16.mxu1 %v2070_v3  ;;  %v6629_v6 = vld [vmem:[#allocation5 + $0x350] sm:$0xff]   ;;  %v6625_v5 = vld [vmem:[#allocation5 + $0x298] sm:$0xff]   ;;  %v6628_v3 = vld [vmem:[#allocation5 + $0x2e0] sm:$0xff]  }
 0x2d4   : > { %v1895_v59 = vadd.f32 %v1868_v17, %v7362_v63  ;;  %2400 = vmatmul.mubr.bf16.gmra.mrb[92].mxu0 %v7525_v18  ;;  %v6633_v37 = vld [vmem:[#allocation5 + $0x318] sm:$0xff]   ;;  %v6634_v17 = vld [vmem:[#allocation5 + $0x2e8] sm:$0xff]  }
 0x2d5   : > { %v1910_v41 = vmul.f32 0.5, %v1896_v16  ;;  %2480 = vmatmul.mubr.bf16.gmra.mrb[92].mxu1 %v2068_v9  ;;  %v1933_v15 = vrot.slane %v1916_v13, 2  ;;  %v1957_v32 = vrot.slane %v1916_v13, 6  ;;  %v1945_v42 = vrot.slane %v1916_v13, 4  ;;  %6308 = vmatpush3.bf16.msra.mxu0 %v6612_v26  ;;  %v6619_v26 = vld [vmem:[#allocation5 + $0x288] sm:$0xff]   ;;  %v6636_v9 = vld [vmem:[#allocation5 + $0x360] sm:$0xff]  }
 0x2d6   : > { %v7562_v8 = vmul.f32 0.5, %v1895_v59  ;;  %6309 = vmatprep.subr.bf16.mxu0 %v6613_v14  ;;  %5898 = vmatpush3.bf16.msra.mxu1 %v6619_v26  ;;  %v6637_v13 = vld [vmem:[#allocation5 + $0x320] sm:$0xff]   ;;  %v6639_v16 = vld [vmem:[#allocation5 + $0x368] sm:$0xff]  }
 0x2d7   : > { %v1934_v34 = vsel %vm445_vm3, %v1931_v44, %v1933_v15  ;;  %v1958_v0 = vsel %vm1949_vm1, %v1955_v45, %v1957_v32  ;;  %v1946_v21 = vsel %vm1179_vm7, %v1943_v55, %v1945_v42  ;;  %v2077_v1 = vrot.slane %v1933_v15, 2  ;;  %5899 = vmatprep.subr.bf16.mxu1 %v6620_v54  ;;  %v6635_v59 = vld [vmem:[#allocation5 + $0x2a8] sm:$0xff]  }
 0x2d8   : > { %v1917_v63 = vpack.c.bf16 %v1910_v41, %v7562_v8  ;;  %v2071_v25 = vrot.slane %v1934_v34, 2  ;;  %v2075_v53 = vrot.slane %v1958_v0, 2  ;;  %v2073_v11 = vrot.slane %v1946_v21, 2  ;;  %v6641_v41 = vld [vmem:[#allocation5 + $0x328] sm:$0xff]   ;;  %v6646_v0 = vld [vmem:[#allocation5 + $0x378] sm:$0xff]  }
 0x2d9   : > { %6310 = vmatpush3.bf16.msra.mxu0 %v6613_v14  ;;  %v6630_v14 = vld [vmem:[#allocation5 + $0x2a0] sm:$0xff]   ;;  %v6645_v21 = vld [vmem:[#allocation5 + $0x2b8] sm:$0xff]  }
 0x2da   : > { %v2072_v57 = vsel %vm445_vm3, %v2065_v60, %v2071_v25  ;;  %v2076_v61 = vsel %vm445_vm3, %v2069_v49, %v2075_v53  ;;  %v2074_v12 = vsel %vm445_vm3, %v2067_v22, %v2073_v11  ;;  %6311 = vmatprep.subr.bf16.mxu0 %v6614_v20  ;;  %v1959_v7 = vrot.slane %v1917_v63, 6  ;;  %v6631_v60 = vld [vmem:[#allocation5 + $0x310] sm:$0xff]   ;;  %v6624_v49 = vld [vmem:[#allocation5 + $0x2d8] sm:$0xff]  }
 0x2db   : > { %2407 = vmatprep.mubr.bf16.mxu0 %v2072_v57  ;;  %2487 = vmatprep.mubr.bf16.mxu1 %v2076_v61  ;;  %v1947_v48 = vrot.slane %v1917_v63, 4  ;;  %v2078_v2 = vsel %vm445_vm3, %v2071_v25, %v2077_v1  ;;  %v2083_v45 = vrot.slane %v1917_v63, 2  ;;  %v6632_v22 = vld [vmem:[#allocation5 + $0x358] sm:$0xff]   ;;  %v7581_v63 = vld [vmem:[#allocation5 + $0x380] sm:$0xff]  }
 0x2dc   : > { %2408 = vmatmul.mubr.bf16.gmra.mrb[96].mxu0 %v7544_v50  ;;  %v1960_v27 = vsel %vm1949_vm1, %v1957_v32, %v1959_v7  ;;  %v6642_v32 = vld [vmem:[#allocation5 + $0x370] sm:$0xff]  }
 0x2dd   : > { %2488 = vmatmul.mubr.bf16.gmra.mrb[96].mxu1 %v2074_v12  ;;  %2415 = vmatprep.mubr.bf16.mxu0 %v2078_v2  ;;  %v1948_v36 = vsel %vm1179_vm7, %v1945_v42, %v1947_v48  ;;  %v2081_v31 = vrot.slane %v1960_v27, 2  ;;  %v2084_v55 = vsel %vm445_vm3, %v1933_v15, %v2083_v45  ;;  %v6640_v42 = vld [vmem:[#allocation5 + $0x2b0] sm:$0xff]  }
 0x2de   : > { %6312 = vmatpush3.bf16.msra.mxu0 %v6614_v20  ;;  %v2079_v39 = vrot.slane %v1948_v36, 2  ;;  %v6643_v20 = vld [vmem:[#allocation5 + $0x330] sm:$0xff]  }
 0x2df   : > { %6313 = vmatprep.subr.bf16.mxu0 %v6615_v40  ;;  %v2082_v38 = vsel %vm445_vm3, %v2075_v53, %v2081_v31 }
 0x2e0   : > { %2495 = vmatprep.mubr.bf16.mxu1 %v2082_v38  ;;  %v2080_v44 = vsel %vm445_vm3, %v2073_v11, %v2079_v39  ;;  %v7587_v11 = vld [vmem:[%s7976_s4 + $0x1] ss:$0 sm:$0xff] }
 0x2e2   : > { %6314 = vmatpush3.bf16.msra.mxu0 %v6615_v40 }
 0x2e4   : > { %2416 = vmatmul.mubr.bf16.gmra.mrb[100].mxu0 %v1934_v34 }
 0x2e5   : > { %2496 = vmatmul.mubr.bf16.gmra.mrb[100].mxu1 %v2080_v44  ;;  %2423 = vmatprep.mubr.bf16.mxu0 %v2077_v1  ;;  %v6647_v1 = vld [vmem:[#allocation5 + $0x338] sm:$0xff]  }
 0x2e6   : > { %2503 = vmatprep.mubr.bf16.mxu1 %v2081_v31 }
 0x2ec   : > { %2424 = vmatmul.mubr.bf16.gmra.mrb[104].mxu0 %v1933_v15  ;;  %v6638_v15 = vld [vmem:[#allocation5 + $0x2f0] sm:$0xff]  }
 0x2ed   : > { %2504 = vmatmul.mubr.bf16.gmra.mrb[104].mxu1 %v2079_v39  ;;  %6315 = vmatprep.mubr.bf16.mxu0 %v7495_v35  ;;  %v6621_v35 = vld [vmem:[#allocation5 + $0x290] sm:$0xff]  }
 0x2ee   : > { %5900 = vmatpush3.bf16.msra.mxu1 %v6621_v35 }
 0x2ef   : > { %5901 = vmatprep.subr.bf16.mxu1 %v6624_v49 }
 0x2f2   : > { %5902 = vmatpush3.bf16.msra.mxu1 %v6625_v5 }
 0x2f3   : > { %5903 = vmatprep.subr.bf16.mxu1 %v6628_v3 }
 0x2f4   : > { %6316 = vmatmul.mubr.bf16.vlgmr.msra.gmra.mrb[108].mxu0 %v7525_v18  ;;  %v6622_v18 = vld [vmem:[#allocation5 + $0x340] sm:$0xff]  }
 0x2f5   : > { %6319 = vmatprep.mubr.bf16.mxu0 %v7544_v50  ;;  %v6623_v50 = vld [vmem:[#allocation5 + $0x300] sm:$0xff]   ;;  %5935 = vmatprep.subr.bf16.mxu0 %v6622_v18 }
 0x2f6   : > { %5936 = vmatpush3.bf16.msra.mxu0 %v6623_v50  ;;  %5904 = vmatpush3.bf16.msra.mxu1 %v6630_v14 }
 0x2f7   : > { %5937 = vmatprep.subr.bf16.mxu0 %v6626_v29  ;;  %5905 = vmatprep.subr.bf16.mxu1 %v6634_v17 }
 0x2fa   : > { %5938 = vmatpush3.bf16.msra.mxu0 %v6627_v56  ;;  %5906 = vmatpush3.bf16.msra.mxu1 %v6635_v59 }
 0x2fb   : > { %5939 = vmatprep.subr.bf16.mxu0 %v6629_v6  ;;  %5907 = vmatprep.subr.bf16.mxu1 %v6638_v15 }
 0x2fc   : > { %6320 = vmatmul.mubr.bf16.gmra.mrb[112].mxu0 %v1934_v34  ;;  %v6644_v34 = vld [vmem:[#allocation5 + $0x2f8] sm:$0xff]  }
 0x2fd   : > { %6323 = vmatprep.mubr.bf16.mxu0 %v2084_v55 }
 0x2fe   : > { %5940 = vmatpush3.bf16.msra.mxu0 %v6631_v60  ;;  %5908 = vmatpush3.bf16.msra.mxu1 %v6640_v42 }
 0x2ff   : > { %5941 = vmatprep.subr.bf16.mxu0 %v6632_v22  ;;  %5909 = vmatprep.subr.bf16.mxu1 %v6644_v34 }
 0x302   : > { %5942 = vmatpush3.bf16.msra.mxu0 %v6633_v37  ;;  %5910 = vmatpush3.bf16.msra.mxu1 %v6645_v21 }
 0x303   : > { %5943 = vmatprep.subr.bf16.mxu0 %v6636_v9  ;;  %6327 = vmatprep.subr.bf16.mxu1 %v7581_v63 }
 0x304   : > { %6324 = vmatmul.mubr.bf16.gmra.mrb[116].mxu0 %v2083_v45 }
 0x306   : > { %5944 = vmatpush3.bf16.msra.mxu0 %v6637_v13 }
 0x307   : > { %5945 = vmatprep.subr.bf16.mxu0 %v6639_v16 }
 0x30a   : > { %5946 = vmatpush3.bf16.msra.mxu0 %v6641_v41 }
 0x30b   : > { %5947 = vmatprep.subr.bf16.mxu0 %v6642_v32 }
 0x30e   : > { %5948 = vmatpush3.bf16.msra.mxu0 %v6643_v20 }
 0x30f   : > { %5949 = vmatprep.subr.bf16.mxu0 %v6646_v0 }
 0x312   : > { %5950 = vmatpush3.bf16.msra.mxu0 %v6647_v1 }
 0x397   : > { %v5793_v25 = vpop.f32.mrb[84].mxu0  ;;  %v5845_v53 = vpop.f32.mrb[84].mxu1 }
 0x398   : > { %v5794_v57 = vpop.f32.mrb[85].mxu0  ;;  %v5846_v12 = vpop.f32.mrb[85].mxu1 }
 0x399   : > { %v5795_v61 = vadd.f32 %v5794_v57, %v5793_v25  ;;  %v5796_v7 = vpop.f32.mrb[86].mxu0  ;;  %v5847_v48 = vadd.f32 %v5846_v12, %v5845_v53  ;;  %v5848_v40 = vpop.f32.mrb[86].mxu1 }
 0x39a   : > { %v5797_v2 = vpop.f32.mrb[87].mxu0  ;;  %v5849_v31 = vpop.f32.mrb[87].mxu1 }
 0x39b   : > { %v2386_v27 = vadd.f32 %v5795_v61, %v7587_v11  ;;  %v5798_v36 = vadd.f32 %v5797_v2, %v5796_v7  ;;  %v5850_v38 = vadd.f32 %v5849_v31, %v5848_v40 }
 0x39d   : > { %v2389_v39 = vadd.f32 %v5798_v36, %v7587_v11  ;;  %v7591_v44 = vadd.f32 %v5847_v48, %v2386_v27 }
 0x39f   : > { %v5799_v45 = vpop.f32.mrb[88].mxu0  ;;  %v7593_v55 = vadd.f32 %v5850_v38, %v2389_v39 }
 0x3a0   : > { %v5851_v58 = vpop.f32.mrb[88].mxu1  ;;  %v5800_v47 = vpop.f32.mrb[89].mxu0 }
 0x3a1   : > { %v5801_v52 = vadd.f32 %v5800_v47, %v5799_v45  ;;  %v5852_v26 = vpop.f32.mrb[89].mxu1  ;;  %v5802_v54 = vpop.f32.mrb[90].mxu0 }
 0x3a2   : > { %v5853_v35 = vadd.f32 %v5852_v26, %v5851_v58  ;;  %v5854_v18 = vpop.f32.mrb[90].mxu1  ;;  %v5803_v50 = vpop.f32.mrb[91].mxu0 }
 0x3a3   : > { %v2394_v29 = vadd.f32 %v5801_v52, %v7587_v11  ;;  %v5804_v56 = vadd.f32 %v5803_v50, %v5802_v54  ;;  %v5855_v6 = vpop.f32.mrb[91].mxu1 }
 0x3a4   : > { %v5856_v60 = vadd.f32 %v5855_v6, %v5854_v18 }
 0x3a5   : > { %v2397_v49 = vadd.f32 %v5804_v56, %v7587_v11  ;;  %v7597_v22 = vadd.f32 %v5853_v35, %v2394_v29 }
 0x3a7   : > { %v5805_v5 = vpop.f32.mrb[92].mxu0  ;;  %v7599_v37 = vadd.f32 %v5856_v60, %v2397_v49 }
 0x3a8   : > { %v5857_v3 = vpop.f32.mrb[92].mxu1  ;;  %v5806_v9 = vpop.f32.mrb[93].mxu0 }
 0x3a9   : > { %v5807_v14 = vadd.f32 %v5806_v9, %v5805_v5  ;;  %v5858_v13 = vpop.f32.mrb[93].mxu1  ;;  %v5808_v17 = vpop.f32.mrb[94].mxu0 }
 0x3aa   : > { %v5859_v16 = vadd.f32 %v5858_v13, %v5857_v3  ;;  %v5860_v59 = vpop.f32.mrb[94].mxu1  ;;  %v5809_v41 = vpop.f32.mrb[95].mxu0 }
 0x3ab   : > { %v2402_v15 = vadd.f32 %v5807_v14, %v7587_v11  ;;  %v5810_v32 = vadd.f32 %v5809_v41, %v5808_v17  ;;  %v5861_v42 = vpop.f32.mrb[95].mxu1 }
 0x3ac   : > { %v5862_v20 = vadd.f32 %v5861_v42, %v5860_v59 }
 0x3ad   : > { %v2405_v34 = vadd.f32 %v5810_v32, %v7587_v11  ;;  %v7603_v0 = vadd.f32 %v5859_v16, %v2402_v15 }
 0x3af   : > { %v5811_v21 = vpop.f32.mrb[96].mxu0  ;;  %v7605_v1 = vadd.f32 %v5862_v20, %v2405_v34 }
 0x3b0   : > { %v5863_v25 = vpop.f32.mrb[96].mxu1  ;;  %v5812_v53 = vpop.f32.mrb[97].mxu0 }
 0x3b1   : > { %v5813_v57 = vadd.f32 %v5812_v53, %v5811_v21  ;;  %v5864_v61 = vpop.f32.mrb[97].mxu1  ;;  %v5814_v12 = vpop.f32.mrb[98].mxu0 }
 0x3b2   : > { %v5865_v7 = vadd.f32 %v5864_v61, %v5863_v25  ;;  %v5866_v48 = vpop.f32.mrb[98].mxu1  ;;  %v5815_v40 = vpop.f32.mrb[99].mxu0 }
 0x3b3   : > { %v2410_v2 = vadd.f32 %v5813_v57, %v7587_v11  ;;  %v5816_v27 = vadd.f32 %v5815_v40, %v5814_v12  ;;  %v5867_v36 = vpop.f32.mrb[99].mxu1 }
 0x3b4   : > { %v5868_v31 = vadd.f32 %v5867_v36, %v5866_v48 }
 0x3b5   : > { %v2413_v38 = vadd.f32 %v5816_v27, %v7587_v11  ;;  %v2490_v39 = vadd.f32 %v5865_v7, %v2410_v2 }
 0x3b7   : > { %v5817_v45 = vpop.f32.mrb[100].mxu0  ;;  %v7609_v58 = vadd.f32 %v5868_v31, %v2413_v38 }
 0x3b8   : > { %v5869_v47 = vpop.f32.mrb[100].mxu1  ;;  %v5818_v52 = vpop.f32.mrb[101].mxu0 }
 0x3b9   : > { %v5819_v26 = vadd.f32 %v5818_v52, %v5817_v45  ;;  %v5870_v54 = vpop.f32.mrb[101].mxu1  ;;  %v5820_v35 = vpop.f32.mrb[102].mxu0 }
 0x3ba   : > { %v5871_v18 = vadd.f32 %v5870_v54, %v5869_v47  ;;  %v5872_v50 = vpop.f32.mrb[102].mxu1  ;;  %v5821_v29 = vpop.f32.mrb[103].mxu0 }
 0x3bb   : > { %v2418_v56 = vadd.f32 %v5819_v26, %v7587_v11  ;;  %v5822_v6 = vadd.f32 %v5821_v29, %v5820_v35  ;;  %v5873_v60 = vpop.f32.mrb[103].mxu1 }
 0x3bc   : > { %v5874_v49 = vadd.f32 %v5873_v60, %v5872_v50 }
 0x3bd   : > { %v2421_v5 = vadd.f32 %v5822_v6, %v7587_v11  ;;  %v7613_v3 = vadd.f32 %v5871_v18, %v2418_v56 }
 0x3bf   : > { %v5823_v9 = vpop.f32.mrb[104].mxu0  ;;  %v7615_v14 = vadd.f32 %v5874_v49, %v2421_v5 }
 0x3c0   : > { %v5875_v13 = vpop.f32.mrb[104].mxu1  ;;  %v5824_v17 = vpop.f32.mrb[105].mxu0 }
 0x3c1   : > { %v5825_v16 = vadd.f32 %v5824_v17, %v5823_v9  ;;  %v5876_v59 = vpop.f32.mrb[105].mxu1  ;;  %v5826_v41 = vpop.f32.mrb[106].mxu0 }
 0x3c2   : > { %v5877_v15 = vadd.f32 %v5876_v59, %v5875_v13  ;;  %v5878_v32 = vpop.f32.mrb[106].mxu1  ;;  %v5827_v42 = vpop.f32.mrb[107].mxu0 }
 0x3c3   : > { %v2426_v20 = vadd.f32 %v5825_v16, %v7587_v11  ;;  %v5879_v34 = vpop.f32.mrb[107].mxu1 }
 0x3c5   : > { %v2506_v21 = vadd.f32 %v5877_v15, %v2426_v20 }
 0x3c7   : > { %v6317_v25 = vpop.f32.mrb[108].mxu0 }
 0x3c8   : > { %v2554_v53 = vadd.f32 %v6317_v25, %v7597_v22  ;;  %v2545_v57 = vpop.f32.mrb[109].mxu0 }
 0x3c9   : > { %v2546_v61 = vadd.f32 %v2545_v57, %v7591_v44  ;;  %v6318_v12 = vpop.f32.mrb[110].mxu0 }
 0x3ca   : > { %vm2593_vm12 = vcmp.gt.f32.partialorder %v2554_v53, 0.0  ;;  %v2604_v7 = vmul.f32 0.2, %v2554_v53  ;;  %v2557_v48 = vadd.f32 %v6318_v12, %v7599_v37  ;;  %v2548_v40 = vpop.f32.mrb[111].mxu0 }
 0x3cb   : > { %vm2591_vm13 = vcmp.gt.f32.partialorder %v2546_v61, 0.0  ;;  %v2602_v2 = vmul.f32 0.2, %v2546_v61  ;;  %v2549_v27 = vadd.f32 %v2548_v40, %v7593_v55 }
 0x3cc   : > { %v2615_v36 = vsel %vm2593_vm12, %v2554_v53, %v2604_v7  ;;  %vm2594_vm14 = vcmp.gt.f32.partialorder %v2557_v48, 0.0  ;;  %v2605_v11 = vmul.f32 0.2, %v2557_v48 }
 0x3cd   : > { %v2613_v31 = vsel %vm2591_vm13, %v2546_v61, %v2602_v2  ;;  %vm2592_vm15 = vcmp.gt.f32.partialorder %v2549_v27, 0.0  ;;  %v2603_v38 = vmul.f32 0.2, %v2549_v27  ;;  %v2638_v47 = vrot.slane %v2615_v36, 4 }
 0x3ce   : > { %v2635_v22 = vrot.slane %v2613_v31, 4  ;;  %v2616_v45 = vsel %vm2594_vm14, %v2557_v48, %v2605_v11 }
 0x3cf   : > { %v2640_v44 = vrot.slane %v2616_v45, 4  ;;  %v2614_v52 = vsel %vm2592_vm15, %v2549_v27, %v2603_v38  ;;  %v6321_v26 = vpop.f32.mrb[112].mxu0 }
 0x3d0   : > { %v2636_v54 = vrot.slane %v2614_v52, 4  ;;  %v2570_v35 = vadd.f32 %v6321_v26, %v2490_v39  ;;  %v2561_v37 = vpop.f32.mrb[113].mxu0  ;;  %v2668_v29 = vadd.f32 %v2635_v22, %v7456_v19 }
 0x3d1   : > { %v2641_v18 = vsel %vm1179_vm7, %v2638_v47, %v2640_v44  ;;  %v2562_v50 = vadd.f32 %v2561_v37, %v7603_v0  ;;  %v6322_v55 = vpop.f32.mrb[114].mxu0 }
 0x3d2   : > { %v2671_v56 = vadd.f32 %v2641_v18, %v7473_v51  ;;  %v2637_v6 = vsel %vm1179_vm7, %v2635_v22, %v2636_v54  ;;  %v2639_v60 = vsel %vm1179_vm7, %v2636_v54, %v2638_v47  ;;  %v2564_v49 = vpop.f32.mrb[115].mxu0  ;;  %vm2597_vm0 = vcmp.gt.f32.partialorder %v2570_v35, 0.0 }
 0x3d3   : > { %v2669_v5 = vadd.f32 %v2637_v6, %v7460_v43  ;;  %v2670_v9 = vadd.f32 %v2639_v60, %v7462_v4  ;;  %v2608_v39 = vmul.f32 0.2, %v2570_v35  ;;  %vm2595_vm5 = vcmp.gt.f32.partialorder %v2562_v50, 0.0 }
 0x3d4   : > { %v7630_v13 = vmul.f32 0.5, %v2671_v56  ;;  %v2606_v0 = vmul.f32 0.2, %v2562_v50  ;;  %v2573_v17 = vadd.f32 %v6322_v55, %v7609_v58  ;;  %v2565_v59 = vadd.f32 %v2564_v49, %v7605_v1 }
 0x3d5   : > { %v2681_v19 = vmul.f32 0.5, %v2669_v5  ;;  %v7633_v16 = vmul.f32 0.5, %v2670_v9  ;;  %v2619_v51 = vsel %vm2597_vm0, %v2570_v35, %v2608_v39  ;;  %v2680_v41 = vmul.f32 0.5, %v2668_v29 }
 0x3d6   : > { %v2617_v15 = vsel %vm2595_vm5, %v2562_v50, %v2606_v0  ;;  %vm2598_vm6 = vcmp.gt.f32.partialorder %v2573_v17, 0.0  ;;  %v2609_v43 = vmul.f32 0.2, %v2573_v17  ;;  %v2646_v32 = vrot.slane %v2619_v51, 4 }
 0x3d7   : > { %v2642_v4 = vrot.slane %v2617_v15, 4  ;;  %vm2596_vm8 = vcmp.gt.f32.partialorder %v2565_v59, 0.0  ;;  %v2607_v42 = vmul.f32 0.2, %v2565_v59  ;;  %v6325_v20 = vpop.f32.mrb[116].mxu0  ;;  %v7638_v34 = vpack.c.bf16 %v7630_v13, %v7633_v16 }
 0x3d8   : > { %v2620_v58 = vsel %vm2598_vm6, %v2573_v17, %v2609_v43  ;;  %v2586_v25 = vadd.f32 %v6325_v20, %v2506_v21  ;;  %v2577_v53 = vpop.f32.mrb[117].mxu0  ;;  %v7640_v57 = vpack.c.bf16 %v2681_v19, %v2680_v41 }
 0x3d9   : > { %v2643_v1 = vsel %vm1179_vm7, %v2640_v44, %v2642_v4  ;;  %v2648_v61 = vrot.slane %v2620_v58, 4  ;;  %v2618_v12 = vsel %vm2596_vm8, %v2565_v59, %v2607_v42  ;;  %v2578_v7 = vadd.f32 %v2577_v53, %v7613_v3  ;;  %v6326_v48 = vpop.f32.mrb[118].mxu0 }
 0x3da   : > { %v2672_v40 = vadd.f32 %v2643_v1, %v7476_v23  ;;  %v2644_v2 = vrot.slane %v2618_v12, 4  ;;  %vm2601_vm10 = vcmp.gt.f32.partialorder %v2586_v25, 0.0  ;;  %v2612_v27 = vmul.f32 0.2, %v2586_v25  ;;  %v2580_v36 = vpop.f32.mrb[119].mxu0 }
 0x3db   : > { %v2649_v11 = vsel %vm1179_vm7, %v2646_v32, %v2648_v61  ;;  %vm2599_vm11 = vcmp.gt.f32.partialorder %v2578_v7, 0.0  ;;  %v2610_v21 = vmul.f32 0.2, %v2578_v7  ;;  %v2581_v31 = vadd.f32 %v2580_v36, %v7615_v14 }
 0x3dc   : > { %v7647_v38 = vmul.f32 0.5, %v2672_v40  ;;  %v2675_v22 = vadd.f32 %v2649_v11, %v7519_v30  ;;  %v2645_v45 = vsel %vm1179_vm7, %v2642_v4, %v2644_v2  ;;  %v2647_v3 = vsel %vm1179_vm7, %v2644_v2, %v2646_v32 }
 0x3dd   : > { %v2673_v23 = vadd.f32 %v2645_v45, %v7489_v24  ;;  %v2674_v47 = vadd.f32 %v2647_v3, %v7502_v10  ;;  %v2623_v44 = vsel %vm2601_vm10, %v2586_v25, %v2612_v27  ;;  %v2621_v52 = vsel %vm2599_vm11, %v2578_v7, %v2610_v21  ;;  %v6650_v45 = vld [vmem:[#allocation5 + $0x390] sm:$0xff]  }
 0x3de   : > { %v7654_v26 = vmul.f32 0.5, %v2675_v22  ;;  %v2654_v54 = vrot.slane %v2623_v44, 4  ;;  %v2650_v35 = vrot.slane %v2621_v52, 4  ;;  %vm2600_vm12 = vcmp.gt.f32.partialorder %v2581_v31, 0.0 }
 0x3df   : > { %v7656_v14 = vmul.f32 0.5, %v2673_v23  ;;  %v7658_v37 = vmul.f32 0.5, %v2674_v47  ;;  %v2611_v30 = vmul.f32 0.2, %v2581_v31  ;;  %v2703_v18 = vrot.slane %v7640_v57, 3 }
 0x3e0   : > { %v2651_v50 = vsel %vm1179_vm7, %v2648_v61, %v2650_v35  ;;  %v2704_v24 = vrot.slane %v7638_v34, 3  ;;  %v2679_v56 = vadd.f32 %v2654_v54, %v7562_v8  ;;  %v2720_v49 = vrot.slane %v7638_v34, 1  ;;  %v6649_v61 = vld [vmem:[#allocation5 + $0x388] sm:$0xff]  }
 0x3e1   : > { %v7665_v10 = vpack.c.bf16 %v7656_v14, %v7647_v38  ;;  %v7669_v55 = vpack.c.bf16 %v7654_v26, %v7658_v37  ;;  %v2622_v29 = vsel %vm2600_vm12, %v2581_v31, %v2611_v30  ;;  %v2676_v6 = vadd.f32 %v2651_v50, %v7530_v46 }
 0x3e2   : > { %v2652_v60 = vrot.slane %v2622_v29, 4  ;;  %v2705_v5 = vsel %vm1158_vm9, %v2703_v18, %v2704_v24  ;;  %v2827_v0 = vrot.slane %v7640_v57, 2  ;;  %v2828_v8 = vrot.slane %v7638_v34, 2 }
 0x3e3   : > { %v2706_v9 = vrot.slane %v7665_v10, 3  ;;  %v2721_v39 = vrot.slane %v7665_v10, 1  ;;  %v2723_v51 = vrot.slane %v7669_v55, 1  ;;  %v2830_v43 = vrot.slane %v2705_v5, 2 }
 0x3e4   : > { %v2653_v17 = vsel %vm1179_vm7, %v2650_v35, %v2652_v60  ;;  %v2655_v19 = vsel %vm1179_vm7, %v2652_v60, %v2654_v54  ;;  %v7687_v20 = vmul.f32 0.5, %v2676_v6  ;;  %v2712_v53 = vrot.slane %v7638_v34, 6 }
 0x3e5   : > { %v2677_v46 = vadd.f32 %v2653_v17, %v7549_v62  ;;  %v2678_v59 = vadd.f32 %v2655_v19, %v7551_v28  ;;  %v2707_v41 = vsel %vm1158_vm9, %v2704_v24, %v2706_v9  ;;  %v2722_v15 = vsel %vm381_vm2, %v2720_v49, %v2721_v39 }
 0x3e6   : > { %v2831_v32 = vrot.slane %v2707_v41, 2  ;;  %v2724_v4 = vsel %vm381_vm2, %v2721_v39, %v2723_v51  ;;  %v2836_v42 = vrot.slane %v2722_v15, 2  ;;  %v2713_v28 = vrot.slane %v7665_v10, 6  ;;  %v6652_v39 = vld [vmem:[#allocation5 + $0x3a0] sm:$0xff]   ;;  %v6653_v41 = vld [vmem:[#allocation5 + $0x3a8] sm:$0xff]  }
 0x3e7   : > { %v7689_v58 = vmul.f32 0.5, %v2677_v46  ;;  %v2837_v25 = vrot.slane %v2724_v4, 2  ;;  %v2690_v57 = vmul.f32 0.5, %v2678_v59  ;;  %v2708_v1 = vrot.slane %v7669_v55, 3 }
 0x3e8   : > { %v2832_v62 = vsel %vm445_vm3, %v2830_v43, %v2831_v32  ;;  %v2829_v48 = vsel %vm445_vm3, %v2827_v0, %v2828_v8  ;;  %v2691_v40 = vmul.f32 0.5, %v2679_v56  ;;  %v2714_v2 = vsel %vm1949_vm1, %v2712_v53, %v2713_v28  ;;  %v6651_v56 = vld [vmem:[#allocation5 + $0x398] sm:$0xff]  }
 0x3e9   : > { %v7697_v12 = vpack.c.bf16 %v7689_v58, %v7687_v20  ;;  %3164 = vmatprep.mubr.bf16.mxu1 %v2832_v62  ;;  %v2838_v7 = vsel %vm445_vm3, %v2836_v42, %v2837_v25  ;;  %v2709_v27 = vsel %vm1158_vm9, %v2706_v9, %v2708_v1  ;;  %v2715_v36 = vrot.slane %v7669_v55, 6 }
 0x3ea   : > { %3229 = vmatprep.mubr.bf16.mxu0 %v2838_v7  ;;  %3165 = vmatmul.mubr.bf16.vlgmr.msra.gmra.mrb[108].mxu1 %v2829_v48  ;;  %v2833_v11 = vrot.slane %v2712_v53, 2  ;;  %v2834_v21 = vrot.slane %v2714_v2, 2  ;;  %v2844_v31 = vrot.slane %v2709_v27, 2  ;;  %v7707_v23 = vpack.c.bf16 %v2691_v40, %v2690_v57  ;;  %v6655_v7 = vld [vmem:[#allocation5 + $0x3b8] sm:$0xff]  }
 0x3eb   : > { %6328 = vmatpush3.bf16.msra.mxu1 %v7581_v63  ;;  %v2725_v22 = vrot.slane %v7697_v12, 1  ;;  %v2710_v3 = vrot.slane %v7697_v12, 3  ;;  %v2842_v54 = vrot.slane %v7665_v10, 2  ;;  %v2716_v63 = vsel %vm1949_vm1, %v2713_v28, %v2715_v36 }
 0x3ec   : > { %6329 = vmatprep.subr.bf16.mxu1 %v6649_v61  ;;  %v2835_v47 = vsel %vm445_vm3, %v2833_v11, %v2834_v21  ;;  %v2845_v44 = vsel %vm445_vm3, %v2831_v32, %v2844_v31  ;;  %v2727_v18 = vrot.slane %v7707_v23, 1  ;;  %v2846_v60 = vrot.slane %v2716_v63, 2  ;;  %v6662_v63 = vld [vmem:[#allocation5 + $0x3c8] sm:$0xff]  }
 0x3ed   : > { %v2726_v52 = vsel %vm381_vm2, %v2723_v51, %v2725_v22  ;;  %3230 = vmatmul.mubr.bf16.vlgmr.msra.gmra.mrb[120].mxu0 %v2835_v47  ;;  %3172 = vmatprep.mubr.bf16.mxu1 %v2845_v44  ;;  %v2711_v30 = vsel %vm1158_vm9, %v2708_v1, %v2710_v3  ;;  %v2843_v6 = vsel %vm445_vm3, %v2828_v8, %v2842_v54  ;;  %v2717_v9 = vrot.slane %v7697_v12, 6  ;;  %v6657_v47 = vld [vmem:[#allocation5 + $0x480] sm:$0xff]  }
 0x3ee   : > { %v2848_v35 = vrot.slane %v2726_v52, 2  ;;  %v2854_v50 = vrot.slane %v2711_v30, 2  ;;  %v2728_v29 = vsel %vm381_vm2, %v2725_v22, %v2727_v18  ;;  %v2847_v0 = vsel %vm445_vm3, %v2834_v21, %v2846_v60  ;;  %v6658_v44 = vld [vmem:[#allocation5 + $0x3c0] sm:$0xff]   ;;  %v6663_v30 = vld [vmem:[#allocation5 + $0x448] sm:$0xff]  }
 0x3ef   : > { %6330 = vmatpush3.bf16.msra.mxu1 %v6649_v61  ;;  %v2858_v5 = vrot.slane %v2728_v29, 2  ;;  %v2852_v17 = vrot.slane %v7669_v55, 2  ;;  %v2718_v51 = vsel %vm1949_vm1, %v2715_v36, %v2717_v9  ;;  %v2864_v8 = vrot.slane %v2710_v3, 2  ;;  %v6659_v52 = vld [vmem:[#allocation5 + $0x440] sm:$0xff]   ;;  %v6667_v29 = vld [vmem:[#allocation5 + $0x450] sm:$0xff]  }
 0x3f0   : > { %v2849_v24 = vsel %vm445_vm3, %v2837_v25, %v2848_v35  ;;  %6331 = vmatprep.subr.bf16.mxu1 %v6650_v45  ;;  %v2855_v49 = vsel %vm445_vm3, %v2844_v31, %v2854_v50  ;;  %v2730_v46 = vrot.slane %v7665_v10, 4  ;;  %v2732_v59 = vrot.slane %v7669_v55, 4  ;;  %v6654_v10 = vld [vmem:[#allocation5 + $0x3b0] sm:$0xff]  }
 0x3f1   : > { %3237 = vmatprep.mubr.bf16.mxu0 %v2849_v24  ;;  %v2859_v19 = vsel %vm445_vm3, %v2848_v35, %v2858_v5  ;;  %v2853_v15 = vsel %vm445_vm3, %v2842_v54, %v2852_v17  ;;  %v2856_v43 = vrot.slane %v2718_v51, 2  ;;  %v2729_v32 = vrot.slane %v7638_v34, 4  ;;  %v6660_v54 = vld [vmem:[#allocation5 + $0x408] sm:$0xff]   ;;  %v6666_v24 = vld [vmem:[#allocation5 + $0x3d0] sm:$0xff]  }
 0x3f2   : > { %3173 = vmatmul.mubr.bf16.gmra.mrb[112].mxu1 %v2843_v6  ;;  %v2865_v4 = vsel %vm445_vm3, %v2854_v50, %v2864_v8  ;;  %v2868_v42 = vrot.slane %v2727_v18, 2  ;;  %v2733_v53 = vsel %vm1179_vm7, %v2730_v46, %v2732_v59  ;;  %v2862_v57 = vrot.slane %v7697_v12, 2  ;;  %v6661_v35 = vld [vmem:[#allocation5 + $0x488] sm:$0xff]   ;;  %v6664_v18 = vld [vmem:[#allocation5 + $0x410] sm:$0xff]   ;;  %v6669_v6 = vld [vmem:[#allocation5 + $0x498] sm:$0xff]  }
 0x3f3   : > { %3180 = vmatprep.mubr.bf16.mxu1 %v2855_v49  ;;  %6332 = vmatpush3.bf16.msra.mxu1 %v6650_v45  ;;  %v2731_v25 = vsel %vm1179_vm7, %v2729_v32, %v2730_v46  ;;  %v2857_v55 = vsel %vm445_vm3, %v2846_v60, %v2856_v43  ;;  %v2840_v28 = vrot.slane %v2733_v53, 2  ;;  %v2734_v1 = vrot.slane %v7697_v12, 4  ;;  %v6665_v50 = vld [vmem:[#allocation5 + $0x490] sm:$0xff]   ;;  %v6670_v60 = vld [vmem:[#allocation5 + $0x3d8] sm:$0xff]   ;;  %v6678_v51 = vld [vmem:[#allocation5 + $0x3e8] sm:$0xff]  }
 0x3f4   : > { %6333 = vmatprep.subr.bf16.mxu1 %v6651_v56  ;;  %v2869_v62 = vsel %vm445_vm3, %v2858_v5, %v2868_v42  ;;  %v2839_v34 = vrot.slane %v2731_v25, 2  ;;  %v2736_v61 = vrot.slane %v7707_v23, 4  ;;  %v2863_v48 = vsel %vm445_vm3, %v2852_v17, %v2862_v57  ;;  %v6656_v23 = vld [vmem:[#allocation5 + $0x400] sm:$0xff]   ;;  %v6671_v49 = vld [vmem:[#allocation5 + $0x458] sm:$0xff]   ;;  %v6676_v17 = vld [vmem:[#allocation5 + $0x428] sm:$0xff]  }
 0x3f5   : > { %3238 = vmatmul.mubr.bf16.gmra.mrb[124].mxu0 %v2847_v0  ;;  %v2866_v40 = vrot.slane %v2717_v9, 2  ;;  %v2735_v27 = vsel %vm1179_vm7, %v2732_v59, %v2734_v1  ;;  %5987 = vmatprep.subr.bf16.mxu0 %v6656_v23  ;;  %v6672_v5 = vld [vmem:[#allocation5 + $0x420] sm:$0xff]   ;;  %v6679_v8 = vld [vmem:[#allocation5 + $0x468] sm:$0xff]   ;;  %v6680_v46 = vld [vmem:[#allocation5 + $0x430] sm:$0xff]  }
 0x3f6   : > { %3245 = vmatprep.mubr.bf16.mxu0 %v2859_v19  ;;  %v2841_v2 = vsel %vm445_vm3, %v2839_v34, %v2840_v28  ;;  %v2737_v36 = vsel %vm1179_vm7, %v2734_v1, %v2736_v61  ;;  %v2850_v11 = vrot.slane %v2735_v27, 2  ;;  %v2870_v45 = vrot.slane %v2736_v61, 2  ;;  %5988 = vmatpush3.bf16.msra.mxu0 %v6658_v44  ;;  %v6673_v9 = vld [vmem:[#allocation5 + $0x4a0] sm:$0xff]   ;;  %v6677_v19 = vld [vmem:[#allocation5 + $0x4a8] sm:$0xff]   ;;  %v6681_v59 = vld [vmem:[#allocation5 + $0x4b0] sm:$0xff]  }
 0x3f7   : > { %6334 = vmatpush3.bf16.msra.mxu1 %v6651_v56  ;;  %v2867_v12 = vsel %vm445_vm3, %v2856_v43, %v2866_v40  ;;  %v2860_v21 = vrot.slane %v2737_v36, 2  ;;  %5989 = vmatprep.subr.bf16.mxu0 %v6660_v54  ;;  %v6668_v56 = vld [vmem:[#allocation5 + $0x418] sm:$0xff]   ;;  %v6675_v0 = vld [vmem:[#allocation5 + $0x460] sm:$0xff]  }
 0x3f8   : > { %6335 = vmatprep.subr.bf16.mxu1 %v6652_v39  ;;  %v2851_v31 = vsel %vm445_vm3, %v2840_v28, %v2850_v11  ;;  %v6684_v43 = vld [vmem:[#allocation5 + $0x438] sm:$0xff]   ;;  %v7745_v25 = vld [vmem:[#allocation5 + $0x4c0] sm:$0xff]  }
 0x3f9   : > { %v2861_v22 = vsel %vm445_vm3, %v2850_v11, %v2860_v21  ;;  %v2871_v3 = vsel %vm445_vm3, %v2860_v21, %v2870_v45  ;;  %v6685_v32 = vld [vmem:[#allocation5 + $0x4b8] sm:$0xff]  }
 0x3fa   : > { %3181 = vmatmul.mubr.bf16.gmra.mrb[116].mxu1 %v2853_v15  ;;  %5990 = vmatpush3.bf16.msra.mxu0 %v6662_v63  ;;  %v6683_v15 = vld [vmem:[#allocation5 + $0x470] sm:$0xff]   ;;  %v6687_v42 = vld [vmem:[#allocation5 + $0x478] sm:$0xff]  }
 0x3fb   : > { %3188 = vmatprep.mubr.bf16.mxu1 %v2865_v4  ;;  %6336 = vmatpush3.bf16.msra.mxu1 %v6652_v39  ;;  %v6674_v39 = vld [vmem:[#allocation5 + $0x3e0] sm:$0xff]   ;;  %v6686_v4 = vld [vmem:[#allocation5 + $0x3f8] sm:$0xff]  }
 0x3fc   : > { %6337 = vmatprep.subr.bf16.mxu1 %v6653_v41  ;;  %5991 = vmatprep.subr.bf16.mxu0 %v6664_v18 }
 0x3fd   : > { %3246 = vmatmul.mubr.bf16.gmra.mrb[128].mxu0 %v2857_v55 }
 0x3fe   : > { %3253 = vmatprep.mubr.bf16.mxu0 %v2869_v62  ;;  %5992 = vmatpush3.bf16.msra.mxu0 %v6666_v24 }
 0x3ff   : > { %6338 = vmatpush3.bf16.msra.mxu1 %v6653_v41  ;;  %5993 = vmatprep.subr.bf16.mxu0 %v6668_v56  ;;  %v6682_v41 = vld [vmem:[#allocation5 + $0x3f0] sm:$0xff]  }
 0x400   : > { %6339 = vmatprep.subr.bf16.mxu1 %v6654_v10 }
 0x402   : > { %3189 = vmatmul.mubr.bf16.gmra.mrb[120].mxu1 %v2863_v48  ;;  %5994 = vmatpush3.bf16.msra.mxu0 %v6670_v60 }
 0x403   : > { %6340 = vmatpush3.bf16.msra.mxu1 %v6654_v10  ;;  %6343 = vmatprep.mubr.bf16.mxu1 %v2841_v2  ;;  %v5344_v10 = vld [vmem:[%s7976_s4 + $0x2] ss:$0 sm:$0xff] }
 0x404   : > { %6341 = vmatprep.subr.bf16.mxu1 %v6655_v7  ;;  %5995 = vmatprep.subr.bf16.mxu0 %v6672_v5 }
 0x405   : > { %3254 = vmatmul.mubr.bf16.gmra.mrb[132].mxu0 %v2867_v12 }
 0x406   : > { %5996 = vmatpush3.bf16.msra.mxu0 %v6674_v39 }
 0x407   : > { %6342 = vmatpush3.bf16.msra.mxu1 %v6655_v7  ;;  %5997 = vmatprep.subr.bf16.mxu0 %v6676_v17 }
 0x408   : > { %6027 = vmatprep.subr.bf16.mxu1 %v6657_v47 }
 0x40a   : > { %6344 = vmatmul.mubr.bf16.vlgmr.msra.gmra.mrb[124].mxu1 %v2851_v31  ;;  %5998 = vmatpush3.bf16.msra.mxu0 %v6678_v51 }
 0x40b   : > { %6347 = vmatprep.mubr.bf16.mxu1 %v2861_v22  ;;  %6028 = vmatpush3.bf16.msra.mxu1 %v6659_v52 }
 0x40c   : > { %6029 = vmatprep.subr.bf16.mxu1 %v6661_v35  ;;  %5999 = vmatprep.subr.bf16.mxu0 %v6680_v46 }
 0x40e   : > { %6000 = vmatpush3.bf16.msra.mxu0 %v6682_v41 }
 0x40f   : > { %6030 = vmatpush3.bf16.msra.mxu1 %v6663_v30  ;;  %6001 = vmatprep.subr.bf16.mxu0 %v6684_v43 }
 0x410   : > { %6031 = vmatprep.subr.bf16.mxu1 %v6665_v50 }
 0x412   : > { %6348 = vmatmul.mubr.bf16.gmra.mrb[128].mxu1 %v2871_v3  ;;  %6002 = vmatpush3.bf16.msra.mxu0 %v6686_v4 }
 0x413   : > { %6032 = vmatpush3.bf16.msra.mxu1 %v6667_v29  ;;  %6351 = vmatprep.subr.bf16.mxu0 %v7745_v25 }
 0x414   : > { %6033 = vmatprep.subr.bf16.mxu1 %v6669_v6 }
 0x417   : > { %6034 = vmatpush3.bf16.msra.mxu1 %v6671_v49 }
 0x418   : > { %6035 = vmatprep.subr.bf16.mxu1 %v6673_v9 }
 0x41b   : > { %6036 = vmatpush3.bf16.msra.mxu1 %v6675_v0 }
 0x41c   : > { %6037 = vmatprep.subr.bf16.mxu1 %v6677_v19 }
 0x41f   : > { %6038 = vmatpush3.bf16.msra.mxu1 %v6679_v8 }
 0x420   : > { %6039 = vmatprep.subr.bf16.mxu1 %v6681_v59 }
 0x423   : > { %6040 = vmatpush3.bf16.msra.mxu1 %v6683_v15 }
 0x424   : > { %6041 = vmatprep.subr.bf16.mxu1 %v6685_v32 }
 0x427   : > { %6042 = vmatpush3.bf16.msra.mxu1 %v6687_v42 }
 0x4bd   : > { %v5911_v53 = vpop.f32.mrb[108].mxu1 }
 0x4be   : > { %v5912_v55 = vpop.f32.mrb[109].mxu1 }
 0x4bf   : > { %v5913_v57 = vadd.f32 %v5912_v55, %v5911_v53  ;;  %v5914_v62 = vpop.f32.mrb[110].mxu1 }
 0x4c0   : > { %v5915_v34 = vpop.f32.mrb[111].mxu1  ;;  %v5951_v28 = vpop.f32.mrb[120].mxu0 }
 0x4c1   : > { %v3167_v1 = vadd.f32 %v5913_v57, %v5344_v10  ;;  %v5916_v61 = vadd.f32 %v5915_v34, %v5914_v62  ;;  %v5952_v7 = vpop.f32.mrb[121].mxu0 }
 0x4c2   : > { %v5953_v48 = vadd.f32 %v5952_v7, %v5951_v28  ;;  %v5954_v40 = vpop.f32.mrb[122].mxu0 }
 0x4c3   : > { %v3170_v2 = vadd.f32 %v5916_v61, %v5344_v10  ;;  %v5955_v27 = vpop.f32.mrb[123].mxu0 }
 0x4c4   : > { %v5956_v36 = vadd.f32 %v5955_v27, %v5954_v40  ;;  %v3232_v11 = vadd.f32 %v5953_v48, %v3167_v1 }
 0x4c5   : > { %v5917_v12 = vpop.f32.mrb[112].mxu1 }
 0x4c6   : > { %v5918_v21 = vpop.f32.mrb[113].mxu1  ;;  %v3235_v45 = vadd.f32 %v5956_v36, %v3170_v2 }
 0x4c7   : > { %v5919_v31 = vadd.f32 %v5918_v21, %v5917_v12  ;;  %v5920_v22 = vpop.f32.mrb[114].mxu1 }
 0x4c8   : > { %v5921_v3 = vpop.f32.mrb[115].mxu1  ;;  %v5957_v23 = vpop.f32.mrb[124].mxu0 }
 0x4c9   : > { %v3175_v47 = vadd.f32 %v5919_v31, %v5344_v10  ;;  %v5922_v44 = vadd.f32 %v5921_v3, %v5920_v22  ;;  %v5958_v52 = vpop.f32.mrb[125].mxu0 }
 0x4ca   : > { %v5959_v54 = vadd.f32 %v5958_v52, %v5957_v23  ;;  %v5960_v35 = vpop.f32.mrb[126].mxu0 }
 0x4cb   : > { %v3178_v63 = vadd.f32 %v5922_v44, %v5344_v10  ;;  %v5961_v30 = vpop.f32.mrb[127].mxu0 }
 0x4cc   : > { %v5962_v18 = vadd.f32 %v5961_v30, %v5960_v35  ;;  %v3240_v24 = vadd.f32 %v5959_v54, %v3175_v47 }
 0x4cd   : > { %v5923_v50 = vpop.f32.mrb[116].mxu1 }
 0x4ce   : > { %v5924_v29 = vpop.f32.mrb[117].mxu1  ;;  %v3243_v60 = vadd.f32 %v5962_v18, %v3178_v63 }
 0x4cf   : > { %v5925_v56 = vadd.f32 %v5924_v29, %v5923_v50  ;;  %v5926_v6 = vpop.f32.mrb[118].mxu1 }
 0x4d0   : > { %v5927_v49 = vpop.f32.mrb[119].mxu1  ;;  %v5963_v5 = vpop.f32.mrb[128].mxu0 }
 0x4d1   : > { %v3183_v9 = vadd.f32 %v5925_v56, %v5344_v10  ;;  %v5928_v39 = vadd.f32 %v5927_v49, %v5926_v6  ;;  %v5964_v0 = vpop.f32.mrb[129].mxu0 }
 0x4d2   : > { %v5965_v17 = vadd.f32 %v5964_v0, %v5963_v5  ;;  %v5966_v19 = vpop.f32.mrb[130].mxu0 }
 0x4d3   : > { %v3186_v51 = vadd.f32 %v5928_v39, %v5344_v10  ;;  %v5967_v8 = vpop.f32.mrb[131].mxu0 }
 0x4d4   : > { %v5968_v46 = vadd.f32 %v5967_v8, %v5966_v19  ;;  %v3248_v41 = vadd.f32 %v5965_v17, %v3183_v9 }
 0x4d5   : > { %v5929_v59 = vpop.f32.mrb[120].mxu1 }
 0x4d6   : > { %v5930_v15 = vpop.f32.mrb[121].mxu1  ;;  %v3251_v4 = vadd.f32 %v5968_v46, %v3186_v51 }
 0x4d7   : > { %v5931_v43 = vadd.f32 %v5930_v15, %v5929_v59  ;;  %v5932_v32 = vpop.f32.mrb[122].mxu1 }
 0x4d8   : > { %v5933_v42 = vpop.f32.mrb[123].mxu1  ;;  %v5969_v53 = vpop.f32.mrb[132].mxu0 }
 0x4d9   : > { %v3191_v55 = vadd.f32 %v5931_v43, %v5344_v10  ;;  %v5934_v57 = vadd.f32 %v5933_v42, %v5932_v32  ;;  %v5970_v62 = vpop.f32.mrb[133].mxu0 }
 0x4da   : > { %v5971_v34 = vadd.f32 %v5970_v62, %v5969_v53  ;;  %v5972_v28 = vpop.f32.mrb[134].mxu0  ;;  %v6689_v62 = vld [vmem:[#allocation5 + $0x4c8] sm:$0xff]  }
 0x4db   : > { %v3194_v1 = vadd.f32 %v5934_v57, %v5344_v10  ;;  %v5973_v61 = vpop.f32.mrb[135].mxu0 }
 0x4dc   : > { %v5974_v7 = vadd.f32 %v5973_v61, %v5972_v28  ;;  %v3256_v40 = vadd.f32 %v5971_v34, %v3191_v55 }
 0x4dd   : > { %v6345_v48 = vpop.f32.mrb[124].mxu1 }
 0x4de   : > { %v3305_v2 = vadd.f32 %v6345_v48, %v3240_v24  ;;  %v3296_v27 = vpop.f32.mrb[125].mxu1  ;;  %v3259_v21 = vadd.f32 %v5974_v7, %v3194_v1 }
 0x4df   : > { %v3297_v36 = vadd.f32 %v3296_v27, %v3232_v11  ;;  %v6346_v12 = vpop.f32.mrb[126].mxu1 }
 0x4e0   : > { %vm3329_vm13 = vcmp.gt.f32.partialorder %v3305_v2, 0.0  ;;  %v3337_v31 = vmul.f32 0.2, %v3305_v2  ;;  %v3308_v22 = vadd.f32 %v6346_v12, %v3243_v60  ;;  %v3299_v3 = vpop.f32.mrb[127].mxu1 }
 0x4e1   : > { %vm3327_vm14 = vcmp.gt.f32.partialorder %v3297_v36, 0.0  ;;  %v3335_v23 = vmul.f32 0.2, %v3297_v36  ;;  %v3300_v47 = vadd.f32 %v3299_v3, %v3235_v45 }
 0x4e2   : > { %v3345_v44 = vsel %vm3329_vm13, %v3305_v2, %v3337_v31  ;;  %vm3330_vm15 = vcmp.gt.f32.partialorder %v3308_v22, 0.0  ;;  %v3338_v52 = vmul.f32 0.2, %v3308_v22  ;;  %v6690_v2 = vld [vmem:[#allocation5 + $0x4d0] sm:$0xff]  }
 0x4e3   : > { %v3353_v10 = vadd.f32 %v3345_v44, %v7647_v38  ;;  %v3343_v54 = vsel %vm3327_vm14, %v3297_v36, %v3335_v23  ;;  %vm3328_vm0 = vcmp.gt.f32.partialorder %v3300_v47, 0.0  ;;  %v3336_v35 = vmul.f32 0.2, %v3300_v47  ;;  %v6691_v23 = vld [vmem:[#allocation5 + $0x4d8] sm:$0xff]  }
 0x4e4   : > { %v3351_v63 = vadd.f32 %v3343_v54, %v7633_v16  ;;  %v3346_v11 = vsel %vm3330_vm15, %v3308_v22, %v3338_v52  ;;  %v6692_v52 = vld [vmem:[#allocation5 + $0x4e0] sm:$0xff]   ;;  %v6693_v54 = vld [vmem:[#allocation5 + $0x4e8] sm:$0xff]  }
 0x4e5   : > { %v3354_v30 = vadd.f32 %v3346_v11, %v7656_v14  ;;  %v3344_v18 = vsel %vm3328_vm0, %v3300_v47, %v3336_v35  ;;  %v6349_v50 = vpop.f32.mrb[128].mxu1  ;;  %v7755_v45 = vmul.f32 0.5, %v3353_v10 }
 0x4e6   : > { %v3352_v24 = vadd.f32 %v3344_v18, %v7630_v13  ;;  %v3321_v29 = vadd.f32 %v6349_v50, %v3256_v40  ;;  %v3312_v56 = vpop.f32.mrb[129].mxu1  ;;  %v7757_v6 = vmul.f32 0.5, %v3351_v63  ;;  %v6694_v63 = vld [vmem:[#allocation5 + $0x4f0] sm:$0xff]   ;;  %v6695_v18 = vld [vmem:[#allocation5 + $0x4f8] sm:$0xff]  }
 0x4e7   : > { %v7759_v60 = vmul.f32 0.5, %v3354_v30  ;;  %v3313_v38 = vadd.f32 %v3312_v56, %v3248_v41  ;;  %v6350_v49 = vpop.f32.mrb[130].mxu1 }
 0x4e8   : > { %v7761_v5 = vmul.f32 0.5, %v3352_v24  ;;  %vm3333_vm5 = vcmp.gt.f32.partialorder %v3321_v29, 0.0  ;;  %v3341_v16 = vmul.f32 0.2, %v3321_v29  ;;  %v3324_v9 = vadd.f32 %v6350_v49, %v3259_v21  ;;  %v3315_v14 = vpop.f32.mrb[131].mxu1  ;;  %v6696_v49 = vld [vmem:[#allocation5 + $0x540] sm:$0xff]  }
 0x4e9   : > { %v7765_v39 = vpack.c.bf16 %v7759_v60, %v7755_v45  ;;  %vm3331_vm6 = vcmp.gt.f32.partialorder %v3313_v38, 0.0  ;;  %v3339_v13 = vmul.f32 0.2, %v3313_v38  ;;  %v3316_v0 = vadd.f32 %v3315_v14, %v3251_v4  ;;  %6079 = vmatprep.subr.bf16.mxu1 %v6696_v49  ;;  %v6699_v14 = vld [vmem:[#allocation5 + $0x580] sm:$0xff]  }
 0x4ea   : > { %v7769_v17 = vpack.c.bf16 %v7761_v5, %v7757_v6  ;;  %v3349_v19 = vsel %vm3333_vm5, %v3321_v29, %v3341_v16  ;;  %vm3334_vm8 = vcmp.gt.f32.partialorder %v3324_v9, 0.0  ;;  %v3342_v51 = vmul.f32 0.2, %v3324_v9  ;;  %v6697_v16 = vld [vmem:[#allocation5 + $0x500] sm:$0xff]  }
 0x4eb   : > { %v3357_v8 = vadd.f32 %v3349_v19, %v7687_v20  ;;  %v3347_v46 = vsel %vm3331_vm6, %v3313_v38, %v3339_v13  ;;  %vm3332_vm10 = vcmp.gt.f32.partialorder %v3316_v0, 0.0  ;;  %v3340_v59 = vmul.f32 0.2, %v3316_v0  ;;  %v6701_v13 = vld [vmem:[#allocation5 + $0x508] sm:$0xff]   ;;  %v6704_v19 = vld [vmem:[#allocation5 + $0x550] sm:$0xff]  }
 0x4ec   : > { %v3355_v41 = vadd.f32 %v3347_v46, %v7658_v37  ;;  %v3350_v15 = vsel %vm3334_vm8, %v3324_v9, %v3342_v51  ;;  %v3375_v43 = vrot.slane %v7769_v17, 1  ;;  %v3376_v32 = vrot.slane %v7765_v39, 1  ;;  %v6698_v9 = vld [vmem:[#allocation5 + $0x5c0] sm:$0xff]   ;;  %v6705_v51 = vld [vmem:[#allocation5 + $0x510] sm:$0xff]  }
 0x4ed   : > { %v3358_v4 = vadd.f32 %v3350_v15, %v7689_v58  ;;  %v3348_v42 = vsel %vm3332_vm10, %v3316_v0, %v3340_v59  ;;  %v3397_v53 = vrot.slane %v7769_v17, 3  ;;  %v3398_v20 = vrot.slane %v7765_v39, 3  ;;  %v6702_v0 = vld [vmem:[#allocation5 + $0x5c8] sm:$0xff]   ;;  %v6707_v46 = vld [vmem:[#allocation5 + $0x590] sm:$0xff]   ;;  %v6708_v59 = vld [vmem:[#allocation5 + $0x558] sm:$0xff]  }
 0x4ee   : > { %v3356_v55 = vadd.f32 %v3348_v42, %v7654_v26  ;;  %v3377_v57 = vsel %vm381_vm2, %v3375_v43, %v3376_v32  ;;  %v7780_v34 = vmul.f32 0.5, %v3357_v8  ;;  %v3386_v28 = vrot.slane %v7769_v17, 2  ;;  %v6706_v8 = vld [vmem:[#allocation5 + $0x5d0] sm:$0xff]   ;;  %v6710_v15 = vld [vmem:[#allocation5 + $0x5d8] sm:$0xff]   ;;  %v6713_v42 = vld [vmem:[#allocation5 + $0x520] sm:$0xff]  }
 0x4ef   : > { %v7782_v37 = vmul.f32 0.5, %v3358_v4  ;;  %3780 = vmatprep.mubr.bf16.mxu0 %v3377_v57  ;;  %v3387_v1 = vrot.slane %v7765_v39, 2  ;;  %v7786_v58 = vmul.f32 0.5, %v3355_v41  ;;  %v3399_v26 = vsel %vm1158_vm9, %v3397_v53, %v3398_v20  ;;  %v6709_v41 = vld [vmem:[#allocation5 + $0x518] sm:$0xff]   ;;  %v6714_v4 = vld [vmem:[#allocation5 + $0x5e0] sm:$0xff]   ;;  %v6718_v57 = vld [vmem:[#allocation5 + $0x5e8] sm:$0xff]  }
 0x4f0   : > { %v7788_v61 = vmul.f32 0.5, %v3356_v55  ;;  %3781 = vmatmul.mubr.bf16.vlgmr.msra.gmra.mrb[136].mxu0 %v7769_v17  ;;  %3844 = vmatprep.mubr.bf16.mxu1 %v3399_v26  ;;  %v3408_v11 = vrot.slane %v7769_v17, 4  ;;  %v3409_v30 = vrot.slane %v7765_v39, 4  ;;  %v6703_v17 = vld [vmem:[#allocation5 + $0x588] sm:$0xff]   ;;  %v6711_v43 = vld [vmem:[#allocation5 + $0x598] sm:$0xff]   ;;  %v6715_v53 = vld [vmem:[#allocation5 + $0x5a0] sm:$0xff]  }
 0x4f1   : > { %v3370_v7 = vpack.c.bf16 %v7782_v37, %v7780_v34  ;;  %v3388_v48 = vsel %vm445_vm3, %v3386_v28, %v3387_v1  ;;  %6352 = vmatpush3.bf16.msra.mxu0 %v7745_v25  ;;  %v6716_v55 = vld [vmem:[#allocation5 + $0x568] sm:$0xff]   ;;  %v6720_v28 = vld [vmem:[#allocation5 + $0x570] sm:$0xff]  }
 0x4f2   : > { %v3369_v40 = vpack.c.bf16 %v7788_v61, %v7786_v58  ;;  %3845 = vmatmul.mubr.bf16.vlgmr.msra.gmra.mrb[132].mxu1 %v3388_v48  ;;  %6353 = vmatprep.subr.bf16.mxu0 %v6689_v62  ;;  %v3410_v50 = vsel %vm1179_vm7, %v3408_v11, %v3409_v30  ;;  %v6721_v26 = vld [vmem:[#allocation5 + $0x530] sm:$0xff]   ;;  %v6724_v48 = vld [vmem:[#allocation5 + $0x578] sm:$0xff]  }
 0x4f3   : > { %v3380_v21 = vrot.slane %v3370_v7, 1  ;;  %v3402_v3 = vrot.slane %v3370_v7, 3  ;;  %v3391_v10 = vrot.slane %v3370_v7, 2  ;;  %v3413_v29 = vrot.slane %v3370_v7, 4  ;;  %6080 = vmatpush3.bf16.msra.mxu1 %v6697_v16 }
 0x4f4   : > { %v3378_v27 = vrot.slane %v3369_v40, 1  ;;  %v3400_v36 = vrot.slane %v3369_v40, 3  ;;  %v3389_v12 = vrot.slane %v3369_v40, 2  ;;  %v3411_v24 = vrot.slane %v3369_v40, 4 }
 0x4f5   : > { %6354 = vmatpush3.bf16.msra.mxu0 %v6689_v62  ;;  %v6719_v62 = vld [vmem:[#allocation5 + $0x5a8] sm:$0xff]  }
 0x4f6   : > { %v3379_v31 = vsel %vm381_vm2, %v3376_v32, %v3378_v27  ;;  %v3401_v22 = vsel %vm1158_vm9, %v3398_v20, %v3400_v36  ;;  %6355 = vmatprep.subr.bf16.mxu0 %v6690_v2  ;;  %v3390_v25 = vsel %vm445_vm3, %v3387_v1, %v3389_v12  ;;  %v3381_v47 = vsel %vm381_vm2, %v3378_v27, %v3380_v21  ;;  %v6712_v32 = vld [vmem:[#allocation5 + $0x560] sm:$0xff]   ;;  %v6717_v20 = vld [vmem:[#allocation5 + $0x528] sm:$0xff]   ;;  %v6722_v1 = vld [vmem:[#allocation5 + $0x5f0] sm:$0xff]  }
 0x4f7   : > { %3788 = vmatprep.mubr.bf16.mxu0 %v3379_v31  ;;  %3852 = vmatprep.mubr.bf16.mxu1 %v3401_v22  ;;  %v3403_v44 = vsel %vm1158_vm9, %v3400_v36, %v3402_v3  ;;  %v3392_v35 = vsel %vm445_vm3, %v3389_v12, %v3391_v10  ;;  %v3412_v56 = vsel %vm1179_vm7, %v3409_v30, %v3411_v24  ;;  %v6727_v27 = vld [vmem:[#allocation5 + $0x5b8] sm:$0xff]   ;;  %v5386_v12 = vld [vmem:[%s7976_s4 + $0x3] ss:$0 sm:$0xff] }
 0x4f8   : > { %3789 = vmatmul.mubr.bf16.gmra.mrb[140].mxu0 %v7765_v39  ;;  %v3414_v38 = vsel %vm1179_vm7, %v3411_v24, %v3413_v29  ;;  %v6700_v39 = vld [vmem:[#allocation5 + $0x548] sm:$0xff]  }
 0x4f9   : > { %3796 = vmatprep.mubr.bf16.mxu0 %v3381_v47  ;;  %6356 = vmatpush3.bf16.msra.mxu0 %v6690_v2  ;;  %v6725_v2 = vld [vmem:[#allocation5 + $0x538] sm:$0xff]  }
 0x4fa   : > { %3853 = vmatmul.mubr.bf16.gmra.mrb[136].mxu1 %v3390_v25  ;;  %6357 = vmatprep.subr.bf16.mxu0 %v6691_v23 }
 0x4fb   : > { %3860 = vmatprep.mubr.bf16.mxu1 %v3403_v44  ;;  %6081 = vmatprep.subr.bf16.mxu1 %v6700_v39 }
 0x4fc   : > { %6082 = vmatpush3.bf16.msra.mxu1 %v6701_v13 }
 0x4fd   : > { %6358 = vmatpush3.bf16.msra.mxu0 %v6691_v23  ;;  %6083 = vmatprep.subr.bf16.mxu1 %v6704_v19 }
 0x4fe   : > { %6359 = vmatprep.subr.bf16.mxu0 %v6692_v52 }
 0x500   : > { %3797 = vmatmul.mubr.bf16.gmra.mrb[144].mxu0 %v3369_v40  ;;  %6084 = vmatpush3.bf16.msra.mxu1 %v6705_v51  ;;  %v6726_v40 = vld [vmem:[#allocation5 + $0x5f8] sm:$0xff]  }
 0x501   : > { %3804 = vmatprep.mubr.bf16.mxu0 %v3380_v21  ;;  %6360 = vmatpush3.bf16.msra.mxu0 %v6692_v52 }
 0x502   : > { %3861 = vmatmul.mubr.bf16.gmra.mrb[140].mxu1 %v3392_v35  ;;  %6361 = vmatprep.subr.bf16.mxu0 %v6693_v54 }
 0x503   : > { %3868 = vmatprep.mubr.bf16.mxu1 %v3402_v3  ;;  %6085 = vmatprep.subr.bf16.mxu1 %v6708_v59 }
 0x504   : > { %6086 = vmatpush3.bf16.msra.mxu1 %v6709_v41 }
 0x505   : > { %6362 = vmatpush3.bf16.msra.mxu0 %v6693_v54  ;;  %6087 = vmatprep.subr.bf16.mxu1 %v6712_v32 }
 0x506   : > { %6363 = vmatprep.subr.bf16.mxu0 %v6694_v63 }
 0x508   : > { %3805 = vmatmul.mubr.bf16.gmra.mrb[148].mxu0 %v3370_v7  ;;  %6088 = vmatpush3.bf16.msra.mxu1 %v6713_v42  ;;  %v6723_v7 = vld [vmem:[#allocation5 + $0x5b0] sm:$0xff]  }
 0x509   : > { %6364 = vmatpush3.bf16.msra.mxu0 %v6694_v63  ;;  %6367 = vmatprep.mubr.bf16.mxu0 %v3410_v50 }
 0x50a   : > { %3869 = vmatmul.mubr.bf16.gmra.mrb[144].mxu1 %v3391_v10  ;;  %6365 = vmatprep.subr.bf16.mxu0 %v6695_v18 }
 0x50b   : > { %6089 = vmatprep.subr.bf16.mxu1 %v6716_v55 }
 0x50c   : > { %6090 = vmatpush3.bf16.msra.mxu1 %v6717_v20 }
 0x50d   : > { %6366 = vmatpush3.bf16.msra.mxu0 %v6695_v18  ;;  %6091 = vmatprep.subr.bf16.mxu1 %v6720_v28 }
 0x50e   : > { %6113 = vmatprep.subr.bf16.mxu0 %v6698_v9 }
 0x510   : > { %6368 = vmatmul.mubr.bf16.vlgmr.msra.gmra.mrb[152].mxu0 %v3412_v56  ;;  %6092 = vmatpush3.bf16.msra.mxu1 %v6721_v26 }
 0x511   : > { %6371 = vmatprep.mubr.bf16.mxu0 %v3414_v38  ;;  %6114 = vmatpush3.bf16.msra.mxu0 %v6699_v14 }
 0x512   : > { %6115 = vmatprep.subr.bf16.mxu0 %v6702_v0  ;;  %6093 = vmatprep.subr.bf16.mxu1 %v6724_v48 }
 0x514   : > { %6094 = vmatpush3.bf16.msra.mxu1 %v6725_v2 }
 0x515   : > { %6116 = vmatpush3.bf16.msra.mxu0 %v6703_v17  ;;  %6375 = vmatprep.subr.bf16.mxu1 %v6908_v33 }
 0x516   : > { %6117 = vmatprep.subr.bf16.mxu0 %v6706_v8 }
 0x518   : > { %6372 = vmatmul.mubr.bf16.gmra.mrb[156].mxu0 %v3413_v29 }
 0x519   : > { %6118 = vmatpush3.bf16.msra.mxu0 %v6707_v46 }
 0x51a   : > { %6119 = vmatprep.subr.bf16.mxu0 %v6710_v15 }
 0x51d   : > { %6120 = vmatpush3.bf16.msra.mxu0 %v6711_v43 }
 0x51e   : > { %6121 = vmatprep.subr.bf16.mxu0 %v6714_v4 }
 0x521   : > { %6122 = vmatpush3.bf16.msra.mxu0 %v6715_v53 }
 0x522   : > { %6123 = vmatprep.subr.bf16.mxu0 %v6718_v57 }
 0x525   : > { %6124 = vmatpush3.bf16.msra.mxu0 %v6719_v62 }
 0x526   : > { %6125 = vmatprep.subr.bf16.mxu0 %v6722_v1 }
 0x529   : > { %6126 = vmatpush3.bf16.msra.mxu0 %v6723_v7 }
 0x52a   : > { %6127 = vmatprep.subr.bf16.mxu0 %v6726_v40 }
 0x52d   : > { %6128 = vmatpush3.bf16.msra.mxu0 %v6727_v27 }
 0x5c3   : > { %v6003_v36 = vpop.f32.mrb[136].mxu0 }
 0x5c4   : > { %v6004_v21 = vpop.f32.mrb[137].mxu0 }
 0x5c5   : > { %v6043_v31 = vpop.f32.mrb[132].mxu1  ;;  %v6005_v22 = vadd.f32 %v6004_v21, %v6003_v36  ;;  %v6006_v3 = vpop.f32.mrb[138].mxu0 }
 0x5c6   : > { %v6044_v23 = vpop.f32.mrb[133].mxu1  ;;  %v6007_v25 = vpop.f32.mrb[139].mxu0 }
 0x5c7   : > { %v3783_v47 = vadd.f32 %v6005_v22, %v5386_v12  ;;  %v6045_v44 = vadd.f32 %v6044_v23, %v6043_v31  ;;  %v6046_v52 = vpop.f32.mrb[134].mxu1  ;;  %v6008_v10 = vadd.f32 %v6007_v25, %v6006_v3 }
 0x5c8   : > { %v6047_v54 = vpop.f32.mrb[135].mxu1 }
 0x5c9   : > { %v3786_v35 = vadd.f32 %v6008_v10, %v5386_v12  ;;  %v6048_v63 = vadd.f32 %v6047_v54, %v6046_v52  ;;  %v3847_v11 = vadd.f32 %v6045_v44, %v3783_v47 }
 0x5cb   : > { %v6009_v30 = vpop.f32.mrb[140].mxu0  ;;  %v3850_v18 = vadd.f32 %v6048_v63, %v3786_v35 }
 0x5cc   : > { %v6010_v50 = vpop.f32.mrb[141].mxu0 }
 0x5cd   : > { %v6049_v24 = vpop.f32.mrb[136].mxu1  ;;  %v6011_v29 = vadd.f32 %v6010_v50, %v6009_v30  ;;  %v6012_v56 = vpop.f32.mrb[142].mxu0 }
 0x5ce   : > { %v6050_v38 = vpop.f32.mrb[137].mxu1  ;;  %v6013_v49 = vpop.f32.mrb[143].mxu0 }
 0x5cf   : > { %v3791_v16 = vadd.f32 %v6011_v29, %v5386_v12  ;;  %v6051_v9 = vadd.f32 %v6050_v38, %v6049_v24  ;;  %v6052_v14 = vpop.f32.mrb[138].mxu1  ;;  %v6014_v39 = vadd.f32 %v6013_v49, %v6012_v56 }
 0x5d0   : > { %v6053_v13 = vpop.f32.mrb[139].mxu1 }
 0x5d1   : > { %v3794_v0 = vadd.f32 %v6014_v39, %v5386_v12  ;;  %v6054_v17 = vadd.f32 %v6053_v13, %v6052_v14  ;;  %v3855_v19 = vadd.f32 %v6051_v9, %v3791_v16 }
 0x5d3   : > { %v6015_v51 = vpop.f32.mrb[144].mxu0  ;;  %v3858_v8 = vadd.f32 %v6054_v17, %v3794_v0 }
 0x5d4   : > { %v6016_v46 = vpop.f32.mrb[145].mxu0 }
 0x5d5   : > { %v6055_v59 = vpop.f32.mrb[140].mxu1  ;;  %v6017_v41 = vadd.f32 %v6016_v46, %v6015_v51  ;;  %v6018_v15 = vpop.f32.mrb[146].mxu0 }
 0x5d6   : > { %v6056_v43 = vpop.f32.mrb[141].mxu1  ;;  %v6019_v32 = vpop.f32.mrb[147].mxu0 }
 0x5d7   : > { %v3799_v4 = vadd.f32 %v6017_v41, %v5386_v12  ;;  %v6057_v42 = vadd.f32 %v6056_v43, %v6055_v59  ;;  %v6058_v53 = vpop.f32.mrb[142].mxu1  ;;  %v6020_v55 = vadd.f32 %v6019_v32, %v6018_v15 }
 0x5d8   : > { %v6059_v57 = vpop.f32.mrb[143].mxu1 }
 0x5d9   : > { %v3802_v20 = vadd.f32 %v6020_v55, %v5386_v12  ;;  %v6060_v62 = vadd.f32 %v6059_v57, %v6058_v53  ;;  %v3863_v28 = vadd.f32 %v6057_v42, %v3799_v4 }
 0x5db   : > { %v6021_v1 = vpop.f32.mrb[148].mxu0  ;;  %v3866_v26 = vadd.f32 %v6060_v62, %v3802_v20 }
 0x5dc   : > { %v6022_v7 = vpop.f32.mrb[149].mxu0 }
 0x5dd   : > { %v6061_v48 = vpop.f32.mrb[144].mxu1  ;;  %v6023_v40 = vadd.f32 %v6022_v7, %v6021_v1  ;;  %v6024_v2 = vpop.f32.mrb[150].mxu0 }
 0x5de   : > { %v6062_v27 = vpop.f32.mrb[145].mxu1  ;;  %v6025_v36 = vpop.f32.mrb[151].mxu0 }
 0x5df   : > { %v3807_v21 = vadd.f32 %v6023_v40, %v5386_v12  ;;  %v6063_v31 = vadd.f32 %v6062_v27, %v6061_v48  ;;  %v6064_v22 = vpop.f32.mrb[146].mxu1 }
 0x5e0   : > { %v6065_v3 = vpop.f32.mrb[147].mxu1 }
 0x5e1   : > { %v3871_v23 = vadd.f32 %v6063_v31, %v3807_v21 }
 0x5e3   : > { %v6369_v25 = vpop.f32.mrb[152].mxu0 }
 0x5e4   : > { %v3919_v47 = vadd.f32 %v6369_v25, %v3855_v19  ;;  %v3910_v44 = vpop.f32.mrb[153].mxu0 }
 0x5e5   : > { %v3911_v52 = vadd.f32 %v3910_v44, %v3847_v11  ;;  %v6370_v10 = vpop.f32.mrb[154].mxu0 }
 0x5e6   : > { %vm3942_vm11 = vcmp.gt.f32.partialorder %v3919_v47, 0.0  ;;  %v3949_v54 = vmul.f32 0.2, %v3919_v47  ;;  %v3922_v35 = vadd.f32 %v6370_v10, %v3858_v8  ;;  %v3913_v63 = vpop.f32.mrb[155].mxu0 }
 0x5e7   : > { %vm3940_vm12 = vcmp.gt.f32.partialorder %v3911_v52, 0.0  ;;  %v3947_v30 = vmul.f32 0.2, %v3911_v52  ;;  %v3914_v50 = vadd.f32 %v3913_v63, %v3850_v18 }
 0x5e8   : > { %v3956_v24 = vsel %vm3942_vm11, %v3919_v47, %v3949_v54  ;;  %vm3943_vm13 = vcmp.gt.f32.partialorder %v3922_v35, 0.0  ;;  %v3950_v29 = vmul.f32 0.2, %v3922_v35 }
 0x5e9   : > { %v3954_v12 = vsel %vm3940_vm12, %v3911_v52, %v3947_v30  ;;  %vm3941_vm14 = vcmp.gt.f32.partialorder %v3914_v50, 0.0  ;;  %v3948_v56 = vmul.f32 0.2, %v3914_v50  ;;  %v3971_v16 = vrot.slane %v3956_v24, 4 }
 0x5ea   : > { %v3968_v38 = vrot.slane %v3954_v12, 4  ;;  %v3957_v49 = vsel %vm3943_vm13, %v3922_v35, %v3950_v29 }
 0x5eb   : > { %v3973_v9 = vrot.slane %v3957_v49, 4  ;;  %v3955_v14 = vsel %vm3941_vm14, %v3914_v50, %v3948_v56  ;;  %v6373_v11 = vpop.f32.mrb[156].mxu0 }
 0x5ec   : > { %v3969_v39 = vrot.slane %v3955_v14, 4  ;;  %v3935_v13 = vadd.f32 %v6373_v11, %v3871_v23  ;;  %v3926_v0 = vpop.f32.mrb[157].mxu0  ;;  %v3989_v17 = vadd.f32 %v3968_v38, %v7757_v6 }
 0x5ed   : > { %v3974_v19 = vsel %vm1179_vm7, %v3971_v16, %v3973_v9  ;;  %v3927_v18 = vadd.f32 %v3926_v0, %v3863_v28  ;;  %v6374_v51 = vpop.f32.mrb[158].mxu0  ;;  %v6728_v0 = vld [vmem:[#allocation5 + $0x600] sm:$0xff]  }
 0x5ee   : > { %v3992_v8 = vadd.f32 %v3974_v19, %v7759_v60  ;;  %v3970_v46 = vsel %vm1179_vm7, %v3968_v38, %v3969_v39  ;;  %v3972_v59 = vsel %vm1179_vm7, %v3969_v39, %v3971_v16  ;;  %v3929_v41 = vpop.f32.mrb[159].mxu0  ;;  %vm3946_vm15 = vcmp.gt.f32.partialorder %v3935_v13, 0.0 }
 0x5ef   : > { %v3990_v15 = vadd.f32 %v3970_v46, %v7761_v5  ;;  %v3991_v43 = vadd.f32 %v3972_v59, %v7755_v45  ;;  %v3953_v32 = vmul.f32 0.2, %v3935_v13  ;;  %vm3944_vm0 = vcmp.gt.f32.partialorder %v3927_v18, 0.0 }
 0x5f0   : > { %v7821_v4 = vmul.f32 0.5, %v3992_v8  ;;  %v3951_v6 = vmul.f32 0.2, %v3927_v18  ;;  %v3930_v42 = vadd.f32 %v3929_v41, %v3866_v26  ;;  %v3997_v53 = vmul.f32 0.5, %v3989_v17  ;;  %v6729_v41 = vld [vmem:[#allocation5 + $0x608] sm:$0xff]  }
 0x5f1   : > { %v7823_v55 = vmul.f32 0.5, %v3990_v15  ;;  %v7825_v60 = vmul.f32 0.5, %v3991_v43  ;;  %v3960_v57 = vsel %vm3946_vm15, %v3935_v13, %v3953_v32  ;;  %v6730_v43 = vld [vmem:[#allocation5 + $0x610] sm:$0xff]  }
 0x5f2   : > { %v3979_v20 = vrot.slane %v3960_v57, 4  ;;  %v3958_v62 = vsel %vm3944_vm0, %v3927_v18, %v3951_v6  ;;  %vm3945_vm5 = vcmp.gt.f32.partialorder %v3930_v42, 0.0  ;;  %v3952_v28 = vmul.f32 0.2, %v3930_v42  ;;  %v6731_v6 = vld [vmem:[#allocation5 + $0x618] sm:$0xff]   ;;  %v6734_v57 = vld [vmem:[#allocation5 + $0x630] sm:$0xff]  }
 0x5f3   : > { %v4005_v5 = vpack.c.bf16 %v7823_v55, %v3997_v53  ;;  %v4006_v45 = vpack.c.bf16 %v7821_v4, %v7825_v60  ;;  %v3975_v1 = vrot.slane %v3958_v62, 4  ;;  %v6733_v53 = vld [vmem:[#allocation5 + $0x628] sm:$0xff]  }
 0x5f4   : > { %v3959_v7 = vsel %vm3945_vm5, %v3930_v42, %v3952_v28  ;;  %v3996_v40 = vadd.f32 %v3979_v20, %v7782_v37  ;;  %v6732_v42 = vld [vmem:[#allocation5 + $0x620] sm:$0xff]  }
 0x5f5   : > { %v3976_v48 = vsel %vm1179_vm7, %v3973_v9, %v3975_v1  ;;  %v3977_v26 = vrot.slane %v3959_v7, 4  ;;  %v4012_v21 = vrot.slane %v4005_v5, 2  ;;  %v4013_v31 = vrot.slane %v4006_v45, 2  ;;  %v6739_v7 = vld [vmem:[#allocation5 + $0x648] sm:$0xff]  }
 0x5f6   : > { %v3993_v2 = vadd.f32 %v3976_v48, %v7786_v58  ;;  %v4018_v23 = vrot.slane %v4005_v5, 4  ;;  %v4019_v25 = vrot.slane %v4006_v45, 4  ;;  %v4004_v47 = vmul.f32 0.5, %v3996_v40  ;;  %v6736_v5 = vld [vmem:[#allocation5 + $0x680] sm:$0xff]  }
 0x5f7   : > { %v3978_v27 = vsel %vm1179_vm7, %v3975_v1, %v3977_v26  ;;  %v3980_v36 = vsel %vm1179_vm7, %v3977_v26, %v3979_v20  ;;  %v4025_v58 = vrot.slane %v4006_v45, 6  ;;  %v6735_v20 = vld [vmem:[#allocation5 + $0x638] sm:$0xff]   ;;  %6158 = vmatprep.subr.bf16.mxu0 %v6736_v5  ;;  %v6737_v45 = vld [vmem:[#allocation5 + $0x640] sm:$0xff]   ;;  %v6738_v1 = vld [vmem:[#allocation5 + $0x688] sm:$0xff]  }
 0x5f8   : > { %v3994_v22 = vadd.f32 %v3978_v27, %v7788_v61  ;;  %v3995_v3 = vadd.f32 %v3980_v36, %v7780_v34  ;;  %v7837_v44 = vmul.f32 0.5, %v3993_v2  ;;  %v4014_v61 = vsel %vm445_vm3, %v4012_v21, %v4013_v31  ;;  %v6740_v48 = vld [vmem:[#allocation5 + $0x700] sm:$0xff]   ;;  %v6741_v26 = vld [vmem:[#allocation5 + $0x690] sm:$0xff]   ;;  %v6744_v27 = vld [vmem:[#allocation5 + $0x708] sm:$0xff]  }
 0x5f9   : > { %v4020_v34 = vsel %vm1179_vm7, %v4018_v23, %v4019_v25  ;;  %v4119_v24 = vrot.slane %v4014_v61, 2  ;;  %v4125_v29 = vrot.slane %v4025_v58, 2  ;;  %v6742_v40 = vld [vmem:[#allocation5 + $0x6c0] sm:$0xff]   ;;  %v6743_v2 = vld [vmem:[#allocation5 + $0x650] sm:$0xff]   ;;  %v6745_v36 = vld [vmem:[#allocation5 + $0x698] sm:$0xff]  }
 0x5fa   : > { %v7839_v52 = vmul.f32 0.5, %v3994_v22  ;;  %v7841_v37 = vmul.f32 0.5, %v3995_v3  ;;  %v4122_v12 = vrot.slane %v4020_v34, 2  ;;  %v6746_v21 = vld [vmem:[#allocation5 + $0x6c8] sm:$0xff]   ;;  %v6748_v22 = vld [vmem:[#allocation5 + $0x710] sm:$0xff]   ;;  %v6749_v3 = vld [vmem:[#allocation5 + $0x6a0] sm:$0xff]  }
 0x5fb   : > { %v6750_v23 = vld [vmem:[#allocation5 + $0x6d0] sm:$0xff]  }
 0x5fc   : > { %v4007_v10 = vpack.c.bf16 %v7839_v52, %v7837_v44  ;;  %v7846_v54 = vpack.c.bf16 %v4004_v47, %v7841_v37  ;;  %v6752_v47 = vld [vmem:[#allocation5 + $0x718] sm:$0xff]   ;;  %v6757_v34 = vld [vmem:[#allocation5 + $0x6b0] sm:$0xff]  }
 0x5fe   : > { %v7850_v35 = vrot.slane %v4007_v10, 2  ;;  %v4026_v63 = vrot.slane %v4007_v10, 6  ;;  %v4021_v30 = vrot.slane %v4007_v10, 4  ;;  %v4028_v50 = vrot.slane %v7846_v54, 6  ;;  %v6754_v10 = vld [vmem:[#allocation5 + $0x6d8] sm:$0xff]  }
 0x5ff   : > { %v4023_v56 = vrot.slane %v7846_v54, 4  ;;  %v4134_v62 = vrot.slane %v7846_v54, 2  ;;  %v6755_v54 = vld [vmem:[#allocation5 + $0x668] sm:$0xff]  }
 0x600   : > { %v4016_v38 = vsel %vm445_vm3, %v4013_v31, %v7850_v35  ;;  %v4027_v49 = vsel %vm1949_vm1, %v4025_v58, %v4026_v63  ;;  %v4022_v16 = vsel %vm1179_vm7, %v4019_v25, %v4021_v30  ;;  %v4128_v9 = vrot.slane %v7850_v35, 2  ;;  %v6747_v31 = vld [vmem:[#allocation5 + $0x658] sm:$0xff]   ;;  %v6751_v25 = vld [vmem:[#allocation5 + $0x660] sm:$0xff]   ;;  %v6753_v58 = vld [vmem:[#allocation5 + $0x6a8] sm:$0xff]  }
 0x601   : > { %v4120_v14 = vrot.slane %v4016_v38, 2  ;;  %v4126_v11 = vrot.slane %v4027_v49, 2  ;;  %v4123_v39 = vrot.slane %v4022_v16, 2  ;;  %v4029_v13 = vsel %vm1949_vm1, %v4026_v63, %v4028_v50  ;;  %v6759_v63 = vld [vmem:[#allocation5 + $0x670] sm:$0xff]   ;;  %v6761_v50 = vld [vmem:[#allocation5 + $0x6b8] sm:$0xff]  }
 0x602   : > { %v4132_v17 = vrot.slane %v4029_v13, 2  ;;  %v4024_v46 = vsel %vm1179_vm7, %v4021_v30, %v4023_v56  ;;  %v4135_v28 = vsel %vm445_vm3, %v7850_v35, %v4134_v62  ;;  %v6760_v30 = vld [vmem:[#allocation5 + $0x728] sm:$0xff]   ;;  %v6765_v56 = vld [vmem:[#allocation5 + $0x6f0] sm:$0xff]   ;;  %v6768_v49 = vld [vmem:[#allocation5 + $0x6f8] sm:$0xff]  }
 0x603   : > { %v4121_v19 = vsel %vm445_vm3, %v4119_v24, %v4120_v14  ;;  %v4127_v18 = vsel %vm445_vm3, %v4125_v29, %v4126_v11  ;;  %v4124_v51 = vsel %vm445_vm3, %v4122_v12, %v4123_v39  ;;  %v4129_v8 = vsel %vm445_vm3, %v4120_v14, %v4128_v9  ;;  %v6762_v24 = vld [vmem:[#allocation5 + $0x6e8] sm:$0xff]   ;;  %v6763_v29 = vld [vmem:[#allocation5 + $0x678] sm:$0xff]   ;;  %v6764_v12 = vld [vmem:[#allocation5 + $0x730] sm:$0xff]  }
 0x604   : > { %4422 = vmatprep.mubr.bf16.mxu1 %v4121_v19  ;;  %4478 = vmatprep.mubr.bf16.mxu0 %v4127_v18  ;;  %v4133_v59 = vsel %vm445_vm3, %v4126_v11, %v4132_v17  ;;  %v4130_v15 = vrot.slane %v4024_v46, 2  ;;  %v5428_v14 = vld [vmem:[%s7976_s4 + $0x4] ss:$0 sm:$0xff] }
 0x605   : > { %4423 = vmatmul.mubr.bf16.vlgmr.msra.gmra.mrb[148].mxu1 %v4014_v61  ;;  %4479 = vmatmul.mubr.bf16.vlgmr.msra.gmra.mrb[160].mxu0 %v4124_v51  ;;  %v6756_v61 = vld [vmem:[#allocation5 + $0x720] sm:$0xff]  }
 0x606   : > { %6376 = vmatpush3.bf16.msra.mxu1 %v6728_v0  ;;  %4430 = vmatprep.mubr.bf16.mxu1 %v4129_v8  ;;  %v4131_v32 = vsel %vm445_vm3, %v4123_v39, %v4130_v15 }
 0x607   : > { %4486 = vmatprep.mubr.bf16.mxu0 %v4133_v59  ;;  %6377 = vmatprep.subr.bf16.mxu1 %v6908_v33 }
 0x608   : > { %6159 = vmatpush3.bf16.msra.mxu0 %v6737_v45 }
 0x609   : > { %6160 = vmatprep.subr.bf16.mxu0 %v6738_v1 }
 0x60a   : > { %6378 = vmatpush3.bf16.msra.mxu1 %v6729_v41 }
 0x60b   : > { %6379 = vmatprep.subr.bf16.mxu1 %v6908_v33 }
 0x60c   : > { %6161 = vmatpush3.bf16.msra.mxu0 %v6739_v7 }
 0x60d   : > { %4431 = vmatmul.mubr.bf16.gmra.mrb[152].mxu1 %v4016_v38  ;;  %4487 = vmatmul.mubr.bf16.gmra.mrb[164].mxu0 %v4131_v32 }
 0x60e   : > { %6380 = vmatpush3.bf16.msra.mxu1 %v6730_v43  ;;  %4438 = vmatprep.mubr.bf16.mxu1 %v4128_v9 }
 0x60f   : > { %4494 = vmatprep.mubr.bf16.mxu0 %v4132_v17  ;;  %6381 = vmatprep.subr.bf16.mxu1 %v6908_v33 }
 0x610   : > { %6162 = vmatprep.subr.bf16.mxu0 %v6741_v26 }
 0x611   : > { %6163 = vmatpush3.bf16.msra.mxu0 %v6743_v2 }
 0x612   : > { %6382 = vmatpush3.bf16.msra.mxu1 %v6731_v6  ;;  %6164 = vmatprep.subr.bf16.mxu0 %v6745_v36 }
 0x613   : > { %6383 = vmatprep.subr.bf16.mxu1 %v6908_v33 }
 0x615   : > { %4439 = vmatmul.mubr.bf16.gmra.mrb[156].mxu1 %v7850_v35  ;;  %4495 = vmatmul.mubr.bf16.gmra.mrb[168].mxu0 %v4130_v15  ;;  %v6758_v35 = vld [vmem:[#allocation5 + $0x6e0] sm:$0xff]  }
 0x616   : > { %6384 = vmatpush3.bf16.msra.mxu1 %v6732_v42  ;;  %6391 = vmatprep.mubr.msk.bf16.mxu1 %vm6909_vm4, %v6908_v33 }
 0x617   : > { %6385 = vmatprep.subr.bf16.mxu1 %v6908_v33  ;;  %6165 = vmatpush3.bf16.msra.mxu0 %v6747_v31 }
 0x618   : > { %6166 = vmatprep.subr.bf16.mxu0 %v6749_v3 }
 0x61a   : > { %6386 = vmatpush3.bf16.msra.mxu1 %v6733_v53 }
 0x61b   : > { %6387 = vmatprep.subr.bf16.mxu1 %v6908_v33  ;;  %6167 = vmatpush3.bf16.msra.mxu0 %v6751_v25 }
 0x61c   : > { %6168 = vmatprep.subr.bf16.mxu0 %v6753_v58 }
 0x61e   : > { %6388 = vmatpush3.bf16.msra.mxu1 %v6734_v57 }
 0x61f   : > { %6389 = vmatprep.subr.bf16.mxu1 %v6908_v33  ;;  %6169 = vmatpush3.bf16.msra.mxu0 %v6755_v54 }
 0x620   : > { %6170 = vmatprep.subr.bf16.mxu0 %v6757_v34 }
 0x622   : > { %6390 = vmatpush3.bf16.msra.mxu1 %v6735_v20 }
 0x623   : > { %6180 = vmatprep.subr.bf16.mxu1 %v6740_v48  ;;  %6171 = vmatpush3.bf16.msra.mxu0 %v6759_v63 }
 0x624   : > { %6172 = vmatprep.subr.bf16.mxu0 %v6761_v50 }
 0x625   : > { %6392 = vmatmul.mubr.bf16.vlgmr.msra.gmra.mrb[160].mxu1 %v4016_v38  ;;  %v6767_v38 = vld [vmem:[#allocation5 + $0x738] sm:$0xff]  }
 0x626   : > { %6395 = vmatprep.mubr.msk.bf16.mxu1 %vm6909_vm4, %v6908_v33  ;;  %6181 = vmatpush3.bf16.msra.mxu1 %v6742_v40 }
 0x627   : > { %6182 = vmatprep.subr.bf16.mxu1 %v6744_v27  ;;  %6173 = vmatpush3.bf16.msra.mxu0 %v6763_v29 }
 0x628   : > { %6403 = vmatprep.subr.bf16.mxu0 %v6908_v33 }
 0x62a   : > { %6183 = vmatpush3.bf16.msra.mxu1 %v6746_v21 }
 0x62b   : > { %6184 = vmatprep.subr.bf16.mxu1 %v6748_v22 }
 0x62d   : > { %6396 = vmatmul.mubr.bf16.gmra.mrb[164].mxu1 %v4135_v28 }
 0x62e   : > { %6399 = vmatprep.mubr.msk.bf16.mxu1 %vm6909_vm4, %v6908_v33  ;;  %6185 = vmatpush3.bf16.msra.mxu1 %v6750_v23 }
 0x62f   : > { %6186 = vmatprep.subr.bf16.mxu1 %v6752_v47 }
 0x632   : > { %6187 = vmatpush3.bf16.msra.mxu1 %v6754_v10 }
 0x633   : > { %6188 = vmatprep.subr.bf16.mxu1 %v6756_v61 }
 0x635   : > { %6400 = vmatmul.mubr.bf16.gmra.mrb[168].mxu1 %v4134_v62 }
 0x636   : > { %6189 = vmatpush3.bf16.msra.mxu1 %v6758_v35 }
 0x637   : > { %6190 = vmatprep.subr.bf16.mxu1 %v6760_v30 }
 0x63a   : > { %6191 = vmatpush3.bf16.msra.mxu1 %v6762_v24 }
 0x63b   : > { %6192 = vmatprep.subr.bf16.mxu1 %v6764_v12 }
 0x63e   : > { %6193 = vmatpush3.bf16.msra.mxu1 %v6765_v56 }
 0x63f   : > { %6194 = vmatprep.subr.bf16.mxu1 %v6767_v38 }
 0x642   : > { %6195 = vmatpush3.bf16.msra.mxu1 %v6768_v49 }
 0x6d8   : > { %v6095_v16 = vpop.f32.mrb[148].mxu1  ;;  %v6129_v9 = vpop.f32.mrb[160].mxu0 }
 0x6d9   : > { %v6096_v11 = vpop.f32.mrb[149].mxu1  ;;  %v6130_v39 = vpop.f32.mrb[161].mxu0 }
 0x6da   : > { %v6097_v13 = vadd.f32 %v6096_v11, %v6095_v16  ;;  %v6131_v0 = vadd.f32 %v6130_v39, %v6129_v9  ;;  %v6098_v17 = vpop.f32.mrb[150].mxu1  ;;  %v6132_v19 = vpop.f32.mrb[162].mxu0 }
 0x6db   : > { %v6099_v18 = vpop.f32.mrb[151].mxu1  ;;  %v6133_v51 = vpop.f32.mrb[163].mxu0 }
 0x6dc   : > { %v4425_v8 = vadd.f32 %v6097_v13, %v5428_v14  ;;  %v6100_v46 = vadd.f32 %v6099_v18, %v6098_v17  ;;  %v6134_v59 = vadd.f32 %v6133_v51, %v6132_v19 }
 0x6de   : > { %v4428_v41 = vadd.f32 %v6100_v46, %v5428_v14  ;;  %v4481_v15 = vadd.f32 %v6131_v0, %v4425_v8 }
 0x6e0   : > { %v6101_v43 = vpop.f32.mrb[152].mxu1  ;;  %v6135_v32 = vpop.f32.mrb[164].mxu0  ;;  %v4484_v6 = vadd.f32 %v6134_v59, %v4428_v41 }
 0x6e1   : > { %v6102_v42 = vpop.f32.mrb[153].mxu1  ;;  %v6136_v53 = vpop.f32.mrb[165].mxu0 }
 0x6e2   : > { %v6103_v57 = vadd.f32 %v6102_v42, %v6101_v43  ;;  %v6137_v20 = vadd.f32 %v6136_v53, %v6135_v32  ;;  %v6104_v62 = vpop.f32.mrb[154].mxu1  ;;  %v6138_v28 = vpop.f32.mrb[166].mxu0 }
 0x6e3   : > { %v6105_v5 = vpop.f32.mrb[155].mxu1  ;;  %v6139_v45 = vpop.f32.mrb[167].mxu0 }
 0x6e4   : > { %v4433_v1 = vadd.f32 %v6103_v57, %v5428_v14  ;;  %v6106_v7 = vadd.f32 %v6105_v5, %v6104_v62  ;;  %v6140_v48 = vadd.f32 %v6139_v45, %v6138_v28 }
 0x6e6   : > { %v4436_v26 = vadd.f32 %v6106_v7, %v5428_v14  ;;  %v4489_v40 = vadd.f32 %v6137_v20, %v4433_v1 }
 0x6e8   : > { %v6107_v2 = vpop.f32.mrb[156].mxu1  ;;  %v6141_v27 = vpop.f32.mrb[168].mxu0  ;;  %v4492_v36 = vadd.f32 %v6140_v48, %v4436_v26 }
 0x6e9   : > { %v6108_v21 = vpop.f32.mrb[157].mxu1  ;;  %v6142_v31 = vpop.f32.mrb[169].mxu0 }
 0x6ea   : > { %v6109_v22 = vadd.f32 %v6108_v21, %v6107_v2  ;;  %v6143_v3 = vadd.f32 %v6142_v31, %v6141_v27  ;;  %v6110_v23 = vpop.f32.mrb[158].mxu1  ;;  %v6144_v25 = vpop.f32.mrb[170].mxu0 }
 0x6eb   : > { %v6111_v47 = vpop.f32.mrb[159].mxu1  ;;  %v6145_v58 = vpop.f32.mrb[171].mxu0 }
 0x6ec   : > { %v4441_v10 = vadd.f32 %v6109_v22, %v5428_v14  ;;  %v6766_v58 = vld [vmem:[#allocation5 + $0x740] sm:$0xff]  }
 0x6ee   : > { %v4497_v54 = vadd.f32 %v6143_v3, %v4441_v10 }
 0x6f8   : > { %v4536_v61 = vpop.f32.mrb[160].mxu1 }
 0x6f9   : > { %v4537_v34 = vadd.f32 %v4536_v61, %v4481_v15  ;;  %v6393_v35 = vpop.f32.mrb[161].mxu1 }
 0x6fa   : > { %v4539_v63 = vpop.f32.mrb[162].mxu1 }
 0x6fb   : > { %vm4558_vm1 = vcmp.gt.f32.partialorder %v4537_v34, 0.0  ;;  %v4563_v30 = vmul.f32 0.2, %v4537_v34  ;;  %v4540_v50 = vadd.f32 %v4539_v63, %v4484_v6  ;;  %v6394_v24 = vpop.f32.mrb[163].mxu1 }
 0x6fc   : > { %v6771_v24 = vld [vmem:[#allocation5 + $0x758] sm:$0xff]  }
 0x6fd   : > { %v4568_v29 = vsel %vm4558_vm1, %v4537_v34, %v4563_v30  ;;  %vm4559_vm6 = vcmp.gt.f32.partialorder %v4540_v50, 0.0  ;;  %v4564_v12 = vmul.f32 0.2, %v4540_v50 }
 0x6fe   : > { %v4578_v56 = vrot.slane %v4568_v29, 4  ;;  %v6772_v29 = vld [vmem:[#allocation5 + $0x760] sm:$0xff]  }
 0x6ff   : > { %v4569_v38 = vsel %vm4559_vm6, %v4540_v50, %v4564_v12  ;;  %v6770_v50 = vld [vmem:[#allocation5 + $0x750] sm:$0xff]   ;;  %v6773_v12 = vld [vmem:[#allocation5 + $0x768] sm:$0xff]  }
 0x700   : > { %v4593_v49 = vadd.f32 %v4578_v56, %v7823_v55  ;;  %v4579_v16 = vrot.slane %v4569_v38, 4  ;;  %v4544_v9 = vpop.f32.mrb[164].mxu1  ;;  %v6774_v38 = vld [vmem:[#allocation5 + $0x770] sm:$0xff]  }
 0x701   : > { %v4545_v11 = vadd.f32 %v4544_v9, %v4489_v40  ;;  %v6397_v14 = vpop.f32.mrb[165].mxu1  ;;  %v6775_v9 = vld [vmem:[#allocation5 + $0x778] sm:$0xff]  }
 0x702   : > { %v4580_v39 = vsel %vm1179_vm7, %v4578_v56, %v4579_v16  ;;  %v4547_v13 = vpop.f32.mrb[166].mxu1  ;;  %v4599_v51 = vmul.f32 0.5, %v4593_v49 }
 0x703   : > { %v4594_v0 = vadd.f32 %v4580_v39, %v7825_v60  ;;  %vm4560_vm8 = vcmp.gt.f32.partialorder %v4545_v11, 0.0  ;;  %v4565_v17 = vmul.f32 0.2, %v4545_v11  ;;  %v4548_v19 = vadd.f32 %v4547_v13, %v4492_v36  ;;  %v6398_v18 = vpop.f32.mrb[167].mxu1 }
 0x705   : > { %v4600_v8 = vmul.f32 0.5, %v4594_v0  ;;  %v4570_v46 = vsel %vm4560_vm8, %v4545_v11, %v4565_v17  ;;  %vm4561_vm10 = vcmp.gt.f32.partialorder %v4548_v19, 0.0  ;;  %v4566_v59 = vmul.f32 0.2, %v4548_v19 }
 0x706   : > { %v4581_v41 = vrot.slane %v4570_v46, 4 }
 0x707   : > { %v4571_v55 = vsel %vm4561_vm10, %v4548_v19, %v4566_v59  ;;  %v4605_v15 = vpack.c.bf16 %v4600_v8, %v4599_v51  ;;  %v5470_v8 = vld [vmem:[%s7976_s4 + $0x5] ss:$0 sm:$0xff] }
 0x708   : > { %v4582_v43 = vsel %vm1179_vm7, %v4579_v16, %v4581_v41  ;;  %v4583_v32 = vrot.slane %v4571_v55, 4  ;;  %v4552_v6 = vpop.f32.mrb[168].mxu1 }
 0x709   : > { %v4595_v42 = vadd.f32 %v4582_v43, %v7821_v4  ;;  %v4553_v53 = vadd.f32 %v4552_v6, %v4497_v54  ;;  %v6401_v60 = vpop.f32.mrb[169].mxu1  ;;  %v4610_v27 = vrot.slane %v4605_v15, 3  ;;  %v4710_v47 = vrot.slane %v4605_v15, 2 }
 0x70a   : > { %v4584_v57 = vsel %vm1179_vm7, %v4581_v41, %v4583_v32  ;;  %v4555_v20 = vpop.f32.mrb[170].mxu1 }
 0x70b   : > { %v4596_v62 = vadd.f32 %v4584_v57, %v7837_v44  ;;  %vm4562_vm11 = vcmp.gt.f32.partialorder %v4553_v53, 0.0  ;;  %v4567_v28 = vmul.f32 0.2, %v4553_v53  ;;  %v6402_v5 = vpop.f32.mrb[171].mxu1  ;;  %v7895_v45 = vmul.f32 0.5, %v4595_v42 }
 0x70d   : > { %v7897_v1 = vmul.f32 0.5, %v4596_v62  ;;  %v4572_v7 = vsel %vm4562_vm11, %v4553_v53, %v4567_v28 }
 0x70e   : > { %v4585_v48 = vrot.slane %v4572_v7, 4 }
 0x70f   : > { %v4606_v26 = vpack.c.bf16 %v7897_v1, %v7895_v45 }
 0x710   : > { %v4586_v4 = vsel %vm1179_vm7, %v4583_v32, %v4585_v48  ;;  %v4598_v40 = vadd.f32 %v4585_v48, %v7841_v37 }
 0x711   : > { %v4597_v2 = vadd.f32 %v4586_v4, %v7839_v52  ;;  %v4611_v44 = vrot.slane %v4606_v26, 3  ;;  %v4711_v3 = vrot.slane %v4606_v26, 2  ;;  %v4615_v37 = vrot.slane %v4606_v26, 1  ;;  %v6769_v52 = vld [vmem:[#allocation5 + $0x748] sm:$0xff]  }
 0x712   : > { %v4604_v36 = vmul.f32 0.5, %v4598_v40  ;;  %v4618_v49 = vrot.slane %v4606_v26, 4 }
 0x713   : > { %v4603_v21 = vmul.f32 0.5, %v4597_v2  ;;  %v4612_v31 = vsel %vm1158_vm9, %v4610_v27, %v4611_v44  ;;  %v4714_v22 = vrot.slane %v4611_v44, 2  ;;  %v4712_v54 = vsel %vm445_vm3, %v4710_v47, %v4711_v3 }
 0x714   : > { %v4713_v23 = vrot.slane %v4612_v31, 2 }
 0x715   : > { %v4607_v25 = vpack.c.bf16 %v4604_v36, %v4603_v21 }
 0x716   : > { %v4715_v10 = vsel %vm445_vm3, %v4713_v23, %v4714_v22 }
 0x717   : > { %5001 = vmatprep.mubr.bf16.mxu0 %v4715_v10  ;;  %v4616_v61 = vrot.slane %v4607_v25, 1  ;;  %v4619_v56 = vrot.slane %v4607_v25, 4 }
 0x718   : > { %5002 = vmatmul.mubr.bf16.vlgmr.msra.gmra.mrb[172].mxu0 %v4712_v54 }
 0x719   : > { %6404 = vmatpush3.bf16.msra.mxu0 %v6766_v58  ;;  %v4617_v34 = vsel %vm381_vm2, %v4615_v37, %v4616_v61  ;;  %v4719_v35 = vrot.slane %v4616_v61, 2  ;;  %6419 = vmatprep.mubr.msk.bf16.mxu0 %vm6909_vm4, %v6908_v33  ;;  %v4620_v16 = vsel %vm1179_vm7, %v4618_v49, %v4619_v56  ;;  %v4722_v14 = vrot.slane %v4619_v56, 2 }
 0x71a   : > { %6405 = vmatprep.subr.bf16.mxu0 %v6908_v33  ;;  %v4718_v63 = vrot.slane %v4617_v34, 2  ;;  %v4721_v11 = vrot.slane %v4620_v16, 2 }
 0x71c   : > { %v4720_v30 = vsel %vm445_vm3, %v4718_v63, %v4719_v35  ;;  %v4723_v39 = vsel %vm445_vm3, %v4721_v11, %v4722_v14 }
 0x71d   : > { %6406 = vmatpush3.bf16.msra.mxu0 %v6769_v52  ;;  %5042 = vmatprep.mubr.bf16.mxu1 %v4720_v30 }
 0x71e   : > { %5043 = vmatmul.mubr.bf16.vlgmr.msra.gmra.mrb[172].mxu1 %v4606_v26  ;;  %6407 = vmatprep.subr.bf16.mxu0 %v6908_v33 }
 0x721   : > { %6408 = vmatpush3.bf16.msra.mxu0 %v6770_v50 }
 0x722   : > { %6409 = vmatprep.subr.bf16.mxu0 %v6908_v33 }
 0x725   : > { %6410 = vmatpush3.bf16.msra.mxu0 %v6771_v24 }
 0x726   : > { %6411 = vmatprep.subr.bf16.mxu0 %v6908_v33 }
 0x729   : > { %6412 = vmatpush3.bf16.msra.mxu0 %v6772_v29 }
 0x72a   : > { %6413 = vmatprep.subr.bf16.mxu0 %v6908_v33 }
 0x72d   : > { %6414 = vmatpush3.bf16.msra.mxu0 %v6773_v12 }
 0x72e   : > { %6415 = vmatprep.subr.bf16.mxu0 %v6908_v33 }
 0x731   : > { %6416 = vmatpush3.bf16.msra.mxu0 %v6774_v38 }
 0x732   : > { %6417 = vmatprep.subr.bf16.mxu0 %v6908_v33 }
 0x735   : > { %6418 = vmatpush3.bf16.msra.mxu0 %v6775_v9 }
 0x738   : > { %6420 = vmatmul.mubr.bf16.vlgmr.msra.gmra.mrb[176].mxu0 %v4723_v39 }
 0x7eb   : > { %v6174_v13 = vpop.f32.mrb[172].mxu0 }
 0x7ec   : > { %v6175_v0 = vpop.f32.mrb[173].mxu0 }
 0x7ed   : > { %v6176_v17 = vadd.f32 %v6175_v0, %v6174_v13  ;;  %v6177_v19 = vpop.f32.mrb[174].mxu0 }
 0x7ee   : > { %v6178_v18 = vpop.f32.mrb[175].mxu0 }
 0x7ef   : > { %v6179_v51 = vadd.f32 %v6178_v18, %v6177_v19  ;;  %v5004_v41 = vadd.f32 %v6176_v17, %v5470_v8 }
 0x7f1   : > { %v6196_v46 = vpop.f32.mrb[172].mxu1  ;;  %v5007_v43 = vadd.f32 %v6179_v51, %v5470_v8 }
 0x7f2   : > { %v6197_v59 = vpop.f32.mrb[173].mxu1 }
 0x7f3   : > { %v6198_v33 = vadd.f32 %v6197_v59, %v6196_v46  ;;  %v6199_v55 = vpop.f32.mrb[174].mxu1 }
 0x7f4   : > { %v6200_v15 = vpop.f32.mrb[175].mxu1 }
 0x7f5   : > { %v6201_v32 = vadd.f32 %v6200_v15, %v6199_v55  ;;  %v5045_v6 = vadd.f32 %v6198_v33, %v5004_v41 }
 0x7f7   : > { %v5048_v42 = vadd.f32 %v6201_v32, %v5007_v43 }
 0x80b   : > { %v5085_v53 = vpop.f32.mrb[176].mxu0 }
 0x80c   : > { %v5086_v60 = vadd.f32 %v5085_v53, %v5045_v6  ;;  %v6421_v57 = vpop.f32.mrb[177].mxu0 }
 0x80d   : > { %v5088_v20 = vpop.f32.mrb[178].mxu0 }
 0x80e   : > { %vm5092_vm2 = vcmp.gt.f32.partialorder %v5086_v60, 0.0  ;;  %v5094_v62 = vmul.f32 0.2, %v5086_v60  ;;  %v5089_v28 = vadd.f32 %v5088_v20, %v5048_v42  ;;  %v6422_v5 = vpop.f32.mrb[179].mxu0 }
 0x810   : > { %v5096_v7 = vsel %vm5092_vm2, %v5086_v60, %v5094_v62  ;;  %vm5093_vm3 = vcmp.gt.f32.partialorder %v5089_v28, 0.0  ;;  %v5095_v48 = vmul.f32 0.2, %v5089_v28 }
 0x811   : > { %v5098_v26 = vadd.f32 %v5096_v7, %v7895_v45 }
 0x812   : > { %v5097_v4 = vsel %vm5093_vm3, %v5089_v28, %v5095_v48 }
 0x813   : > { %v5099_v40 = vadd.f32 %v5097_v4, %v7897_v1  ;;  %v5100_v2 = vmul.f32 0.5, %v5098_v26 }
 0x815   : > { %v5101_v27 = vmul.f32 0.5, %v5099_v40 }
 0x817   : > { %v5102_v44 = vadd.f32 %v5101_v27, %v5100_v2 }
 0x819   : > { %v5103_v36 = vrot.slane %v5102_v44, 4 }
 0x81b   : > { %v5104_v21 = vadd.f32 %v5103_v36, %v5102_v44 }
 0x81d   : > { %v5105_v31 = vrot.slane %v5104_v21, 2 }
 0x81f   : > { %v5106_v22 = vadd.f32 %v5105_v31, %v5104_v21 }
 0x821   : > { %v5107_v3 = vrot.slane %v5106_v22, 1 }
 0x823   : > { %v5108_v23 = vadd.f32 %v5107_v3, %v5106_v22 }
 0x825   : > { %v5110_v25 = vmul.f32 0.0625, %v5108_v23 }
 0x827   : > { %5111 = vst [vmem:[%s246_s9] sm:$0x1] %v5110_v25 }
 0x828   : > { %6845 = shalt.err (!%p6842_p11)
}
 0x829   : > { %s6846_s23 = scalar_lea.hbm %s7930_s14, 16  ;;  %s6850_s8 = scalar_lea.hbm %s7977_s5, 32 }
 0x82a   : > { %p6847_p13 = scmp.ne.s32.totalorder %s7930_s14, %s6846_s23  ;;  %p6851_p6 = scmp.lt.u32.totalorder %s7930_s14, %s7977_s5 }
 0x82b   : > { %p6852_p9 = scmp.lt.u32.totalorder %s6850_s8, %s6846_s23  ;;  %p6854_p10 = scmp.lt.u32.totalorder %s6846_s23, %s7930_s14 }
 0x82c   : > { %p6848_p5 = pnand %p6847_p13, %p7990_p1 }
 0x82d   : > { %p6853_p12 = por %p6852_p9, %p6851_p6 }
 0x82e   : > { %p6849_p0 = pneg %p6848_p5 }
 0x82f   : > { %p6855_p2 = por %p6854_p10, %p6853_p12 }
 0x831   : > { %p6856_p3 = pnand %p6855_p2, %p6849_p0 }
 0x833   : > { %6859 = shalt.err (!%p6856_p3)
}
 0x834   : > { %6432 = dma.vmem_to_hbm [thread:$0]  (%p7990_p1), %s7932_s11, 16, %s7930_s14, %s5113_s15  }
 0x835 PF: > { %p6449_p4 = scmp.ge.s32.totalorder %s6902_s21, 2  ;;  %s5137_s26 = sand.u32 1, %s6890_s18  }
 0x836   : > { %p7991_p7 = scmp.ne.s32.totalorder %s7982_s29, 0  ;;  %s5138_s9 = scalar_lea.sflag [#allocation4], %s5137_s26 }
 0x838   : > { %p6442_p8 = pnand %p6449_p4, %p7991_p7 }
 0x83a   : > { %6885 = dma.done.wait (!%p6442_p8), %s5138_s9, 16  }
 0x83b   : > { %6887 = vsyncadd (!%p6442_p8), %s5138_s9, 4294967280  ;;  %p17_p11 = scmp.ge.s32.totalorder %s6966_s24, 4   ;;  %s7992_s18 = smov %s6894_s19 }
 0x83c   : > { %s7993_s19 = smov %s6898_s20  ;;  %s7994_s20 = smov %s6977_s27 }
 0x83d   : > { %s7995_s21 = smov %s6966_s24  ;;  %19 = sbr.rel (!%p17_p11) target bundleno = 5 (0x5), region = 94 }
 0x844   :  { %5142 = vsyncpa [#allocation3], 1 }
 0x845   :  { %5144 = vsyncpa [#allocation3 + $0x1], 1 }
 0x846   :  { %5145 = vsyncpa [#allocation6], 1 }
 0x847   :  { %5146 = vsyncpa [#allocation4], 1 }
 0x848   :  { %5148 = vsyncpa [#allocation4 + $0x1], 1 }

</bundles_post_ra>
